<compile_context>
chip_gen: v6e
topology: v6e:2x2x1
jax: 0.10.0
libtpu: 0.0.40
codegen_flags: <defaults>
</compile_context>

<pallas_src>
import jax
import jax.numpy as jnp
from jax.experimental import pallas as pl
from jax.experimental.pallas import tpu as pltpu

# ----- model hyper-parameters (match the PyTorch module defaults) -----
D_MODEL = 64
NHEAD = 4
NUM_LAYERS = 2
DIM_FF = 256
MAX_SEQ_LEN = 100
INPUT_DIM = 3
OUTDIM = 6
HEAD_DIM = D_MODEL // NHEAD
SCALE = 1.0 / (HEAD_DIM ** 0.5)
LN_EPS = 1e-5
NEG_INF = -1e9

# ----- packing layout constants -----
IN_PAD = 8        # src/tgt feature columns zero-padded to 8 lanes
OUT_PAD = 8       # fused heads output width: 6 point dims + 1 eos + 1 pad
SLAB_W = 256      # column width of per-layer weight slabs
R_ENC = 448       # encoder slab rows:  wqkv(64)+wo(64)+w1(64)+w2(256)
R_DEC = 640       # decoder slab rows:  sa_wqkv,sa_wo,ca_wq,ca_wkv,ca_wo,w1(64 ea)+w2(256)
V_ENC = 8         # encoder bias/LN rows
V_DEC = 16        # decoder bias/LN rows (13 used, padded to 16)
EMB_W_ROWS = 96   # seg_w region(16) + pts_w region(16) + heads_w(64)
EMB_V_ROWS = 8    # seg_b, pts_b, heads_b (padded)


# ====================== in-kernel building blocks (traced inside the kernel) ======================

def _layernorm(x, g, b):
    # f32 math (v5e VPU has no bf16)
    mean = jnp.mean(x, axis=-1, keepdims=True)
    var = jnp.mean((x - mean) ** 2, axis=-1, keepdims=True)
    return (x - mean) * jax.lax.rsqrt(var + LN_EPS) * g + b


def _mha(q, k, v, wo, bo, mask):
    """All-head attention for one batch element.

    q: (Sq, D) f32, k/v: (Sk, D) f32, wo: (D, D) bf16, bo: (1, D) f32,
    mask: (Sq, Sk) f32 additive mask or None.
    Per-head softmax(q k^T * scale) v outputs are concatenated and projected with
    a SINGLE K=64 matmul (review item: no 4x zero-padded K=16 MXU pushes).
    """
    heads = []
    for h in range(NHEAD):                               # static unroll, still one kernel
        lo = h * HEAD_DIM
        qh = (q[:, lo:lo + HEAD_DIM] * SCALE).astype(jnp.bfloat16)
        kh = k[:, lo:lo + HEAD_DIM].astype(jnp.bfloat16)
        vh = v[:, lo:lo + HEAD_DIM].astype(jnp.bfloat16)
        # scores = qh @ kh^T (contract head_dim, no explicit transpose)
        s = jax.lax.dot_general(qh, kh, (((1,), (1,)), ((), ())),
                                preferred_element_type=jnp.float32)
        if mask is not None:
            s = s + mask
        m = jnp.max(s, axis=-1, keepdims=True)
        p = jnp.exp(s - m)
        p = p * pl.reciprocal(jnp.sum(p, axis=-1, keepdims=True), approx=True)
        heads.append(jnp.dot(p.astype(jnp.bfloat16), vh,
                             preferred_element_type=jnp.float32))
    ctx = jnp.concatenate(heads, axis=-1)                # (Sq, D)
    return jnp.dot(ctx.astype(jnp.bfloat16), wo,
                   preferred_element_type=jnp.float32) + bo


def _ffn(x, w1, b1, w2, b2):
    h = jnp.dot(x.astype(jnp.bfloat16), w1, preferred_element_type=jnp.float32) + b1
    h = jnp.maximum(h, 0.0)
    return jnp.dot(h.astype(jnp.bfloat16), w2, preferred_element_type=jnp.float32) + b2


def _encoder_layer(x, w_ref, v_ref, l):
    D = D_MODEL
    wqkv = w_ref[l, 0:64, 0:3 * D]
    wo = w_ref[l, 64:128, 0:D]
    w1 = w_ref[l, 128:192, 0:DIM_FF]
    w2 = w_ref[l, 192:448, 0:D]
    bqkv = v_ref[l, 0:1, 0:3 * D]
    bo = v_ref[l, 1:2, 0:D]
    ln1_g = v_ref[l, 2:3, 0:D]
    ln1_b = v_ref[l, 3:4, 0:D]
    b1 = v_ref[l, 4:5, 0:DIM_FF]
    b2 = v_ref[l, 5:6, 0:D]
    ln2_g = v_ref[l, 6:7, 0:D]
    ln2_b = v_ref[l, 7:8, 0:D]

    qkv = jnp.dot(x.astype(jnp.bfloat16), wqkv,
                  preferred_element_type=jnp.float32) + bqkv
    q, k, v = qkv[:, :D], qkv[:, D:2 * D], qkv[:, 2 * D:]
    x = _layernorm(x + _mha(q, k, v, wo, bo, None), ln1_g, ln1_b)    # post-norm
    y = _ffn(x, w1, b1, w2, b2)
    return _layernorm(x + y, ln2_g, ln2_b)


def _decoder_layer(x, mem, mask, w_ref, v_ref, l):
    D = D_MODEL
    sa_wqkv = w_ref[l, 0:64, 0:3 * D]
    sa_wo = w_ref[l, 64:128, 0:D]
    ca_wq = w_ref[l, 128:192, 0:D]
    ca_wkv = w_ref[l, 192:256, 0:2 * D]
    ca_wo = w_ref[l, 256:320, 0:D]
    w1 = w_ref[l, 320:384, 0:DIM_FF]
    w2 = w_ref[l, 384:640, 0:D]

    sa_bqkv = v_ref[l, 0:1, 0:3 * D]
    sa_bo = v_ref[l, 1:2, 0:D]
    ln1_g = v_ref[l, 2:3, 0:D]
    ln1_b = v_ref[l, 3:4, 0:D]
    ca_bq = v_ref[l, 4:5, 0:D]
    ca_bkv = v_ref[l, 5:6, 0:2 * D]
    ca_bo = v_ref[l, 6:7, 0:D]
    ln2_g = v_ref[l, 7:8, 0:D]
    ln2_b = v_ref[l, 8:9, 0:D]
    b1 = v_ref[l, 9:10, 0:DIM_FF]
    b2 = v_ref[l, 10:11, 0:D]
    ln3_g = v_ref[l, 11:12, 0:D]
    ln3_b = v_ref[l, 12:13, 0:D]

    # causal self-attention
    qkv = jnp.dot(x.astype(jnp.bfloat16), sa_wqkv,
                  preferred_element_type=jnp.float32) + sa_bqkv
    q, k, v = qkv[:, :D], qkv[:, D:2 * D], qkv[:, 2 * D:]
    x = _layernorm(x + _mha(q, k, v, sa_wo, sa_bo, mask), ln1_g, ln1_b)
    # cross-attention over encoder memory
    q = jnp.dot(x.astype(jnp.bfloat16), ca_wq,
                preferred_element_type=jnp.float32) + ca_bq
    kv = jnp.dot(mem.astype(jnp.bfloat16), ca_wkv,
                 preferred_element_type=jnp.float32) + ca_bkv
    k, v = kv[:, :D], kv[:, D:]
    x = _layernorm(x + _mha(q, k, v, ca_wo, ca_bo, None), ln2_g, ln2_b)
    # feed-forward
    y = _ffn(x, w1, b1, w2, b2)
    return _layernorm(x + y, ln3_g, ln3_b)


# ====================== the single fused kernel ======================

def _forward_kernel(src_ref, tgt_ref, pe_ref, embw_ref, embv_ref,
                    encw_ref, encv_ref, decw_ref, decv_ref, out_ref):
    # ---- source embedding ----
    src = src_ref[0]                                           # (S, IN_PAD) f32
    mem = (jnp.dot(src.astype(jnp.bfloat16), embw_ref[0:IN_PAD, :],
                   preferred_element_type=jnp.float32) + embv_ref[0:1, :])
    # ---- encoder stack (static unroll) ----
    for l in range(NUM_LAYERS):
        mem = _encoder_layer(mem, encw_ref, encv_ref, l)
    # ---- target embedding + positional encoding ----
    tgt = tgt_ref[0]                                           # (T, IN_PAD) f32
    x = (jnp.dot(tgt.astype(jnp.bfloat16), embw_ref[16:16 + IN_PAD, :],
                 preferred_element_type=jnp.float32)
         + embv_ref[1:2, :] + pe_ref[0])
    # ---- causal mask generated in-kernel (no (T,T) input DMA) ----
    T = x.shape[0]
    row = jax.lax.broadcasted_iota(jnp.int32, (T, T), 0)
    col = jax.lax.broadcasted_iota(jnp.int32, (T, T), 1)
    mask = jnp.where(col > row, NEG_INF, 0.0).astype(jnp.float32)
    # ---- decoder stack (static unroll) ----
    for l in range(NUM_LAYERS):
        x = _decoder_layer(x, mem, mask, decw_ref, decv_ref, l)
    # ---- fused output heads: [points | eos | pad] in one lane-dense store ----
    slab = (jnp.dot(x.astype(jnp.bfloat16), embw_ref[32:96, 0:OUT_PAD],
                    preferred_element_type=jnp.float32)
            + embv_ref[2:3, 0:OUT_PAD])
    cid = jax.lax.broadcasted_iota(jnp.int32, slab.shape, 1)
    sig = 1.0 / (1.0 + jnp.exp(-slab))                         # sigmoid (EUP exp + vrcp)
    out_ref[0] = jnp.where(cid == OUTDIM, sig, slab)


# ====================== host-side wrapper ======================

def point_transformer_forward(params, src_points, tgt_points):
    B, S, _ = src_points.shape
    # decoder input: prepend SOS then embed in-kernel
    sos = jnp.zeros((B, 1, OUTDIM), jnp.float32)
    tgt = jnp.concatenate([sos, tgt_points], axis=1)           # (B, T, OUTDIM)
    T = tgt.shape[1]
    # lane-pad the tiny feature dims (3 / 6 -> 8); padded cols hit zero weight rows
    src_pad = jnp.pad(src_points, ((0, 0), (0, 0), (0, IN_PAD - INPUT_DIM)))
    tgt_pad = jnp.pad(tgt, ((0, 0), (0, 0), (0, IN_PAD - OUTDIM)))
    pe = jax.lax.slice(params["pos_enc"], (0, 0, 0), (1, T, D_MODEL))

    slab = pl.pallas_call(
        _forward_kernel,
        out_shape=jax.ShapeDtypeStruct((B, T, OUT_PAD), jnp.float32),
        grid=(B,),
        in_specs=[
            pl.BlockSpec((1, S, IN_PAD), lambda b: (b, 0, 0)),
            pl.BlockSpec((1, T, IN_PAD), lambda b: (b, 0, 0)),
            pl.BlockSpec((1, T, D_MODEL), lambda b: (0, 0, 0)),
            pl.BlockSpec((EMB_W_ROWS, D_MODEL), lambda b: (0, 0)),
            pl.BlockSpec((EMB_V_ROWS, D_MODEL), lambda b: (0, 0)),
            pl.BlockSpec((NUM_LAYERS, R_ENC, SLAB_W), lambda b: (0, 0, 0)),
            pl.BlockSpec((NUM_LAYERS, V_ENC, SLAB_W), lambda b: (0, 0, 0)),
            pl.BlockSpec((NUM_LAYERS, R_DEC, SLAB_W), lambda b: (0, 0, 0)),
            pl.BlockSpec((NUM_LAYERS, V_DEC, SLAB_W), lambda b: (0, 0, 0)),
        ],
        out_specs=pl.BlockSpec((1, T, OUT_PAD), lambda b: (b, 0, 0)),
        compiler_params=pltpu.CompilerParams(dimension_semantics=("parallel",)),
    )(src_pad, tgt_pad, pe,
      params["emb_w"], params["emb_v"],
      params["enc_w"], params["enc_v"], params["dec_w"], params["dec_v"])

    output_points = slab[..., :OUTDIM]
    eos_probs = slab[..., OUTDIM:OUTDIM + 1]
    return output_points, eos_probs


# ====================== deterministic parameter init & packing ======================

def sinusoidal_positional_encoding(max_seq_len, d_model):
    pos = jnp.arange(max_seq_len, dtype=jnp.float32)[:, None]
    i = jnp.arange(0, d_model, 2, dtype=jnp.float32)
    angle_rates = 1.0 / (10000.0 ** (i / d_model))
    angle_rads = pos * angle_rates
    pe = jnp.zeros((max_seq_len, d_model), jnp.float32)
    pe = pe.at[:, 0::2].set(jnp.sin(angle_rads))
    pe = pe.at[:, 1::2].set(jnp.cos(angle_rads))
    return pe[None]                                            # (1, max_seq_len, d_model)


def init_linear(key, in_dim, out_dim):
    k1, k2 = jax.random.split(key)
    bound = 1.0 / (in_dim ** 0.5)
    w = jax.random.uniform(k1, (in_dim, out_dim), jnp.float32, -bound, bound)
    b = jax.random.uniform(k2, (1, out_dim), jnp.float32, -bound, bound)
    return w, b


def _pad2(x, rows, cols):
    r, c = x.shape
    return jnp.pad(x, ((0, rows - r), (0, cols - c)))


def _ln_pair():
    return jnp.ones((1, D_MODEL), jnp.float32), jnp.zeros((1, D_MODEL), jnp.float32)


def init_encoder_layer_raw(key):
    ks = jax.random.split(key, 6)
    wq, bq = init_linear(ks[0], D_MODEL, D_MODEL)
    wk, bk = init_linear(ks[1], D_MODEL, D_MODEL)
    wv, bv = init_linear(ks[2], D_MODEL, D_MODEL)
    wo, bo = init_linear(ks[3], D_MODEL, D_MODEL)
    w1, b1 = init_linear(ks[4], D_MODEL, DIM_FF)
    w2, b2 = init_linear(ks[5], DIM_FF, D_MODEL)
    g1, z1 = _ln_pair()
    g2, z2 = _ln_pair()
    return dict(wqkv=jnp.concatenate([wq, wk, wv], 1),
                bqkv=jnp.concatenate([bq, bk, bv], 1),
                wo=wo, bo=bo, w1=w1, b1=b1, w2=w2, b2=b2,
                ln1_g=g1, ln1_b=z1, ln2_g=g2, ln2_b=z2)


def init_decoder_layer_raw(key):
    ks = jax.random.split(key, 10)
    wq, bq = init_linear(ks[0], D_MODEL, D_MODEL)
    wk, bk = init_linear(ks[1], D_MODEL, D_MODEL)
    wv, bv = init_linear(ks[2], D_MODEL, D_MODEL)
    wo, bo = init_linear(ks[3], D_MODEL, D_MODEL)
    cwq, cbq = init_linear(ks[4], D_MODEL, D_MODEL)
    cwk, cbk = init_linear(ks[5], D_MODEL, D_MODEL)
    cwv, cbv = init_linear(ks[6], D_MODEL, D_MODEL)
    cwo, cbo = init_linear(ks[7], D_MODEL, D_MODEL)
    w1, b1 = init_linear(ks[8], D_MODEL, DIM_FF)
    w2, b2 = init_linear(ks[9], DIM_FF, D_MODEL)
    g1, z1 = _ln_pair()
    g2, z2 = _ln_pair()
    g3, z3 = _ln_pair()
    return dict(sa_wqkv=jnp.concatenate([wq, wk, wv], 1),
                sa_bqkv=jnp.concatenate([bq, bk, bv], 1),
                sa_wo=wo, sa_bo=bo,
                ca_wq=cwq, ca_bq=cbq,
                ca_wkv=jnp.concatenate([cwk, cwv], 1),
                ca_bkv=jnp.concatenate([cbk, cbv], 1),
                ca_wo=cwo, ca_bo=cbo,
                w1=w1, b1=b1, w2=w2, b2=b2,
                ln1_g=g1, ln1_b=z1, ln2_g=g2, ln2_b=z2, ln3_g=g3, ln3_b=z3)


def pack_encoder_layers(layers):
    ws, vs = [], []
    for p in layers:
        ws.append(jnp.concatenate([
            _pad2(p["wqkv"], 64, SLAB_W), _pad2(p["wo"], 64, SLAB_W),
            _pad2(p["w1"], 64, SLAB_W), _pad2(p["w2"], 256, SLAB_W)], axis=0))
        vs.append(jnp.concatenate(
            [_pad2(p[n], 1, SLAB_W) for n in
             ("bqkv", "bo", "ln1_g", "ln1_b", "b1", "b2", "ln2_g", "ln2_b")], axis=0))
    return jnp.stack(ws).astype(jnp.bfloat16), jnp.stack(vs)


def pack_decoder_layers(layers):
    ws, vs = [], []
    for p in layers:
        ws.append(jnp.concatenate([
            _pad2(p["sa_wqkv"], 64, SLAB_W), _pad2(p["sa_wo"], 64, SLAB_W),
            _pad2(p["ca_wq"], 64, SLAB_W), _pad2(p["ca_wkv"], 64, SLAB_W),
            _pad2(p["ca_wo"], 64, SLAB_W),
            _pad2(p["w1"], 64, SLAB_W), _pad2(p["w2"], 256, SLAB_W)], axis=0))
        v = jnp.concatenate(
            [_pad2(p[n], 1, SLAB_W) for n in
             ("sa_bqkv", "sa_bo", "ln1_g", "ln1_b",
              "ca_bq", "ca_bkv", "ca_bo", "ln2_g", "ln2_b",
              "b1", "b2", "ln3_g", "ln3_b")], axis=0)
        vs.append(_pad2(v, V_DEC, SLAB_W))
    return jnp.stack(ws).astype(jnp.bfloat16), jnp.stack(vs)


def init_params(key):
    ks = jax.random.split(key, 4 + 2 * NUM_LAYERS)
    seg_w, seg_b = init_linear(ks[0], INPUT_DIM, D_MODEL)
    pts_w, pts_b = init_linear(ks[1], OUTDIM, D_MODEL)
    out_w, out_b = init_linear(ks[2], D_MODEL, OUTDIM)
    eos_w, eos_b = init_linear(ks[3], D_MODEL, 1)
    enc_raw = [init_encoder_layer_raw(ks[4 + i]) for i in range(NUM_LAYERS)]
    dec_raw = [init_decoder_layer_raw(ks[4 + NUM_LAYERS + i]) for i in range(NUM_LAYERS)]

    heads_w = jnp.concatenate([out_w, eos_w], axis=1)          # (64, 7)
    heads_b = jnp.concatenate([out_b, eos_b], axis=1)          # (1, 7)

    # embedding / heads slab: rows 0:16 seg_w (3 used), 16:32 pts_w (6 used), 32:96 heads_w
    emb_w = jnp.concatenate([
        _pad2(seg_w, 16, D_MODEL),
        _pad2(pts_w, 16, D_MODEL),
        _pad2(heads_w, 64, D_MODEL),
    ], axis=0).astype(jnp.bfloat16)                            # (96, 64) bf16
    emb_v = _pad2(jnp.concatenate([
        _pad2(seg_b, 1, D_MODEL),
        _pad2(pts_b, 1, D_MODEL),
        _pad2(heads_b, 1, D_MODEL),
    ], axis=0), EMB_V_ROWS, D_MODEL)                           # (8, 64) f32

    enc_w, enc_v = pack_encoder_layers(enc_raw)                # (L,448,256) bf16 / (L,8,256) f32
    dec_w, dec_v = pack_decoder_layers(dec_raw)                # (L,640,256) bf16 / (L,16,256) f32

    return dict(emb_w=emb_w, emb_v=emb_v,
                enc_w=enc_w, enc_v=enc_v, dec_w=dec_w, dec_v=dec_v,
                pos_enc=sinusoidal_positional_encoding(MAX_SEQ_LEN, D_MODEL))


# ====================== main ======================

if __name__ == "__main__":
    root = jax.random.PRNGKey(0)
    k_params, k_src, k_tgt = jax.random.split(root, 3)

    params = init_params(k_params)

    B, S, T_in = 2, 8, 8
    src_points = jax.random.normal(k_src, (B, S, INPUT_DIM), jnp.float32)
    tgt_points = jax.random.normal(k_tgt, (B, T_in, OUTDIM), jnp.float32)

    fwd = jax.jit(point_transformer_forward)
    output_points, eos_probs = fwd(params, src_points, tgt_points)
    jax.block_until_ready((output_points, eos_probs))

    assert output_points.shape == (B, T_in + 1, OUTDIM)
    assert eos_probs.shape == (B, T_in + 1, 1)
    assert bool(jnp.all(jnp.isfinite(output_points)))
    assert bool(jnp.all((eos_probs >= 0.0) & (eos_probs <= 1.0)))
    print("KERNEL_OK")
</pallas_src>

<mosaic_0001>
module attributes {stable_mosaic.version = 11 : i64} {
  func.func @_forward_kernel(%arg0: i32, %arg1: memref<1x8x8xf32, #tpu.memory_space<vmem>>, %arg2: memref<1x9x8xf32, #tpu.memory_space<vmem>>, %arg3: memref<1x9x64xf32, #tpu.memory_space<vmem>>, %arg4: memref<96x64xbf16, #tpu.memory_space<vmem>>, %arg5: memref<8x64xf32, #tpu.memory_space<vmem>>, %arg6: memref<2x448x256xbf16, #tpu.memory_space<vmem>>, %arg7: memref<2x8x256xf32, #tpu.memory_space<vmem>>, %arg8: memref<2x640x256xbf16, #tpu.memory_space<vmem>>, %arg9: memref<2x16x256xf32, #tpu.memory_space<vmem>>, %arg10: memref<1x9x8xf32, #tpu.memory_space<vmem>>) attributes {dimension_semantics = [#tpu.dimension_semantics<parallel>], iteration_bounds = array<i64: 2>, scalar_prefetch = 0 : i64, scratch_operands = 0 : i64, tpu.core_type = #tpu.core_type<tc>, window_params = [{transform_indices = @transform_0, window_bounds = array<i64: 1, 8, 8>}, {transform_indices = @transform_1, window_bounds = array<i64: 1, 9, 8>}, {pipeline_mode = #tpu.pipeline_mode<synchronous>, transform_indices = @transform_2, window_bounds = array<i64: 1, 9, 64>}, {pipeline_mode = #tpu.pipeline_mode<synchronous>, transform_indices = @transform_3, window_bounds = array<i64: 96, 64>}, {pipeline_mode = #tpu.pipeline_mode<synchronous>, transform_indices = @transform_4, window_bounds = array<i64: 8, 64>}, {pipeline_mode = #tpu.pipeline_mode<synchronous>, transform_indices = @transform_5, window_bounds = array<i64: 2, 448, 256>}, {pipeline_mode = #tpu.pipeline_mode<synchronous>, transform_indices = @transform_6, window_bounds = array<i64: 2, 8, 256>}, {pipeline_mode = #tpu.pipeline_mode<synchronous>, transform_indices = @transform_7, window_bounds = array<i64: 2, 640, 256>}, {pipeline_mode = #tpu.pipeline_mode<synchronous>, transform_indices = @transform_8, window_bounds = array<i64: 2, 16, 256>}, {transform_indices = @transform_9, window_bounds = array<i64: 1, 9, 8>}]} {
    %c0 = arith.constant 0 : index
    %c0_0 = arith.constant 0 : index
    %c0_1 = arith.constant 0 : index
    %0 = vector.load %arg1[%c0, %c0_0, %c0_1] : memref<1x8x8xf32, #tpu.memory_space<vmem>>, vector<1x8x8xf32>
    %1 = vector.shape_cast %0 : vector<1x8x8xf32> to vector<8x8xf32>
    %2 = arith.truncf %1 : vector<8x8xf32> to vector<8x8xbf16>
    %c0_2 = arith.constant 0 : index
    %c0_3 = arith.constant 0 : index
    %3 = vector.load %arg4[%c0_2, %c0_3] : memref<96x64xbf16, #tpu.memory_space<vmem>>, vector<8x64xbf16>
    %cst = arith.constant dense<0.000000e+00> : vector<8x64xf32>
    %4 = tpu.matmul %2, %3, %cst {dimension_numbers = #tpu.dot_dimension_numbers<[1], [0], [0], [1], [0, 0, 1, 1], [], []>} : vector<8x8xbf16>, vector<8x64xbf16>, vector<8x64xf32> -> vector<8x64xf32>
    %c0_4 = arith.constant 0 : index
    %c0_5 = arith.constant 0 : index
    %5 = vector.load %arg5[%c0_4, %c0_5] : memref<8x64xf32, #tpu.memory_space<vmem>>, vector<1x64xf32>
    %6 = vector.broadcast %5 : vector<1x64xf32> to vector<8x64xf32>
    %7 = arith.addf %4, %6 : vector<8x64xf32>
    %c0_6 = arith.constant 0 : index
    %c0_7 = arith.constant 0 : index
    %c0_8 = arith.constant 0 : index
    %8 = vector.load %arg6[%c0_6, %c0_7, %c0_8] : memref<2x448x256xbf16, #tpu.memory_space<vmem>>, vector<1x64x192xbf16>
    %9 = vector.shape_cast %8 : vector<1x64x192xbf16> to vector<64x192xbf16>
    %c0_9 = arith.constant 0 : index
    %c64 = arith.constant 64 : index
    %c0_10 = arith.constant 0 : index
    %10 = vector.load %arg6[%c0_9, %c64, %c0_10] : memref<2x448x256xbf16, #tpu.memory_space<vmem>>, vector<1x64x64xbf16>
    %11 = vector.shape_cast %10 : vector<1x64x64xbf16> to vector<64x64xbf16>
    %c0_11 = arith.constant 0 : index
    %c128 = arith.constant 128 : index
    %c0_12 = arith.constant 0 : index
    %12 = vector.load %arg6[%c0_11, %c128, %c0_12] : memref<2x448x256xbf16, #tpu.memory_space<vmem>>, vector<1x64x256xbf16>
    %13 = vector.shape_cast %12 : vector<1x64x256xbf16> to vector<64x256xbf16>
    %c0_13 = arith.constant 0 : index
    %c192 = arith.constant 192 : index
    %c0_14 = arith.constant 0 : index
    %14 = vector.load %arg6[%c0_13, %c192, %c0_14] : memref<2x448x256xbf16, #tpu.memory_space<vmem>>, vector<1x256x64xbf16>
    %15 = vector.shape_cast %14 : vector<1x256x64xbf16> to vector<256x64xbf16>
    %c0_15 = arith.constant 0 : index
    %c0_16 = arith.constant 0 : index
    %c0_17 = arith.constant 0 : index
    %16 = vector.load %arg7[%c0_15, %c0_16, %c0_17] : memref<2x8x256xf32, #tpu.memory_space<vmem>>, vector<1x1x192xf32>
    %17 = vector.shape_cast %16 : vector<1x1x192xf32> to vector<1x192xf32>
    %c0_18 = arith.constant 0 : index
    %c1 = arith.constant 1 : index
    %c0_19 = arith.constant 0 : index
    %18 = vector.load %arg7[%c0_18, %c1, %c0_19] : memref<2x8x256xf32, #tpu.memory_space<vmem>>, vector<1x1x64xf32>
    %19 = vector.shape_cast %18 : vector<1x1x64xf32> to vector<1x64xf32>
    %c0_20 = arith.constant 0 : index
    %c2 = arith.constant 2 : index
    %c0_21 = arith.constant 0 : index
    %20 = vector.load %arg7[%c0_20, %c2, %c0_21] : memref<2x8x256xf32, #tpu.memory_space<vmem>>, vector<1x1x64xf32>
    %21 = vector.shape_cast %20 : vector<1x1x64xf32> to vector<1x64xf32>
    %c0_22 = arith.constant 0 : index
    %c3 = arith.constant 3 : index
    %c0_23 = arith.constant 0 : index
    %22 = vector.load %arg7[%c0_22, %c3, %c0_23] : memref<2x8x256xf32, #tpu.memory_space<vmem>>, vector<1x1x64xf32>
    %23 = vector.shape_cast %22 : vector<1x1x64xf32> to vector<1x64xf32>
    %c0_24 = arith.constant 0 : index
    %c4 = arith.constant 4 : index
    %c0_25 = arith.constant 0 : index
    %24 = vector.load %arg7[%c0_24, %c4, %c0_25] : memref<2x8x256xf32, #tpu.memory_space<vmem>>, vector<1x1x256xf32>
    %25 = vector.shape_cast %24 : vector<1x1x256xf32> to vector<1x256xf32>
    %c0_26 = arith.constant 0 : index
    %c5 = arith.constant 5 : index
    %c0_27 = arith.constant 0 : index
    %26 = vector.load %arg7[%c0_26, %c5, %c0_27] : memref<2x8x256xf32, #tpu.memory_space<vmem>>, vector<1x1x64xf32>
    %27 = vector.shape_cast %26 : vector<1x1x64xf32> to vector<1x64xf32>
    %c0_28 = arith.constant 0 : index
    %c6 = arith.constant 6 : index
    %c0_29 = arith.constant 0 : index
    %28 = vector.load %arg7[%c0_28, %c6, %c0_29] : memref<2x8x256xf32, #tpu.memory_space<vmem>>, vector<1x1x64xf32>
    %29 = vector.shape_cast %28 : vector<1x1x64xf32> to vector<1x64xf32>
    %c0_30 = arith.constant 0 : index
    %c7 = arith.constant 7 : index
    %c0_31 = arith.constant 0 : index
    %30 = vector.load %arg7[%c0_30, %c7, %c0_31] : memref<2x8x256xf32, #tpu.memory_space<vmem>>, vector<1x1x64xf32>
    %31 = vector.shape_cast %30 : vector<1x1x64xf32> to vector<1x64xf32>
    %32 = arith.truncf %7 : vector<8x64xf32> to vector<8x64xbf16>
    %cst_32 = arith.constant dense<0.000000e+00> : vector<8x192xf32>
    %33 = tpu.matmul %32, %9, %cst_32 {dimension_numbers = #tpu.dot_dimension_numbers<[1], [0], [0], [1], [0, 0, 1, 1], [], []>} : vector<8x64xbf16>, vector<64x192xbf16>, vector<8x192xf32> -> vector<8x192xf32>
    %34 = vector.broadcast %17 : vector<1x192xf32> to vector<8x192xf32>
    %35 = arith.addf %33, %34 : vector<8x192xf32>
    %36 = vector.extract_strided_slice %35 {offsets = [0, 0], sizes = [8, 64], strides = [1, 1]} : vector<8x192xf32> to vector<8x64xf32>
    %37 = vector.extract_strided_slice %35 {offsets = [0, 64], sizes = [8, 64], strides = [1, 1]} : vector<8x192xf32> to vector<8x64xf32>
    %38 = vector.extract_strided_slice %35 {offsets = [0, 128], sizes = [8, 64], strides = [1, 1]} : vector<8x192xf32> to vector<8x64xf32>
    %39 = vector.extract_strided_slice %36 {offsets = [0, 0], sizes = [8, 16], strides = [1, 1]} : vector<8x64xf32> to vector<8x16xf32>
    %cst_33 = arith.constant 2.500000e-01 : f32
    %40 = vector.broadcast %cst_33 : f32 to vector<8x16xf32>
    %41 = arith.mulf %39, %40 : vector<8x16xf32>
    %42 = arith.truncf %41 : vector<8x16xf32> to vector<8x16xbf16>
    %43 = vector.extract_strided_slice %37 {offsets = [0, 0], sizes = [8, 16], strides = [1, 1]} : vector<8x64xf32> to vector<8x16xf32>
    %44 = arith.truncf %43 : vector<8x16xf32> to vector<8x16xbf16>
    %45 = vector.extract_strided_slice %38 {offsets = [0, 0], sizes = [8, 16], strides = [1, 1]} : vector<8x64xf32> to vector<8x16xf32>
    %46 = arith.truncf %45 : vector<8x16xf32> to vector<8x16xbf16>
    %cst_34 = arith.constant dense<0.000000e+00> : vector<8x8xf32>
    %47 = tpu.matmul %42, %44, %cst_34 {dimension_numbers = #tpu.dot_dimension_numbers<[1], [1], [0], [0], [0, 0, 1, 0], [], []>} : vector<8x16xbf16>, vector<8x16xbf16>, vector<8x8xf32> -> vector<8x8xf32>
    %cst_35 = arith.constant dense<0xFF800000> : vector<8xf32>
    %48 = vector.multi_reduction <maximumf>, %47, %cst_35 [1] : vector<8x8xf32> to vector<8xf32>
    %49 = vector.shape_cast %48 : vector<8xf32> to vector<8x1xf32>
    %50 = vector.broadcast %49 : vector<8x1xf32> to vector<8x8xf32>
    %51 = arith.subf %47, %50 : vector<8x8xf32>
    %52 = math.exp %51 : vector<8x8xf32>
    %cst_36 = arith.constant dense<0.000000e+00> : vector<8xf32>
    %53 = vector.multi_reduction <add>, %52, %cst_36 [1] : vector<8x8xf32> to vector<8xf32>
    %54 = vector.shape_cast %53 : vector<8xf32> to vector<8x1xf32>
    %55 = tpu.reciprocal %54 {approx = true} : vector<8x1xf32> -> vector<8x1xf32>
    %56 = vector.broadcast %55 : vector<8x1xf32> to vector<8x8xf32>
    %57 = arith.mulf %52, %56 : vector<8x8xf32>
    %58 = arith.truncf %57 : vector<8x8xf32> to vector<8x8xbf16>
    %cst_37 = arith.constant dense<0.000000e+00> : vector<8x16xf32>
    %59 = tpu.matmul %58, %46, %cst_37 {dimension_numbers = #tpu.dot_dimension_numbers<[1], [0], [0], [1], [0, 0, 1, 1], [], []>} : vector<8x8xbf16>, vector<8x16xbf16>, vector<8x16xf32> -> vector<8x16xf32>
    %60 = vector.extract_strided_slice %36 {offsets = [0, 16], sizes = [8, 16], strides = [1, 1]} : vector<8x64xf32> to vector<8x16xf32>
    %cst_38 = arith.constant 2.500000e-01 : f32
    %61 = vector.broadcast %cst_38 : f32 to vector<8x16xf32>
    %62 = arith.mulf %60, %61 : vector<8x16xf32>
    %63 = arith.truncf %62 : vector<8x16xf32> to vector<8x16xbf16>
    %64 = vector.extract_strided_slice %37 {offsets = [0, 16], sizes = [8, 16], strides = [1, 1]} : vector<8x64xf32> to vector<8x16xf32>
    %65 = arith.truncf %64 : vector<8x16xf32> to vector<8x16xbf16>
    %66 = vector.extract_strided_slice %38 {offsets = [0, 16], sizes = [8, 16], strides = [1, 1]} : vector<8x64xf32> to vector<8x16xf32>
    %67 = arith.truncf %66 : vector<8x16xf32> to vector<8x16xbf16>
    %cst_39 = arith.constant dense<0.000000e+00> : vector<8x8xf32>
    %68 = tpu.matmul %63, %65, %cst_39 {dimension_numbers = #tpu.dot_dimension_numbers<[1], [1], [0], [0], [0, 0, 1, 0], [], []>} : vector<8x16xbf16>, vector<8x16xbf16>, vector<8x8xf32> -> vector<8x8xf32>
    %cst_40 = arith.constant dense<0xFF800000> : vector<8xf32>
    %69 = vector.multi_reduction <maximumf>, %68, %cst_40 [1] : vector<8x8xf32> to vector<8xf32>
    %70 = vector.shape_cast %69 : vector<8xf32> to vector<8x1xf32>
    %71 = vector.broadcast %70 : vector<8x1xf32> to vector<8x8xf32>
    %72 = arith.subf %68, %71 : vector<8x8xf32>
    %73 = math.exp %72 : vector<8x8xf32>
    %cst_41 = arith.constant dense<0.000000e+00> : vector<8xf32>
    %74 = vector.multi_reduction <add>, %73, %cst_41 [1] : vector<8x8xf32> to vector<8xf32>
    %75 = vector.shape_cast %74 : vector<8xf32> to vector<8x1xf32>
    %76 = tpu.reciprocal %75 {approx = true} : vector<8x1xf32> -> vector<8x1xf32>
    %77 = vector.broadcast %76 : vector<8x1xf32> to vector<8x8xf32>
    %78 = arith.mulf %73, %77 : vector<8x8xf32>
    %79 = arith.truncf %78 : vector<8x8xf32> to vector<8x8xbf16>
    %cst_42 = arith.constant dense<0.000000e+00> : vector<8x16xf32>
    %80 = tpu.matmul %79, %67, %cst_42 {dimension_numbers = #tpu.dot_dimension_numbers<[1], [0], [0], [1], [0, 0, 1, 1], [], []>} : vector<8x8xbf16>, vector<8x16xbf16>, vector<8x16xf32> -> vector<8x16xf32>
    %81 = vector.extract_strided_slice %36 {offsets = [0, 32], sizes = [8, 16], strides = [1, 1]} : vector<8x64xf32> to vector<8x16xf32>
    %cst_43 = arith.constant 2.500000e-01 : f32
    %82 = vector.broadcast %cst_43 : f32 to vector<8x16xf32>
    %83 = arith.mulf %81, %82 : vector<8x16xf32>
    %84 = arith.truncf %83 : vector<8x16xf32> to vector<8x16xbf16>
    %85 = vector.extract_strided_slice %37 {offsets = [0, 32], sizes = [8, 16], strides = [1, 1]} : vector<8x64xf32> to vector<8x16xf32>
    %86 = arith.truncf %85 : vector<8x16xf32> to vector<8x16xbf16>
    %87 = vector.extract_strided_slice %38 {offsets = [0, 32], sizes = [8, 16], strides = [1, 1]} : vector<8x64xf32> to vector<8x16xf32>
    %88 = arith.truncf %87 : vector<8x16xf32> to vector<8x16xbf16>
    %cst_44 = arith.constant dense<0.000000e+00> : vector<8x8xf32>
    %89 = tpu.matmul %84, %86, %cst_44 {dimension_numbers = #tpu.dot_dimension_numbers<[1], [1], [0], [0], [0, 0, 1, 0], [], []>} : vector<8x16xbf16>, vector<8x16xbf16>, vector<8x8xf32> -> vector<8x8xf32>
    %cst_45 = arith.constant dense<0xFF800000> : vector<8xf32>
    %90 = vector.multi_reduction <maximumf>, %89, %cst_45 [1] : vector<8x8xf32> to vector<8xf32>
    %91 = vector.shape_cast %90 : vector<8xf32> to vector<8x1xf32>
    %92 = vector.broadcast %91 : vector<8x1xf32> to vector<8x8xf32>
    %93 = arith.subf %89, %92 : vector<8x8xf32>
    %94 = math.exp %93 : vector<8x8xf32>
    %cst_46 = arith.constant dense<0.000000e+00> : vector<8xf32>
    %95 = vector.multi_reduction <add>, %94, %cst_46 [1] : vector<8x8xf32> to vector<8xf32>
    %96 = vector.shape_cast %95 : vector<8xf32> to vector<8x1xf32>
    %97 = tpu.reciprocal %96 {approx = true} : vector<8x1xf32> -> vector<8x1xf32>
    %98 = vector.broadcast %97 : vector<8x1xf32> to vector<8x8xf32>
    %99 = arith.mulf %94, %98 : vector<8x8xf32>
    %100 = arith.truncf %99 : vector<8x8xf32> to vector<8x8xbf16>
    %cst_47 = arith.constant dense<0.000000e+00> : vector<8x16xf32>
    %101 = tpu.matmul %100, %88, %cst_47 {dimension_numbers = #tpu.dot_dimension_numbers<[1], [0], [0], [1], [0, 0, 1, 1], [], []>} : vector<8x8xbf16>, vector<8x16xbf16>, vector<8x16xf32> -> vector<8x16xf32>
    %102 = vector.extract_strided_slice %36 {offsets = [0, 48], sizes = [8, 16], strides = [1, 1]} : vector<8x64xf32> to vector<8x16xf32>
    %cst_48 = arith.constant 2.500000e-01 : f32
    %103 = vector.broadcast %cst_48 : f32 to vector<8x16xf32>
    %104 = arith.mulf %102, %103 : vector<8x16xf32>
    %105 = arith.truncf %104 : vector<8x16xf32> to vector<8x16xbf16>
    %106 = vector.extract_strided_slice %37 {offsets = [0, 48], sizes = [8, 16], strides = [1, 1]} : vector<8x64xf32> to vector<8x16xf32>
    %107 = arith.truncf %106 : vector<8x16xf32> to vector<8x16xbf16>
    %108 = vector.extract_strided_slice %38 {offsets = [0, 48], sizes = [8, 16], strides = [1, 1]} : vector<8x64xf32> to vector<8x16xf32>
    %109 = arith.truncf %108 : vector<8x16xf32> to vector<8x16xbf16>
    %cst_49 = arith.constant dense<0.000000e+00> : vector<8x8xf32>
    %110 = tpu.matmul %105, %107, %cst_49 {dimension_numbers = #tpu.dot_dimension_numbers<[1], [1], [0], [0], [0, 0, 1, 0], [], []>} : vector<8x16xbf16>, vector<8x16xbf16>, vector<8x8xf32> -> vector<8x8xf32>
    %cst_50 = arith.constant dense<0xFF800000> : vector<8xf32>
    %111 = vector.multi_reduction <maximumf>, %110, %cst_50 [1] : vector<8x8xf32> to vector<8xf32>
    %112 = vector.shape_cast %111 : vector<8xf32> to vector<8x1xf32>
    %113 = vector.broadcast %112 : vector<8x1xf32> to vector<8x8xf32>
    %114 = arith.subf %110, %113 : vector<8x8xf32>
    %115 = math.exp %114 : vector<8x8xf32>
    %cst_51 = arith.constant dense<0.000000e+00> : vector<8xf32>
    %116 = vector.multi_reduction <add>, %115, %cst_51 [1] : vector<8x8xf32> to vector<8xf32>
    %117 = vector.shape_cast %116 : vector<8xf32> to vector<8x1xf32>
    %118 = tpu.reciprocal %117 {approx = true} : vector<8x1xf32> -> vector<8x1xf32>
    %119 = vector.broadcast %118 : vector<8x1xf32> to vector<8x8xf32>
    %120 = arith.mulf %115, %119 : vector<8x8xf32>
    %121 = arith.truncf %120 : vector<8x8xf32> to vector<8x8xbf16>
    %cst_52 = arith.constant dense<0.000000e+00> : vector<8x16xf32>
    %122 = tpu.matmul %121, %109, %cst_52 {dimension_numbers = #tpu.dot_dimension_numbers<[1], [0], [0], [1], [0, 0, 1, 1], [], []>} : vector<8x8xbf16>, vector<8x16xbf16>, vector<8x16xf32> -> vector<8x16xf32>
    %123 = tpu.concatenate %59, %80, %101, %122 in 1 : vector<8x16xf32>, vector<8x16xf32>, vector<8x16xf32>, vector<8x16xf32> -> vector<8x64xf32>
    %124 = arith.truncf %123 : vector<8x64xf32> to vector<8x64xbf16>
    %cst_53 = arith.constant dense<0.000000e+00> : vector<8x64xf32>
    %125 = tpu.matmul %124, %11, %cst_53 {dimension_numbers = #tpu.dot_dimension_numbers<[1], [0], [0], [1], [0, 0, 1, 1], [], []>} : vector<8x64xbf16>, vector<64x64xbf16>, vector<8x64xf32> -> vector<8x64xf32>
    %126 = vector.broadcast %19 : vector<1x64xf32> to vector<8x64xf32>
    %127 = arith.addf %125, %126 : vector<8x64xf32>
    %128 = arith.addf %7, %127 : vector<8x64xf32>
    %cst_54 = arith.constant dense<0.000000e+00> : vector<8xf32>
    %129 = vector.multi_reduction <add>, %128, %cst_54 [1] : vector<8x64xf32> to vector<8xf32>
    %130 = vector.shape_cast %129 : vector<8xf32> to vector<8x1xf32>
    %cst_55 = arith.constant 6.400000e+01 : f32
    %131 = vector.broadcast %cst_55 : f32 to vector<8x1xf32>
    %132 = arith.divf %130, %131 : vector<8x1xf32>
    %133 = vector.broadcast %132 : vector<8x1xf32> to vector<8x64xf32>
    %134 = arith.subf %128, %133 : vector<8x64xf32>
    %135 = arith.mulf %134, %134 : vector<8x64xf32>
    %cst_56 = arith.constant dense<0.000000e+00> : vector<8xf32>
    %136 = vector.multi_reduction <add>, %135, %cst_56 [1] : vector<8x64xf32> to vector<8xf32>
    %137 = vector.shape_cast %136 : vector<8xf32> to vector<8x1xf32>
    %cst_57 = arith.constant 6.400000e+01 : f32
    %138 = vector.broadcast %cst_57 : f32 to vector<8x1xf32>
    %139 = arith.divf %137, %138 : vector<8x1xf32>
    %140 = vector.broadcast %132 : vector<8x1xf32> to vector<8x64xf32>
    %141 = arith.subf %128, %140 : vector<8x64xf32>
    %cst_58 = arith.constant 9.99999974E-6 : f32
    %142 = vector.broadcast %cst_58 : f32 to vector<8x1xf32>
    %143 = arith.addf %139, %142 : vector<8x1xf32>
    %144 = math.rsqrt %143 : vector<8x1xf32>
    %145 = vector.broadcast %144 : vector<8x1xf32> to vector<8x64xf32>
    %146 = arith.mulf %141, %145 : vector<8x64xf32>
    %147 = vector.broadcast %21 : vector<1x64xf32> to vector<8x64xf32>
    %148 = arith.mulf %146, %147 : vector<8x64xf32>
    %149 = vector.broadcast %23 : vector<1x64xf32> to vector<8x64xf32>
    %150 = arith.addf %148, %149 : vector<8x64xf32>
    %151 = arith.truncf %150 : vector<8x64xf32> to vector<8x64xbf16>
    %cst_59 = arith.constant dense<0.000000e+00> : vector<8x256xf32>
    %152 = tpu.matmul %151, %13, %cst_59 {dimension_numbers = #tpu.dot_dimension_numbers<[1], [0], [0], [1], [0, 0, 1, 1], [], []>} : vector<8x64xbf16>, vector<64x256xbf16>, vector<8x256xf32> -> vector<8x256xf32>
    %153 = vector.broadcast %25 : vector<1x256xf32> to vector<8x256xf32>
    %154 = arith.addf %152, %153 : vector<8x256xf32>
    %cst_60 = arith.constant 0.000000e+00 : f32
    %155 = vector.broadcast %cst_60 : f32 to vector<8x256xf32>
    %156 = arith.maximumf %154, %155 : vector<8x256xf32>
    %157 = arith.truncf %156 : vector<8x256xf32> to vector<8x256xbf16>
    %cst_61 = arith.constant dense<0.000000e+00> : vector<8x64xf32>
    %158 = tpu.matmul %157, %15, %cst_61 {dimension_numbers = #tpu.dot_dimension_numbers<[1], [0], [0], [1], [0, 0, 1, 1], [], []>} : vector<8x256xbf16>, vector<256x64xbf16>, vector<8x64xf32> -> vector<8x64xf32>
    %159 = vector.broadcast %27 : vector<1x64xf32> to vector<8x64xf32>
    %160 = arith.addf %158, %159 : vector<8x64xf32>
    %161 = arith.addf %150, %160 : vector<8x64xf32>
    %cst_62 = arith.constant dense<0.000000e+00> : vector<8xf32>
    %162 = vector.multi_reduction <add>, %161, %cst_62 [1] : vector<8x64xf32> to vector<8xf32>
    %163 = vector.shape_cast %162 : vector<8xf32> to vector<8x1xf32>
    %cst_63 = arith.constant 6.400000e+01 : f32
    %164 = vector.broadcast %cst_63 : f32 to vector<8x1xf32>
    %165 = arith.divf %163, %164 : vector<8x1xf32>
    %166 = vector.broadcast %165 : vector<8x1xf32> to vector<8x64xf32>
    %167 = arith.subf %161, %166 : vector<8x64xf32>
    %168 = arith.mulf %167, %167 : vector<8x64xf32>
    %cst_64 = arith.constant dense<0.000000e+00> : vector<8xf32>
    %169 = vector.multi_reduction <add>, %168, %cst_64 [1] : vector<8x64xf32> to vector<8xf32>
    %170 = vector.shape_cast %169 : vector<8xf32> to vector<8x1xf32>
    %cst_65 = arith.constant 6.400000e+01 : f32
    %171 = vector.broadcast %cst_65 : f32 to vector<8x1xf32>
    %172 = arith.divf %170, %171 : vector<8x1xf32>
    %173 = vector.broadcast %165 : vector<8x1xf32> to vector<8x64xf32>
    %174 = arith.subf %161, %173 : vector<8x64xf32>
    %cst_66 = arith.constant 9.99999974E-6 : f32
    %175 = vector.broadcast %cst_66 : f32 to vector<8x1xf32>
    %176 = arith.addf %172, %175 : vector<8x1xf32>
    %177 = math.rsqrt %176 : vector<8x1xf32>
    %178 = vector.broadcast %177 : vector<8x1xf32> to vector<8x64xf32>
    %179 = arith.mulf %174, %178 : vector<8x64xf32>
    %180 = vector.broadcast %29 : vector<1x64xf32> to vector<8x64xf32>
    %181 = arith.mulf %179, %180 : vector<8x64xf32>
    %182 = vector.broadcast %31 : vector<1x64xf32> to vector<8x64xf32>
    %183 = arith.addf %181, %182 : vector<8x64xf32>
    %c1_67 = arith.constant 1 : index
    %c0_68 = arith.constant 0 : index
    %c0_69 = arith.constant 0 : index
    %184 = vector.load %arg6[%c1_67, %c0_68, %c0_69] : memref<2x448x256xbf16, #tpu.memory_space<vmem>>, vector<1x64x192xbf16>
    %185 = vector.shape_cast %184 : vector<1x64x192xbf16> to vector<64x192xbf16>
    %c1_70 = arith.constant 1 : index
    %c64_71 = arith.constant 64 : index
    %c0_72 = arith.constant 0 : index
    %186 = vector.load %arg6[%c1_70, %c64_71, %c0_72] : memref<2x448x256xbf16, #tpu.memory_space<vmem>>, vector<1x64x64xbf16>
    %187 = vector.shape_cast %186 : vector<1x64x64xbf16> to vector<64x64xbf16>
    %c1_73 = arith.constant 1 : index
    %c128_74 = arith.constant 128 : index
    %c0_75 = arith.constant 0 : index
    %188 = vector.load %arg6[%c1_73, %c128_74, %c0_75] : memref<2x448x256xbf16, #tpu.memory_space<vmem>>, vector<1x64x256xbf16>
    %189 = vector.shape_cast %188 : vector<1x64x256xbf16> to vector<64x256xbf16>
    %c1_76 = arith.constant 1 : index
    %c192_77 = arith.constant 192 : index
    %c0_78 = arith.constant 0 : index
    %190 = vector.load %arg6[%c1_76, %c192_77, %c0_78] : memref<2x448x256xbf16, #tpu.memory_space<vmem>>, vector<1x256x64xbf16>
    %191 = vector.shape_cast %190 : vector<1x256x64xbf16> to vector<256x64xbf16>
    %c1_79 = arith.constant 1 : index
    %c0_80 = arith.constant 0 : index
    %c0_81 = arith.constant 0 : index
    %192 = vector.load %arg7[%c1_79, %c0_80, %c0_81] : memref<2x8x256xf32, #tpu.memory_space<vmem>>, vector<1x1x192xf32>
    %193 = vector.shape_cast %192 : vector<1x1x192xf32> to vector<1x192xf32>
    %c1_82 = arith.constant 1 : index
    %c1_83 = arith.constant 1 : index
    %c0_84 = arith.constant 0 : index
    %194 = vector.load %arg7[%c1_82, %c1_83, %c0_84] : memref<2x8x256xf32, #tpu.memory_space<vmem>>, vector<1x1x64xf32>
    %195 = vector.shape_cast %194 : vector<1x1x64xf32> to vector<1x64xf32>
    %c1_85 = arith.constant 1 : index
    %c2_86 = arith.constant 2 : index
    %c0_87 = arith.constant 0 : index
    %196 = vector.load %arg7[%c1_85, %c2_86, %c0_87] : memref<2x8x256xf32, #tpu.memory_space<vmem>>, vector<1x1x64xf32>
    %197 = vector.shape_cast %196 : vector<1x1x64xf32> to vector<1x64xf32>
    %c1_88 = arith.constant 1 : index
    %c3_89 = arith.constant 3 : index
    %c0_90 = arith.constant 0 : index
    %198 = vector.load %arg7[%c1_88, %c3_89, %c0_90] : memref<2x8x256xf32, #tpu.memory_space<vmem>>, vector<1x1x64xf32>
    %199 = vector.shape_cast %198 : vector<1x1x64xf32> to vector<1x64xf32>
    %c1_91 = arith.constant 1 : index
    %c4_92 = arith.constant 4 : index
    %c0_93 = arith.constant 0 : index
    %200 = vector.load %arg7[%c1_91, %c4_92, %c0_93] : memref<2x8x256xf32, #tpu.memory_space<vmem>>, vector<1x1x256xf32>
    %201 = vector.shape_cast %200 : vector<1x1x256xf32> to vector<1x256xf32>
    %c1_94 = arith.constant 1 : index
    %c5_95 = arith.constant 5 : index
    %c0_96 = arith.constant 0 : index
    %202 = vector.load %arg7[%c1_94, %c5_95, %c0_96] : memref<2x8x256xf32, #tpu.memory_space<vmem>>, vector<1x1x64xf32>
    %203 = vector.shape_cast %202 : vector<1x1x64xf32> to vector<1x64xf32>
    %c1_97 = arith.constant 1 : index
    %c6_98 = arith.constant 6 : index
    %c0_99 = arith.constant 0 : index
    %204 = vector.load %arg7[%c1_97, %c6_98, %c0_99] : memref<2x8x256xf32, #tpu.memory_space<vmem>>, vector<1x1x64xf32>
    %205 = vector.shape_cast %204 : vector<1x1x64xf32> to vector<1x64xf32>
    %c1_100 = arith.constant 1 : index
    %c7_101 = arith.constant 7 : index
    %c0_102 = arith.constant 0 : index
    %206 = vector.load %arg7[%c1_100, %c7_101, %c0_102] : memref<2x8x256xf32, #tpu.memory_space<vmem>>, vector<1x1x64xf32>
    %207 = vector.shape_cast %206 : vector<1x1x64xf32> to vector<1x64xf32>
    %208 = arith.truncf %183 : vector<8x64xf32> to vector<8x64xbf16>
    %cst_103 = arith.constant dense<0.000000e+00> : vector<8x192xf32>
    %209 = tpu.matmul %208, %185, %cst_103 {dimension_numbers = #tpu.dot_dimension_numbers<[1], [0], [0], [1], [0, 0, 1, 1], [], []>} : vector<8x64xbf16>, vector<64x192xbf16>, vector<8x192xf32> -> vector<8x192xf32>
    %210 = vector.broadcast %193 : vector<1x192xf32> to vector<8x192xf32>
    %211 = arith.addf %209, %210 : vector<8x192xf32>
    %212 = vector.extract_strided_slice %211 {offsets = [0, 0], sizes = [8, 64], strides = [1, 1]} : vector<8x192xf32> to vector<8x64xf32>
    %213 = vector.extract_strided_slice %211 {offsets = [0, 64], sizes = [8, 64], strides = [1, 1]} : vector<8x192xf32> to vector<8x64xf32>
    %214 = vector.extract_strided_slice %211 {offsets = [0, 128], sizes = [8, 64], strides = [1, 1]} : vector<8x192xf32> to vector<8x64xf32>
    %215 = vector.extract_strided_slice %212 {offsets = [0, 0], sizes = [8, 16], strides = [1, 1]} : vector<8x64xf32> to vector<8x16xf32>
    %cst_104 = arith.constant 2.500000e-01 : f32
    %216 = vector.broadcast %cst_104 : f32 to vector<8x16xf32>
    %217 = arith.mulf %215, %216 : vector<8x16xf32>
    %218 = arith.truncf %217 : vector<8x16xf32> to vector<8x16xbf16>
    %219 = vector.extract_strided_slice %213 {offsets = [0, 0], sizes = [8, 16], strides = [1, 1]} : vector<8x64xf32> to vector<8x16xf32>
    %220 = arith.truncf %219 : vector<8x16xf32> to vector<8x16xbf16>
    %221 = vector.extract_strided_slice %214 {offsets = [0, 0], sizes = [8, 16], strides = [1, 1]} : vector<8x64xf32> to vector<8x16xf32>
    %222 = arith.truncf %221 : vector<8x16xf32> to vector<8x16xbf16>
    %cst_105 = arith.constant dense<0.000000e+00> : vector<8x8xf32>
    %223 = tpu.matmul %218, %220, %cst_105 {dimension_numbers = #tpu.dot_dimension_numbers<[1], [1], [0], [0], [0, 0, 1, 0], [], []>} : vector<8x16xbf16>, vector<8x16xbf16>, vector<8x8xf32> -> vector<8x8xf32>
    %cst_106 = arith.constant dense<0xFF800000> : vector<8xf32>
    %224 = vector.multi_reduction <maximumf>, %223, %cst_106 [1] : vector<8x8xf32> to vector<8xf32>
    %225 = vector.shape_cast %224 : vector<8xf32> to vector<8x1xf32>
    %226 = vector.broadcast %225 : vector<8x1xf32> to vector<8x8xf32>
    %227 = arith.subf %223, %226 : vector<8x8xf32>
    %228 = math.exp %227 : vector<8x8xf32>
    %cst_107 = arith.constant dense<0.000000e+00> : vector<8xf32>
    %229 = vector.multi_reduction <add>, %228, %cst_107 [1] : vector<8x8xf32> to vector<8xf32>
    %230 = vector.shape_cast %229 : vector<8xf32> to vector<8x1xf32>
    %231 = tpu.reciprocal %230 {approx = true} : vector<8x1xf32> -> vector<8x1xf32>
    %232 = vector.broadcast %231 : vector<8x1xf32> to vector<8x8xf32>
    %233 = arith.mulf %228, %232 : vector<8x8xf32>
    %234 = arith.truncf %233 : vector<8x8xf32> to vector<8x8xbf16>
    %cst_108 = arith.constant dense<0.000000e+00> : vector<8x16xf32>
    %235 = tpu.matmul %234, %222, %cst_108 {dimension_numbers = #tpu.dot_dimension_numbers<[1], [0], [0], [1], [0, 0, 1, 1], [], []>} : vector<8x8xbf16>, vector<8x16xbf16>, vector<8x16xf32> -> vector<8x16xf32>
    %236 = vector.extract_strided_slice %212 {offsets = [0, 16], sizes = [8, 16], strides = [1, 1]} : vector<8x64xf32> to vector<8x16xf32>
    %cst_109 = arith.constant 2.500000e-01 : f32
    %237 = vector.broadcast %cst_109 : f32 to vector<8x16xf32>
    %238 = arith.mulf %236, %237 : vector<8x16xf32>
    %239 = arith.truncf %238 : vector<8x16xf32> to vector<8x16xbf16>
    %240 = vector.extract_strided_slice %213 {offsets = [0, 16], sizes = [8, 16], strides = [1, 1]} : vector<8x64xf32> to vector<8x16xf32>
    %241 = arith.truncf %240 : vector<8x16xf32> to vector<8x16xbf16>
    %242 = vector.extract_strided_slice %214 {offsets = [0, 16], sizes = [8, 16], strides = [1, 1]} : vector<8x64xf32> to vector<8x16xf32>
    %243 = arith.truncf %242 : vector<8x16xf32> to vector<8x16xbf16>
    %cst_110 = arith.constant dense<0.000000e+00> : vector<8x8xf32>
    %244 = tpu.matmul %239, %241, %cst_110 {dimension_numbers = #tpu.dot_dimension_numbers<[1], [1], [0], [0], [0, 0, 1, 0], [], []>} : vector<8x16xbf16>, vector<8x16xbf16>, vector<8x8xf32> -> vector<8x8xf32>
    %cst_111 = arith.constant dense<0xFF800000> : vector<8xf32>
    %245 = vector.multi_reduction <maximumf>, %244, %cst_111 [1] : vector<8x8xf32> to vector<8xf32>
    %246 = vector.shape_cast %245 : vector<8xf32> to vector<8x1xf32>
    %247 = vector.broadcast %246 : vector<8x1xf32> to vector<8x8xf32>
    %248 = arith.subf %244, %247 : vector<8x8xf32>
    %249 = math.exp %248 : vector<8x8xf32>
    %cst_112 = arith.constant dense<0.000000e+00> : vector<8xf32>
    %250 = vector.multi_reduction <add>, %249, %cst_112 [1] : vector<8x8xf32> to vector<8xf32>
    %251 = vector.shape_cast %250 : vector<8xf32> to vector<8x1xf32>
    %252 = tpu.reciprocal %251 {approx = true} : vector<8x1xf32> -> vector<8x1xf32>
    %253 = vector.broadcast %252 : vector<8x1xf32> to vector<8x8xf32>
    %254 = arith.mulf %249, %253 : vector<8x8xf32>
    %255 = arith.truncf %254 : vector<8x8xf32> to vector<8x8xbf16>
    %cst_113 = arith.constant dense<0.000000e+00> : vector<8x16xf32>
    %256 = tpu.matmul %255, %243, %cst_113 {dimension_numbers = #tpu.dot_dimension_numbers<[1], [0], [0], [1], [0, 0, 1, 1], [], []>} : vector<8x8xbf16>, vector<8x16xbf16>, vector<8x16xf32> -> vector<8x16xf32>
    %257 = vector.extract_strided_slice %212 {offsets = [0, 32], sizes = [8, 16], strides = [1, 1]} : vector<8x64xf32> to vector<8x16xf32>
    %cst_114 = arith.constant 2.500000e-01 : f32
    %258 = vector.broadcast %cst_114 : f32 to vector<8x16xf32>
    %259 = arith.mulf %257, %258 : vector<8x16xf32>
    %260 = arith.truncf %259 : vector<8x16xf32> to vector<8x16xbf16>
    %261 = vector.extract_strided_slice %213 {offsets = [0, 32], sizes = [8, 16], strides = [1, 1]} : vector<8x64xf32> to vector<8x16xf32>
    %262 = arith.truncf %261 : vector<8x16xf32> to vector<8x16xbf16>
    %263 = vector.extract_strided_slice %214 {offsets = [0, 32], sizes = [8, 16], strides = [1, 1]} : vector<8x64xf32> to vector<8x16xf32>
    %264 = arith.truncf %263 : vector<8x16xf32> to vector<8x16xbf16>
    %cst_115 = arith.constant dense<0.000000e+00> : vector<8x8xf32>
    %265 = tpu.matmul %260, %262, %cst_115 {dimension_numbers = #tpu.dot_dimension_numbers<[1], [1], [0], [0], [0, 0, 1, 0], [], []>} : vector<8x16xbf16>, vector<8x16xbf16>, vector<8x8xf32> -> vector<8x8xf32>
    %cst_116 = arith.constant dense<0xFF800000> : vector<8xf32>
    %266 = vector.multi_reduction <maximumf>, %265, %cst_116 [1] : vector<8x8xf32> to vector<8xf32>
    %267 = vector.shape_cast %266 : vector<8xf32> to vector<8x1xf32>
    %268 = vector.broadcast %267 : vector<8x1xf32> to vector<8x8xf32>
    %269 = arith.subf %265, %268 : vector<8x8xf32>
    %270 = math.exp %269 : vector<8x8xf32>
    %cst_117 = arith.constant dense<0.000000e+00> : vector<8xf32>
    %271 = vector.multi_reduction <add>, %270, %cst_117 [1] : vector<8x8xf32> to vector<8xf32>
    %272 = vector.shape_cast %271 : vector<8xf32> to vector<8x1xf32>
    %273 = tpu.reciprocal %272 {approx = true} : vector<8x1xf32> -> vector<8x1xf32>
    %274 = vector.broadcast %273 : vector<8x1xf32> to vector<8x8xf32>
    %275 = arith.mulf %270, %274 : vector<8x8xf32>
    %276 = arith.truncf %275 : vector<8x8xf32> to vector<8x8xbf16>
    %cst_118 = arith.constant dense<0.000000e+00> : vector<8x16xf32>
    %277 = tpu.matmul %276, %264, %cst_118 {dimension_numbers = #tpu.dot_dimension_numbers<[1], [0], [0], [1], [0, 0, 1, 1], [], []>} : vector<8x8xbf16>, vector<8x16xbf16>, vector<8x16xf32> -> vector<8x16xf32>
    %278 = vector.extract_strided_slice %212 {offsets = [0, 48], sizes = [8, 16], strides = [1, 1]} : vector<8x64xf32> to vector<8x16xf32>
    %cst_119 = arith.constant 2.500000e-01 : f32
    %279 = vector.broadcast %cst_119 : f32 to vector<8x16xf32>
    %280 = arith.mulf %278, %279 : vector<8x16xf32>
    %281 = arith.truncf %280 : vector<8x16xf32> to vector<8x16xbf16>
    %282 = vector.extract_strided_slice %213 {offsets = [0, 48], sizes = [8, 16], strides = [1, 1]} : vector<8x64xf32> to vector<8x16xf32>
    %283 = arith.truncf %282 : vector<8x16xf32> to vector<8x16xbf16>
    %284 = vector.extract_strided_slice %214 {offsets = [0, 48], sizes = [8, 16], strides = [1, 1]} : vector<8x64xf32> to vector<8x16xf32>
    %285 = arith.truncf %284 : vector<8x16xf32> to vector<8x16xbf16>
    %cst_120 = arith.constant dense<0.000000e+00> : vector<8x8xf32>
    %286 = tpu.matmul %281, %283, %cst_120 {dimension_numbers = #tpu.dot_dimension_numbers<[1], [1], [0], [0], [0, 0, 1, 0], [], []>} : vector<8x16xbf16>, vector<8x16xbf16>, vector<8x8xf32> -> vector<8x8xf32>
    %cst_121 = arith.constant dense<0xFF800000> : vector<8xf32>
    %287 = vector.multi_reduction <maximumf>, %286, %cst_121 [1] : vector<8x8xf32> to vector<8xf32>
    %288 = vector.shape_cast %287 : vector<8xf32> to vector<8x1xf32>
    %289 = vector.broadcast %288 : vector<8x1xf32> to vector<8x8xf32>
    %290 = arith.subf %286, %289 : vector<8x8xf32>
    %291 = math.exp %290 : vector<8x8xf32>
    %cst_122 = arith.constant dense<0.000000e+00> : vector<8xf32>
    %292 = vector.multi_reduction <add>, %291, %cst_122 [1] : vector<8x8xf32> to vector<8xf32>
    %293 = vector.shape_cast %292 : vector<8xf32> to vector<8x1xf32>
    %294 = tpu.reciprocal %293 {approx = true} : vector<8x1xf32> -> vector<8x1xf32>
    %295 = vector.broadcast %294 : vector<8x1xf32> to vector<8x8xf32>
    %296 = arith.mulf %291, %295 : vector<8x8xf32>
    %297 = arith.truncf %296 : vector<8x8xf32> to vector<8x8xbf16>
    %cst_123 = arith.constant dense<0.000000e+00> : vector<8x16xf32>
    %298 = tpu.matmul %297, %285, %cst_123 {dimension_numbers = #tpu.dot_dimension_numbers<[1], [0], [0], [1], [0, 0, 1, 1], [], []>} : vector<8x8xbf16>, vector<8x16xbf16>, vector<8x16xf32> -> vector<8x16xf32>
    %299 = tpu.concatenate %235, %256, %277, %298 in 1 : vector<8x16xf32>, vector<8x16xf32>, vector<8x16xf32>, vector<8x16xf32> -> vector<8x64xf32>
    %300 = arith.truncf %299 : vector<8x64xf32> to vector<8x64xbf16>
    %cst_124 = arith.constant dense<0.000000e+00> : vector<8x64xf32>
    %301 = tpu.matmul %300, %187, %cst_124 {dimension_numbers = #tpu.dot_dimension_numbers<[1], [0], [0], [1], [0, 0, 1, 1], [], []>} : vector<8x64xbf16>, vector<64x64xbf16>, vector<8x64xf32> -> vector<8x64xf32>
    %302 = vector.broadcast %195 : vector<1x64xf32> to vector<8x64xf32>
    %303 = arith.addf %301, %302 : vector<8x64xf32>
    %304 = arith.addf %183, %303 : vector<8x64xf32>
    %cst_125 = arith.constant dense<0.000000e+00> : vector<8xf32>
    %305 = vector.multi_reduction <add>, %304, %cst_125 [1] : vector<8x64xf32> to vector<8xf32>
    %306 = vector.shape_cast %305 : vector<8xf32> to vector<8x1xf32>
    %cst_126 = arith.constant 6.400000e+01 : f32
    %307 = vector.broadcast %cst_126 : f32 to vector<8x1xf32>
    %308 = arith.divf %306, %307 : vector<8x1xf32>
    %309 = vector.broadcast %308 : vector<8x1xf32> to vector<8x64xf32>
    %310 = arith.subf %304, %309 : vector<8x64xf32>
    %311 = arith.mulf %310, %310 : vector<8x64xf32>
    %cst_127 = arith.constant dense<0.000000e+00> : vector<8xf32>
    %312 = vector.multi_reduction <add>, %311, %cst_127 [1] : vector<8x64xf32> to vector<8xf32>
    %313 = vector.shape_cast %312 : vector<8xf32> to vector<8x1xf32>
    %cst_128 = arith.constant 6.400000e+01 : f32
    %314 = vector.broadcast %cst_128 : f32 to vector<8x1xf32>
    %315 = arith.divf %313, %314 : vector<8x1xf32>
    %316 = vector.broadcast %308 : vector<8x1xf32> to vector<8x64xf32>
    %317 = arith.subf %304, %316 : vector<8x64xf32>
    %cst_129 = arith.constant 9.99999974E-6 : f32
    %318 = vector.broadcast %cst_129 : f32 to vector<8x1xf32>
    %319 = arith.addf %315, %318 : vector<8x1xf32>
    %320 = math.rsqrt %319 : vector<8x1xf32>
    %321 = vector.broadcast %320 : vector<8x1xf32> to vector<8x64xf32>
    %322 = arith.mulf %317, %321 : vector<8x64xf32>
    %323 = vector.broadcast %197 : vector<1x64xf32> to vector<8x64xf32>
    %324 = arith.mulf %322, %323 : vector<8x64xf32>
    %325 = vector.broadcast %199 : vector<1x64xf32> to vector<8x64xf32>
    %326 = arith.addf %324, %325 : vector<8x64xf32>
    %327 = arith.truncf %326 : vector<8x64xf32> to vector<8x64xbf16>
    %cst_130 = arith.constant dense<0.000000e+00> : vector<8x256xf32>
    %328 = tpu.matmul %327, %189, %cst_130 {dimension_numbers = #tpu.dot_dimension_numbers<[1], [0], [0], [1], [0, 0, 1, 1], [], []>} : vector<8x64xbf16>, vector<64x256xbf16>, vector<8x256xf32> -> vector<8x256xf32>
    %329 = vector.broadcast %201 : vector<1x256xf32> to vector<8x256xf32>
    %330 = arith.addf %328, %329 : vector<8x256xf32>
    %cst_131 = arith.constant 0.000000e+00 : f32
    %331 = vector.broadcast %cst_131 : f32 to vector<8x256xf32>
    %332 = arith.maximumf %330, %331 : vector<8x256xf32>
    %333 = arith.truncf %332 : vector<8x256xf32> to vector<8x256xbf16>
    %cst_132 = arith.constant dense<0.000000e+00> : vector<8x64xf32>
    %334 = tpu.matmul %333, %191, %cst_132 {dimension_numbers = #tpu.dot_dimension_numbers<[1], [0], [0], [1], [0, 0, 1, 1], [], []>} : vector<8x256xbf16>, vector<256x64xbf16>, vector<8x64xf32> -> vector<8x64xf32>
    %335 = vector.broadcast %203 : vector<1x64xf32> to vector<8x64xf32>
    %336 = arith.addf %334, %335 : vector<8x64xf32>
    %337 = arith.addf %326, %336 : vector<8x64xf32>
    %cst_133 = arith.constant dense<0.000000e+00> : vector<8xf32>
    %338 = vector.multi_reduction <add>, %337, %cst_133 [1] : vector<8x64xf32> to vector<8xf32>
    %339 = vector.shape_cast %338 : vector<8xf32> to vector<8x1xf32>
    %cst_134 = arith.constant 6.400000e+01 : f32
    %340 = vector.broadcast %cst_134 : f32 to vector<8x1xf32>
    %341 = arith.divf %339, %340 : vector<8x1xf32>
    %342 = vector.broadcast %341 : vector<8x1xf32> to vector<8x64xf32>
    %343 = arith.subf %337, %342 : vector<8x64xf32>
    %344 = arith.mulf %343, %343 : vector<8x64xf32>
    %cst_135 = arith.constant dense<0.000000e+00> : vector<8xf32>
    %345 = vector.multi_reduction <add>, %344, %cst_135 [1] : vector<8x64xf32> to vector<8xf32>
    %346 = vector.shape_cast %345 : vector<8xf32> to vector<8x1xf32>
    %cst_136 = arith.constant 6.400000e+01 : f32
    %347 = vector.broadcast %cst_136 : f32 to vector<8x1xf32>
    %348 = arith.divf %346, %347 : vector<8x1xf32>
    %349 = vector.broadcast %341 : vector<8x1xf32> to vector<8x64xf32>
    %350 = arith.subf %337, %349 : vector<8x64xf32>
    %cst_137 = arith.constant 9.99999974E-6 : f32
    %351 = vector.broadcast %cst_137 : f32 to vector<8x1xf32>
    %352 = arith.addf %348, %351 : vector<8x1xf32>
    %353 = math.rsqrt %352 : vector<8x1xf32>
    %354 = vector.broadcast %353 : vector<8x1xf32> to vector<8x64xf32>
    %355 = arith.mulf %350, %354 : vector<8x64xf32>
    %356 = vector.broadcast %205 : vector<1x64xf32> to vector<8x64xf32>
    %357 = arith.mulf %355, %356 : vector<8x64xf32>
    %358 = vector.broadcast %207 : vector<1x64xf32> to vector<8x64xf32>
    %359 = arith.addf %357, %358 : vector<8x64xf32>
    %c0_138 = arith.constant 0 : index
    %c0_139 = arith.constant 0 : index
    %c0_140 = arith.constant 0 : index
    %360 = vector.load %arg2[%c0_138, %c0_139, %c0_140] : memref<1x9x8xf32, #tpu.memory_space<vmem>>, vector<1x9x8xf32>
    %361 = vector.shape_cast %360 : vector<1x9x8xf32> to vector<9x8xf32>
    %362 = arith.truncf %361 : vector<9x8xf32> to vector<9x8xbf16>
    %c16 = arith.constant 16 : index
    %c0_141 = arith.constant 0 : index
    %363 = vector.load %arg4[%c16, %c0_141] : memref<96x64xbf16, #tpu.memory_space<vmem>>, vector<8x64xbf16>
    %cst_142 = arith.constant dense<0.000000e+00> : vector<9x64xf32>
    %364 = tpu.matmul %362, %363, %cst_142 {dimension_numbers = #tpu.dot_dimension_numbers<[1], [0], [0], [1], [0, 0, 1, 1], [], []>} : vector<9x8xbf16>, vector<8x64xbf16>, vector<9x64xf32> -> vector<9x64xf32>
    %c1_143 = arith.constant 1 : index
    %c0_144 = arith.constant 0 : index
    %365 = vector.load %arg5[%c1_143, %c0_144] : memref<8x64xf32, #tpu.memory_space<vmem>>, vector<1x64xf32>
    %366 = vector.broadcast %365 : vector<1x64xf32> to vector<9x64xf32>
    %367 = arith.addf %364, %366 : vector<9x64xf32>
    %c0_145 = arith.constant 0 : index
    %c0_146 = arith.constant 0 : index
    %c0_147 = arith.constant 0 : index
    %368 = vector.load %arg3[%c0_145, %c0_146, %c0_147] : memref<1x9x64xf32, #tpu.memory_space<vmem>>, vector<1x9x64xf32>
    %369 = vector.shape_cast %368 : vector<1x9x64xf32> to vector<9x64xf32>
    %370 = arith.addf %367, %369 : vector<9x64xf32>
    %371 = tpu.iota {dimensions = array<i32: 0>} : vector<9x9xi32>
    %372 = tpu.iota {dimensions = array<i32: 1>} : vector<9x9xi32>
    %373 = arith.cmpi sgt, %372, %371 : vector<9x9xi32>
    %cst_148 = arith.constant -1.000000e+09 : f32
    %cst_149 = arith.constant 0.000000e+00 : f32
    %374 = vector.broadcast %cst_148 : f32 to vector<9x9xf32>
    %375 = vector.broadcast %cst_149 : f32 to vector<9x9xf32>
    %376 = arith.select %373, %374, %375 : vector<9x9xi1>, vector<9x9xf32>
    %c0_150 = arith.constant 0 : index
    %c0_151 = arith.constant 0 : index
    %c0_152 = arith.constant 0 : index
    %377 = vector.load %arg8[%c0_150, %c0_151, %c0_152] : memref<2x640x256xbf16, #tpu.memory_space<vmem>>, vector<1x64x192xbf16>
    %378 = vector.shape_cast %377 : vector<1x64x192xbf16> to vector<64x192xbf16>
    %c0_153 = arith.constant 0 : index
    %c64_154 = arith.constant 64 : index
    %c0_155 = arith.constant 0 : index
    %379 = vector.load %arg8[%c0_153, %c64_154, %c0_155] : memref<2x640x256xbf16, #tpu.memory_space<vmem>>, vector<1x64x64xbf16>
    %380 = vector.shape_cast %379 : vector<1x64x64xbf16> to vector<64x64xbf16>
    %c0_156 = arith.constant 0 : index
    %c128_157 = arith.constant 128 : index
    %c0_158 = arith.constant 0 : index
    %381 = vector.load %arg8[%c0_156, %c128_157, %c0_158] : memref<2x640x256xbf16, #tpu.memory_space<vmem>>, vector<1x64x64xbf16>
    %382 = vector.shape_cast %381 : vector<1x64x64xbf16> to vector<64x64xbf16>
    %c0_159 = arith.constant 0 : index
    %c192_160 = arith.constant 192 : index
    %c0_161 = arith.constant 0 : index
    %383 = vector.load %arg8[%c0_159, %c192_160, %c0_161] : memref<2x640x256xbf16, #tpu.memory_space<vmem>>, vector<1x64x128xbf16>
    %384 = vector.shape_cast %383 : vector<1x64x128xbf16> to vector<64x128xbf16>
    %c0_162 = arith.constant 0 : index
    %c256 = arith.constant 256 : index
    %c0_163 = arith.constant 0 : index
    %385 = vector.load %arg8[%c0_162, %c256, %c0_163] : memref<2x640x256xbf16, #tpu.memory_space<vmem>>, vector<1x64x64xbf16>
    %386 = vector.shape_cast %385 : vector<1x64x64xbf16> to vector<64x64xbf16>
    %c0_164 = arith.constant 0 : index
    %c320 = arith.constant 320 : index
    %c0_165 = arith.constant 0 : index
    %387 = vector.load %arg8[%c0_164, %c320, %c0_165] : memref<2x640x256xbf16, #tpu.memory_space<vmem>>, vector<1x64x256xbf16>
    %388 = vector.shape_cast %387 : vector<1x64x256xbf16> to vector<64x256xbf16>
    %c0_166 = arith.constant 0 : index
    %c384 = arith.constant 384 : index
    %c0_167 = arith.constant 0 : index
    %389 = vector.load %arg8[%c0_166, %c384, %c0_167] : memref<2x640x256xbf16, #tpu.memory_space<vmem>>, vector<1x256x64xbf16>
    %390 = vector.shape_cast %389 : vector<1x256x64xbf16> to vector<256x64xbf16>
    %c0_168 = arith.constant 0 : index
    %c0_169 = arith.constant 0 : index
    %c0_170 = arith.constant 0 : index
    %391 = vector.load %arg9[%c0_168, %c0_169, %c0_170] : memref<2x16x256xf32, #tpu.memory_space<vmem>>, vector<1x1x192xf32>
    %392 = vector.shape_cast %391 : vector<1x1x192xf32> to vector<1x192xf32>
    %c0_171 = arith.constant 0 : index
    %c1_172 = arith.constant 1 : index
    %c0_173 = arith.constant 0 : index
    %393 = vector.load %arg9[%c0_171, %c1_172, %c0_173] : memref<2x16x256xf32, #tpu.memory_space<vmem>>, vector<1x1x64xf32>
    %394 = vector.shape_cast %393 : vector<1x1x64xf32> to vector<1x64xf32>
    %c0_174 = arith.constant 0 : index
    %c2_175 = arith.constant 2 : index
    %c0_176 = arith.constant 0 : index
    %395 = vector.load %arg9[%c0_174, %c2_175, %c0_176] : memref<2x16x256xf32, #tpu.memory_space<vmem>>, vector<1x1x64xf32>
    %396 = vector.shape_cast %395 : vector<1x1x64xf32> to vector<1x64xf32>
    %c0_177 = arith.constant 0 : index
    %c3_178 = arith.constant 3 : index
    %c0_179 = arith.constant 0 : index
    %397 = vector.load %arg9[%c0_177, %c3_178, %c0_179] : memref<2x16x256xf32, #tpu.memory_space<vmem>>, vector<1x1x64xf32>
    %398 = vector.shape_cast %397 : vector<1x1x64xf32> to vector<1x64xf32>
    %c0_180 = arith.constant 0 : index
    %c4_181 = arith.constant 4 : index
    %c0_182 = arith.constant 0 : index
    %399 = vector.load %arg9[%c0_180, %c4_181, %c0_182] : memref<2x16x256xf32, #tpu.memory_space<vmem>>, vector<1x1x64xf32>
    %400 = vector.shape_cast %399 : vector<1x1x64xf32> to vector<1x64xf32>
    %c0_183 = arith.constant 0 : index
    %c5_184 = arith.constant 5 : index
    %c0_185 = arith.constant 0 : index
    %401 = vector.load %arg9[%c0_183, %c5_184, %c0_185] : memref<2x16x256xf32, #tpu.memory_space<vmem>>, vector<1x1x128xf32>
    %402 = vector.shape_cast %401 : vector<1x1x128xf32> to vector<1x128xf32>
    %c0_186 = arith.constant 0 : index
    %c6_187 = arith.constant 6 : index
    %c0_188 = arith.constant 0 : index
    %403 = vector.load %arg9[%c0_186, %c6_187, %c0_188] : memref<2x16x256xf32, #tpu.memory_space<vmem>>, vector<1x1x64xf32>
    %404 = vector.shape_cast %403 : vector<1x1x64xf32> to vector<1x64xf32>
    %c0_189 = arith.constant 0 : index
    %c7_190 = arith.constant 7 : index
    %c0_191 = arith.constant 0 : index
    %405 = vector.load %arg9[%c0_189, %c7_190, %c0_191] : memref<2x16x256xf32, #tpu.memory_space<vmem>>, vector<1x1x64xf32>
    %406 = vector.shape_cast %405 : vector<1x1x64xf32> to vector<1x64xf32>
    %c0_192 = arith.constant 0 : index
    %c8 = arith.constant 8 : index
    %c0_193 = arith.constant 0 : index
    %407 = vector.load %arg9[%c0_192, %c8, %c0_193] : memref<2x16x256xf32, #tpu.memory_space<vmem>>, vector<1x1x64xf32>
    %408 = vector.shape_cast %407 : vector<1x1x64xf32> to vector<1x64xf32>
    %c0_194 = arith.constant 0 : index
    %c9 = arith.constant 9 : index
    %c0_195 = arith.constant 0 : index
    %409 = vector.load %arg9[%c0_194, %c9, %c0_195] : memref<2x16x256xf32, #tpu.memory_space<vmem>>, vector<1x1x256xf32>
    %410 = vector.shape_cast %409 : vector<1x1x256xf32> to vector<1x256xf32>
    %c0_196 = arith.constant 0 : index
    %c10 = arith.constant 10 : index
    %c0_197 = arith.constant 0 : index
    %411 = vector.load %arg9[%c0_196, %c10, %c0_197] : memref<2x16x256xf32, #tpu.memory_space<vmem>>, vector<1x1x64xf32>
    %412 = vector.shape_cast %411 : vector<1x1x64xf32> to vector<1x64xf32>
    %c0_198 = arith.constant 0 : index
    %c11 = arith.constant 11 : index
    %c0_199 = arith.constant 0 : index
    %413 = vector.load %arg9[%c0_198, %c11, %c0_199] : memref<2x16x256xf32, #tpu.memory_space<vmem>>, vector<1x1x64xf32>
    %414 = vector.shape_cast %413 : vector<1x1x64xf32> to vector<1x64xf32>
    %c0_200 = arith.constant 0 : index
    %c12 = arith.constant 12 : index
    %c0_201 = arith.constant 0 : index
    %415 = vector.load %arg9[%c0_200, %c12, %c0_201] : memref<2x16x256xf32, #tpu.memory_space<vmem>>, vector<1x1x64xf32>
    %416 = vector.shape_cast %415 : vector<1x1x64xf32> to vector<1x64xf32>
    %417 = arith.truncf %370 : vector<9x64xf32> to vector<9x64xbf16>
    %cst_202 = arith.constant dense<0.000000e+00> : vector<9x192xf32>
    %418 = tpu.matmul %417, %378, %cst_202 {dimension_numbers = #tpu.dot_dimension_numbers<[1], [0], [0], [1], [0, 0, 1, 1], [], []>} : vector<9x64xbf16>, vector<64x192xbf16>, vector<9x192xf32> -> vector<9x192xf32>
    %419 = vector.broadcast %392 : vector<1x192xf32> to vector<9x192xf32>
    %420 = arith.addf %418, %419 : vector<9x192xf32>
    %421 = vector.extract_strided_slice %420 {offsets = [0, 0], sizes = [9, 64], strides = [1, 1]} : vector<9x192xf32> to vector<9x64xf32>
    %422 = vector.extract_strided_slice %420 {offsets = [0, 64], sizes = [9, 64], strides = [1, 1]} : vector<9x192xf32> to vector<9x64xf32>
    %423 = vector.extract_strided_slice %420 {offsets = [0, 128], sizes = [9, 64], strides = [1, 1]} : vector<9x192xf32> to vector<9x64xf32>
    %424 = vector.extract_strided_slice %421 {offsets = [0, 0], sizes = [9, 16], strides = [1, 1]} : vector<9x64xf32> to vector<9x16xf32>
    %cst_203 = arith.constant 2.500000e-01 : f32
    %425 = vector.broadcast %cst_203 : f32 to vector<9x16xf32>
    %426 = arith.mulf %424, %425 : vector<9x16xf32>
    %427 = arith.truncf %426 : vector<9x16xf32> to vector<9x16xbf16>
    %428 = vector.extract_strided_slice %422 {offsets = [0, 0], sizes = [9, 16], strides = [1, 1]} : vector<9x64xf32> to vector<9x16xf32>
    %429 = arith.truncf %428 : vector<9x16xf32> to vector<9x16xbf16>
    %430 = vector.extract_strided_slice %423 {offsets = [0, 0], sizes = [9, 16], strides = [1, 1]} : vector<9x64xf32> to vector<9x16xf32>
    %431 = arith.truncf %430 : vector<9x16xf32> to vector<9x16xbf16>
    %cst_204 = arith.constant dense<0.000000e+00> : vector<9x9xf32>
    %432 = tpu.matmul %427, %429, %cst_204 {dimension_numbers = #tpu.dot_dimension_numbers<[1], [1], [0], [0], [0, 0, 1, 0], [], []>} : vector<9x16xbf16>, vector<9x16xbf16>, vector<9x9xf32> -> vector<9x9xf32>
    %433 = arith.addf %432, %376 : vector<9x9xf32>
    %cst_205 = arith.constant dense<0xFF800000> : vector<9xf32>
    %434 = vector.multi_reduction <maximumf>, %433, %cst_205 [1] : vector<9x9xf32> to vector<9xf32>
    %435 = vector.shape_cast %434 : vector<9xf32> to vector<9x1xf32>
    %436 = vector.broadcast %435 : vector<9x1xf32> to vector<9x9xf32>
    %437 = arith.subf %433, %436 : vector<9x9xf32>
    %438 = math.exp %437 : vector<9x9xf32>
    %cst_206 = arith.constant dense<0.000000e+00> : vector<9xf32>
    %439 = vector.multi_reduction <add>, %438, %cst_206 [1] : vector<9x9xf32> to vector<9xf32>
    %440 = vector.shape_cast %439 : vector<9xf32> to vector<9x1xf32>
    %441 = tpu.reciprocal %440 {approx = true} : vector<9x1xf32> -> vector<9x1xf32>
    %442 = vector.broadcast %441 : vector<9x1xf32> to vector<9x9xf32>
    %443 = arith.mulf %438, %442 : vector<9x9xf32>
    %444 = arith.truncf %443 : vector<9x9xf32> to vector<9x9xbf16>
    %cst_207 = arith.constant dense<0.000000e+00> : vector<9x16xf32>
    %445 = tpu.matmul %444, %431, %cst_207 {dimension_numbers = #tpu.dot_dimension_numbers<[1], [0], [0], [1], [0, 0, 1, 1], [], []>} : vector<9x9xbf16>, vector<9x16xbf16>, vector<9x16xf32> -> vector<9x16xf32>
    %446 = vector.extract_strided_slice %421 {offsets = [0, 16], sizes = [9, 16], strides = [1, 1]} : vector<9x64xf32> to vector<9x16xf32>
    %cst_208 = arith.constant 2.500000e-01 : f32
    %447 = vector.broadcast %cst_208 : f32 to vector<9x16xf32>
    %448 = arith.mulf %446, %447 : vector<9x16xf32>
    %449 = arith.truncf %448 : vector<9x16xf32> to vector<9x16xbf16>
    %450 = vector.extract_strided_slice %422 {offsets = [0, 16], sizes = [9, 16], strides = [1, 1]} : vector<9x64xf32> to vector<9x16xf32>
    %451 = arith.truncf %450 : vector<9x16xf32> to vector<9x16xbf16>
    %452 = vector.extract_strided_slice %423 {offsets = [0, 16], sizes = [9, 16], strides = [1, 1]} : vector<9x64xf32> to vector<9x16xf32>
    %453 = arith.truncf %452 : vector<9x16xf32> to vector<9x16xbf16>
    %cst_209 = arith.constant dense<0.000000e+00> : vector<9x9xf32>
    %454 = tpu.matmul %449, %451, %cst_209 {dimension_numbers = #tpu.dot_dimension_numbers<[1], [1], [0], [0], [0, 0, 1, 0], [], []>} : vector<9x16xbf16>, vector<9x16xbf16>, vector<9x9xf32> -> vector<9x9xf32>
    %455 = arith.addf %454, %376 : vector<9x9xf32>
    %cst_210 = arith.constant dense<0xFF800000> : vector<9xf32>
    %456 = vector.multi_reduction <maximumf>, %455, %cst_210 [1] : vector<9x9xf32> to vector<9xf32>
    %457 = vector.shape_cast %456 : vector<9xf32> to vector<9x1xf32>
    %458 = vector.broadcast %457 : vector<9x1xf32> to vector<9x9xf32>
    %459 = arith.subf %455, %458 : vector<9x9xf32>
    %460 = math.exp %459 : vector<9x9xf32>
    %cst_211 = arith.constant dense<0.000000e+00> : vector<9xf32>
    %461 = vector.multi_reduction <add>, %460, %cst_211 [1] : vector<9x9xf32> to vector<9xf32>
    %462 = vector.shape_cast %461 : vector<9xf32> to vector<9x1xf32>
    %463 = tpu.reciprocal %462 {approx = true} : vector<9x1xf32> -> vector<9x1xf32>
    %464 = vector.broadcast %463 : vector<9x1xf32> to vector<9x9xf32>
    %465 = arith.mulf %460, %464 : vector<9x9xf32>
    %466 = arith.truncf %465 : vector<9x9xf32> to vector<9x9xbf16>
    %cst_212 = arith.constant dense<0.000000e+00> : vector<9x16xf32>
    %467 = tpu.matmul %466, %453, %cst_212 {dimension_numbers = #tpu.dot_dimension_numbers<[1], [0], [0], [1], [0, 0, 1, 1], [], []>} : vector<9x9xbf16>, vector<9x16xbf16>, vector<9x16xf32> -> vector<9x16xf32>
    %468 = vector.extract_strided_slice %421 {offsets = [0, 32], sizes = [9, 16], strides = [1, 1]} : vector<9x64xf32> to vector<9x16xf32>
    %cst_213 = arith.constant 2.500000e-01 : f32
    %469 = vector.broadcast %cst_213 : f32 to vector<9x16xf32>
    %470 = arith.mulf %468, %469 : vector<9x16xf32>
    %471 = arith.truncf %470 : vector<9x16xf32> to vector<9x16xbf16>
    %472 = vector.extract_strided_slice %422 {offsets = [0, 32], sizes = [9, 16], strides = [1, 1]} : vector<9x64xf32> to vector<9x16xf32>
    %473 = arith.truncf %472 : vector<9x16xf32> to vector<9x16xbf16>
    %474 = vector.extract_strided_slice %423 {offsets = [0, 32], sizes = [9, 16], strides = [1, 1]} : vector<9x64xf32> to vector<9x16xf32>
    %475 = arith.truncf %474 : vector<9x16xf32> to vector<9x16xbf16>
    %cst_214 = arith.constant dense<0.000000e+00> : vector<9x9xf32>
    %476 = tpu.matmul %471, %473, %cst_214 {dimension_numbers = #tpu.dot_dimension_numbers<[1], [1], [0], [0], [0, 0, 1, 0], [], []>} : vector<9x16xbf16>, vector<9x16xbf16>, vector<9x9xf32> -> vector<9x9xf32>
    %477 = arith.addf %476, %376 : vector<9x9xf32>
    %cst_215 = arith.constant dense<0xFF800000> : vector<9xf32>
    %478 = vector.multi_reduction <maximumf>, %477, %cst_215 [1] : vector<9x9xf32> to vector<9xf32>
    %479 = vector.shape_cast %478 : vector<9xf32> to vector<9x1xf32>
    %480 = vector.broadcast %479 : vector<9x1xf32> to vector<9x9xf32>
    %481 = arith.subf %477, %480 : vector<9x9xf32>
    %482 = math.exp %481 : vector<9x9xf32>
    %cst_216 = arith.constant dense<0.000000e+00> : vector<9xf32>
    %483 = vector.multi_reduction <add>, %482, %cst_216 [1] : vector<9x9xf32> to vector<9xf32>
    %484 = vector.shape_cast %483 : vector<9xf32> to vector<9x1xf32>
    %485 = tpu.reciprocal %484 {approx = true} : vector<9x1xf32> -> vector<9x1xf32>
    %486 = vector.broadcast %485 : vector<9x1xf32> to vector<9x9xf32>
    %487 = arith.mulf %482, %486 : vector<9x9xf32>
    %488 = arith.truncf %487 : vector<9x9xf32> to vector<9x9xbf16>
    %cst_217 = arith.constant dense<0.000000e+00> : vector<9x16xf32>
    %489 = tpu.matmul %488, %475, %cst_217 {dimension_numbers = #tpu.dot_dimension_numbers<[1], [0], [0], [1], [0, 0, 1, 1], [], []>} : vector<9x9xbf16>, vector<9x16xbf16>, vector<9x16xf32> -> vector<9x16xf32>
    %490 = vector.extract_strided_slice %421 {offsets = [0, 48], sizes = [9, 16], strides = [1, 1]} : vector<9x64xf32> to vector<9x16xf32>
    %cst_218 = arith.constant 2.500000e-01 : f32
    %491 = vector.broadcast %cst_218 : f32 to vector<9x16xf32>
    %492 = arith.mulf %490, %491 : vector<9x16xf32>
    %493 = arith.truncf %492 : vector<9x16xf32> to vector<9x16xbf16>
    %494 = vector.extract_strided_slice %422 {offsets = [0, 48], sizes = [9, 16], strides = [1, 1]} : vector<9x64xf32> to vector<9x16xf32>
    %495 = arith.truncf %494 : vector<9x16xf32> to vector<9x16xbf16>
    %496 = vector.extract_strided_slice %423 {offsets = [0, 48], sizes = [9, 16], strides = [1, 1]} : vector<9x64xf32> to vector<9x16xf32>
    %497 = arith.truncf %496 : vector<9x16xf32> to vector<9x16xbf16>
    %cst_219 = arith.constant dense<0.000000e+00> : vector<9x9xf32>
    %498 = tpu.matmul %493, %495, %cst_219 {dimension_numbers = #tpu.dot_dimension_numbers<[1], [1], [0], [0], [0, 0, 1, 0], [], []>} : vector<9x16xbf16>, vector<9x16xbf16>, vector<9x9xf32> -> vector<9x9xf32>
    %499 = arith.addf %498, %376 : vector<9x9xf32>
    %cst_220 = arith.constant dense<0xFF800000> : vector<9xf32>
    %500 = vector.multi_reduction <maximumf>, %499, %cst_220 [1] : vector<9x9xf32> to vector<9xf32>
    %501 = vector.shape_cast %500 : vector<9xf32> to vector<9x1xf32>
    %502 = vector.broadcast %501 : vector<9x1xf32> to vector<9x9xf32>
    %503 = arith.subf %499, %502 : vector<9x9xf32>
    %504 = math.exp %503 : vector<9x9xf32>
    %cst_221 = arith.constant dense<0.000000e+00> : vector<9xf32>
    %505 = vector.multi_reduction <add>, %504, %cst_221 [1] : vector<9x9xf32> to vector<9xf32>
    %506 = vector.shape_cast %505 : vector<9xf32> to vector<9x1xf32>
    %507 = tpu.reciprocal %506 {approx = true} : vector<9x1xf32> -> vector<9x1xf32>
    %508 = vector.broadcast %507 : vector<9x1xf32> to vector<9x9xf32>
    %509 = arith.mulf %504, %508 : vector<9x9xf32>
    %510 = arith.truncf %509 : vector<9x9xf32> to vector<9x9xbf16>
    %cst_222 = arith.constant dense<0.000000e+00> : vector<9x16xf32>
    %511 = tpu.matmul %510, %497, %cst_222 {dimension_numbers = #tpu.dot_dimension_numbers<[1], [0], [0], [1], [0, 0, 1, 1], [], []>} : vector<9x9xbf16>, vector<9x16xbf16>, vector<9x16xf32> -> vector<9x16xf32>
    %512 = tpu.concatenate %445, %467, %489, %511 in 1 : vector<9x16xf32>, vector<9x16xf32>, vector<9x16xf32>, vector<9x16xf32> -> vector<9x64xf32>
    %513 = arith.truncf %512 : vector<9x64xf32> to vector<9x64xbf16>
    %cst_223 = arith.constant dense<0.000000e+00> : vector<9x64xf32>
    %514 = tpu.matmul %513, %380, %cst_223 {dimension_numbers = #tpu.dot_dimension_numbers<[1], [0], [0], [1], [0, 0, 1, 1], [], []>} : vector<9x64xbf16>, vector<64x64xbf16>, vector<9x64xf32> -> vector<9x64xf32>
    %515 = vector.broadcast %394 : vector<1x64xf32> to vector<9x64xf32>
    %516 = arith.addf %514, %515 : vector<9x64xf32>
    %517 = arith.addf %370, %516 : vector<9x64xf32>
    %cst_224 = arith.constant dense<0.000000e+00> : vector<9xf32>
    %518 = vector.multi_reduction <add>, %517, %cst_224 [1] : vector<9x64xf32> to vector<9xf32>
    %519 = vector.shape_cast %518 : vector<9xf32> to vector<9x1xf32>
    %cst_225 = arith.constant 6.400000e+01 : f32
    %520 = vector.broadcast %cst_225 : f32 to vector<9x1xf32>
    %521 = arith.divf %519, %520 : vector<9x1xf32>
    %522 = vector.broadcast %521 : vector<9x1xf32> to vector<9x64xf32>
    %523 = arith.subf %517, %522 : vector<9x64xf32>
    %524 = arith.mulf %523, %523 : vector<9x64xf32>
    %cst_226 = arith.constant dense<0.000000e+00> : vector<9xf32>
    %525 = vector.multi_reduction <add>, %524, %cst_226 [1] : vector<9x64xf32> to vector<9xf32>
    %526 = vector.shape_cast %525 : vector<9xf32> to vector<9x1xf32>
    %cst_227 = arith.constant 6.400000e+01 : f32
    %527 = vector.broadcast %cst_227 : f32 to vector<9x1xf32>
    %528 = arith.divf %526, %527 : vector<9x1xf32>
    %529 = vector.broadcast %521 : vector<9x1xf32> to vector<9x64xf32>
    %530 = arith.subf %517, %529 : vector<9x64xf32>
    %cst_228 = arith.constant 9.99999974E-6 : f32
    %531 = vector.broadcast %cst_228 : f32 to vector<9x1xf32>
    %532 = arith.addf %528, %531 : vector<9x1xf32>
    %533 = math.rsqrt %532 : vector<9x1xf32>
    %534 = vector.broadcast %533 : vector<9x1xf32> to vector<9x64xf32>
    %535 = arith.mulf %530, %534 : vector<9x64xf32>
    %536 = vector.broadcast %396 : vector<1x64xf32> to vector<9x64xf32>
    %537 = arith.mulf %535, %536 : vector<9x64xf32>
    %538 = vector.broadcast %398 : vector<1x64xf32> to vector<9x64xf32>
    %539 = arith.addf %537, %538 : vector<9x64xf32>
    %540 = arith.truncf %539 : vector<9x64xf32> to vector<9x64xbf16>
    %cst_229 = arith.constant dense<0.000000e+00> : vector<9x64xf32>
    %541 = tpu.matmul %540, %382, %cst_229 {dimension_numbers = #tpu.dot_dimension_numbers<[1], [0], [0], [1], [0, 0, 1, 1], [], []>} : vector<9x64xbf16>, vector<64x64xbf16>, vector<9x64xf32> -> vector<9x64xf32>
    %542 = vector.broadcast %400 : vector<1x64xf32> to vector<9x64xf32>
    %543 = arith.addf %541, %542 : vector<9x64xf32>
    %544 = arith.truncf %359 : vector<8x64xf32> to vector<8x64xbf16>
    %cst_230 = arith.constant dense<0.000000e+00> : vector<8x128xf32>
    %545 = tpu.matmul %544, %384, %cst_230 {dimension_numbers = #tpu.dot_dimension_numbers<[1], [0], [0], [1], [0, 0, 1, 1], [], []>} : vector<8x64xbf16>, vector<64x128xbf16>, vector<8x128xf32> -> vector<8x128xf32>
    %546 = vector.broadcast %402 : vector<1x128xf32> to vector<8x128xf32>
    %547 = arith.addf %545, %546 : vector<8x128xf32>
    %548 = vector.extract_strided_slice %547 {offsets = [0, 0], sizes = [8, 64], strides = [1, 1]} : vector<8x128xf32> to vector<8x64xf32>
    %549 = vector.extract_strided_slice %547 {offsets = [0, 64], sizes = [8, 64], strides = [1, 1]} : vector<8x128xf32> to vector<8x64xf32>
    %550 = vector.extract_strided_slice %543 {offsets = [0, 0], sizes = [9, 16], strides = [1, 1]} : vector<9x64xf32> to vector<9x16xf32>
    %cst_231 = arith.constant 2.500000e-01 : f32
    %551 = vector.broadcast %cst_231 : f32 to vector<9x16xf32>
    %552 = arith.mulf %550, %551 : vector<9x16xf32>
    %553 = arith.truncf %552 : vector<9x16xf32> to vector<9x16xbf16>
    %554 = vector.extract_strided_slice %548 {offsets = [0, 0], sizes = [8, 16], strides = [1, 1]} : vector<8x64xf32> to vector<8x16xf32>
    %555 = arith.truncf %554 : vector<8x16xf32> to vector<8x16xbf16>
    %556 = vector.extract_strided_slice %549 {offsets = [0, 0], sizes = [8, 16], strides = [1, 1]} : vector<8x64xf32> to vector<8x16xf32>
    %557 = arith.truncf %556 : vector<8x16xf32> to vector<8x16xbf16>
    %cst_232 = arith.constant dense<0.000000e+00> : vector<9x8xf32>
    %558 = tpu.matmul %553, %555, %cst_232 {dimension_numbers = #tpu.dot_dimension_numbers<[1], [1], [0], [0], [0, 0, 1, 0], [], []>} : vector<9x16xbf16>, vector<8x16xbf16>, vector<9x8xf32> -> vector<9x8xf32>
    %cst_233 = arith.constant dense<0xFF800000> : vector<9xf32>
    %559 = vector.multi_reduction <maximumf>, %558, %cst_233 [1] : vector<9x8xf32> to vector<9xf32>
    %560 = vector.shape_cast %559 : vector<9xf32> to vector<9x1xf32>
    %561 = vector.broadcast %560 : vector<9x1xf32> to vector<9x8xf32>
    %562 = arith.subf %558, %561 : vector<9x8xf32>
    %563 = math.exp %562 : vector<9x8xf32>
    %cst_234 = arith.constant dense<0.000000e+00> : vector<9xf32>
    %564 = vector.multi_reduction <add>, %563, %cst_234 [1] : vector<9x8xf32> to vector<9xf32>
    %565 = vector.shape_cast %564 : vector<9xf32> to vector<9x1xf32>
    %566 = tpu.reciprocal %565 {approx = true} : vector<9x1xf32> -> vector<9x1xf32>
    %567 = vector.broadcast %566 : vector<9x1xf32> to vector<9x8xf32>
    %568 = arith.mulf %563, %567 : vector<9x8xf32>
    %569 = arith.truncf %568 : vector<9x8xf32> to vector<9x8xbf16>
    %cst_235 = arith.constant dense<0.000000e+00> : vector<9x16xf32>
    %570 = tpu.matmul %569, %557, %cst_235 {dimension_numbers = #tpu.dot_dimension_numbers<[1], [0], [0], [1], [0, 0, 1, 1], [], []>} : vector<9x8xbf16>, vector<8x16xbf16>, vector<9x16xf32> -> vector<9x16xf32>
    %571 = vector.extract_strided_slice %543 {offsets = [0, 16], sizes = [9, 16], strides = [1, 1]} : vector<9x64xf32> to vector<9x16xf32>
    %cst_236 = arith.constant 2.500000e-01 : f32
    %572 = vector.broadcast %cst_236 : f32 to vector<9x16xf32>
    %573 = arith.mulf %571, %572 : vector<9x16xf32>
    %574 = arith.truncf %573 : vector<9x16xf32> to vector<9x16xbf16>
    %575 = vector.extract_strided_slice %548 {offsets = [0, 16], sizes = [8, 16], strides = [1, 1]} : vector<8x64xf32> to vector<8x16xf32>
    %576 = arith.truncf %575 : vector<8x16xf32> to vector<8x16xbf16>
    %577 = vector.extract_strided_slice %549 {offsets = [0, 16], sizes = [8, 16], strides = [1, 1]} : vector<8x64xf32> to vector<8x16xf32>
    %578 = arith.truncf %577 : vector<8x16xf32> to vector<8x16xbf16>
    %cst_237 = arith.constant dense<0.000000e+00> : vector<9x8xf32>
    %579 = tpu.matmul %574, %576, %cst_237 {dimension_numbers = #tpu.dot_dimension_numbers<[1], [1], [0], [0], [0, 0, 1, 0], [], []>} : vector<9x16xbf16>, vector<8x16xbf16>, vector<9x8xf32> -> vector<9x8xf32>
    %cst_238 = arith.constant dense<0xFF800000> : vector<9xf32>
    %580 = vector.multi_reduction <maximumf>, %579, %cst_238 [1] : vector<9x8xf32> to vector<9xf32>
    %581 = vector.shape_cast %580 : vector<9xf32> to vector<9x1xf32>
    %582 = vector.broadcast %581 : vector<9x1xf32> to vector<9x8xf32>
    %583 = arith.subf %579, %582 : vector<9x8xf32>
    %584 = math.exp %583 : vector<9x8xf32>
    %cst_239 = arith.constant dense<0.000000e+00> : vector<9xf32>
    %585 = vector.multi_reduction <add>, %584, %cst_239 [1] : vector<9x8xf32> to vector<9xf32>
    %586 = vector.shape_cast %585 : vector<9xf32> to vector<9x1xf32>
    %587 = tpu.reciprocal %586 {approx = true} : vector<9x1xf32> -> vector<9x1xf32>
    %588 = vector.broadcast %587 : vector<9x1xf32> to vector<9x8xf32>
    %589 = arith.mulf %584, %588 : vector<9x8xf32>
    %590 = arith.truncf %589 : vector<9x8xf32> to vector<9x8xbf16>
    %cst_240 = arith.constant dense<0.000000e+00> : vector<9x16xf32>
    %591 = tpu.matmul %590, %578, %cst_240 {dimension_numbers = #tpu.dot_dimension_numbers<[1], [0], [0], [1], [0, 0, 1, 1], [], []>} : vector<9x8xbf16>, vector<8x16xbf16>, vector<9x16xf32> -> vector<9x16xf32>
    %592 = vector.extract_strided_slice %543 {offsets = [0, 32], sizes = [9, 16], strides = [1, 1]} : vector<9x64xf32> to vector<9x16xf32>
    %cst_241 = arith.constant 2.500000e-01 : f32
    %593 = vector.broadcast %cst_241 : f32 to vector<9x16xf32>
    %594 = arith.mulf %592, %593 : vector<9x16xf32>
    %595 = arith.truncf %594 : vector<9x16xf32> to vector<9x16xbf16>
    %596 = vector.extract_strided_slice %548 {offsets = [0, 32], sizes = [8, 16], strides = [1, 1]} : vector<8x64xf32> to vector<8x16xf32>
    %597 = arith.truncf %596 : vector<8x16xf32> to vector<8x16xbf16>
    %598 = vector.extract_strided_slice %549 {offsets = [0, 32], sizes = [8, 16], strides = [1, 1]} : vector<8x64xf32> to vector<8x16xf32>
    %599 = arith.truncf %598 : vector<8x16xf32> to vector<8x16xbf16>
    %cst_242 = arith.constant dense<0.000000e+00> : vector<9x8xf32>
    %600 = tpu.matmul %595, %597, %cst_242 {dimension_numbers = #tpu.dot_dimension_numbers<[1], [1], [0], [0], [0, 0, 1, 0], [], []>} : vector<9x16xbf16>, vector<8x16xbf16>, vector<9x8xf32> -> vector<9x8xf32>
    %cst_243 = arith.constant dense<0xFF800000> : vector<9xf32>
    %601 = vector.multi_reduction <maximumf>, %600, %cst_243 [1] : vector<9x8xf32> to vector<9xf32>
    %602 = vector.shape_cast %601 : vector<9xf32> to vector<9x1xf32>
    %603 = vector.broadcast %602 : vector<9x1xf32> to vector<9x8xf32>
    %604 = arith.subf %600, %603 : vector<9x8xf32>
    %605 = math.exp %604 : vector<9x8xf32>
    %cst_244 = arith.constant dense<0.000000e+00> : vector<9xf32>
    %606 = vector.multi_reduction <add>, %605, %cst_244 [1] : vector<9x8xf32> to vector<9xf32>
    %607 = vector.shape_cast %606 : vector<9xf32> to vector<9x1xf32>
    %608 = tpu.reciprocal %607 {approx = true} : vector<9x1xf32> -> vector<9x1xf32>
    %609 = vector.broadcast %608 : vector<9x1xf32> to vector<9x8xf32>
    %610 = arith.mulf %605, %609 : vector<9x8xf32>
    %611 = arith.truncf %610 : vector<9x8xf32> to vector<9x8xbf16>
    %cst_245 = arith.constant dense<0.000000e+00> : vector<9x16xf32>
    %612 = tpu.matmul %611, %599, %cst_245 {dimension_numbers = #tpu.dot_dimension_numbers<[1], [0], [0], [1], [0, 0, 1, 1], [], []>} : vector<9x8xbf16>, vector<8x16xbf16>, vector<9x16xf32> -> vector<9x16xf32>
    %613 = vector.extract_strided_slice %543 {offsets = [0, 48], sizes = [9, 16], strides = [1, 1]} : vector<9x64xf32> to vector<9x16xf32>
    %cst_246 = arith.constant 2.500000e-01 : f32
    %614 = vector.broadcast %cst_246 : f32 to vector<9x16xf32>
    %615 = arith.mulf %613, %614 : vector<9x16xf32>
    %616 = arith.truncf %615 : vector<9x16xf32> to vector<9x16xbf16>
    %617 = vector.extract_strided_slice %548 {offsets = [0, 48], sizes = [8, 16], strides = [1, 1]} : vector<8x64xf32> to vector<8x16xf32>
    %618 = arith.truncf %617 : vector<8x16xf32> to vector<8x16xbf16>
    %619 = vector.extract_strided_slice %549 {offsets = [0, 48], sizes = [8, 16], strides = [1, 1]} : vector<8x64xf32> to vector<8x16xf32>
    %620 = arith.truncf %619 : vector<8x16xf32> to vector<8x16xbf16>
    %cst_247 = arith.constant dense<0.000000e+00> : vector<9x8xf32>
    %621 = tpu.matmul %616, %618, %cst_247 {dimension_numbers = #tpu.dot_dimension_numbers<[1], [1], [0], [0], [0, 0, 1, 0], [], []>} : vector<9x16xbf16>, vector<8x16xbf16>, vector<9x8xf32> -> vector<9x8xf32>
    %cst_248 = arith.constant dense<0xFF800000> : vector<9xf32>
    %622 = vector.multi_reduction <maximumf>, %621, %cst_248 [1] : vector<9x8xf32> to vector<9xf32>
    %623 = vector.shape_cast %622 : vector<9xf32> to vector<9x1xf32>
    %624 = vector.broadcast %623 : vector<9x1xf32> to vector<9x8xf32>
    %625 = arith.subf %621, %624 : vector<9x8xf32>
    %626 = math.exp %625 : vector<9x8xf32>
    %cst_249 = arith.constant dense<0.000000e+00> : vector<9xf32>
    %627 = vector.multi_reduction <add>, %626, %cst_249 [1] : vector<9x8xf32> to vector<9xf32>
    %628 = vector.shape_cast %627 : vector<9xf32> to vector<9x1xf32>
    %629 = tpu.reciprocal %628 {approx = true} : vector<9x1xf32> -> vector<9x1xf32>
    %630 = vector.broadcast %629 : vector<9x1xf32> to vector<9x8xf32>
    %631 = arith.mulf %626, %630 : vector<9x8xf32>
    %632 = arith.truncf %631 : vector<9x8xf32> to vector<9x8xbf16>
    %cst_250 = arith.constant dense<0.000000e+00> : vector<9x16xf32>
    %633 = tpu.matmul %632, %620, %cst_250 {dimension_numbers = #tpu.dot_dimension_numbers<[1], [0], [0], [1], [0, 0, 1, 1], [], []>} : vector<9x8xbf16>, vector<8x16xbf16>, vector<9x16xf32> -> vector<9x16xf32>
    %634 = tpu.concatenate %570, %591, %612, %633 in 1 : vector<9x16xf32>, vector<9x16xf32>, vector<9x16xf32>, vector<9x16xf32> -> vector<9x64xf32>
    %635 = arith.truncf %634 : vector<9x64xf32> to vector<9x64xbf16>
    %cst_251 = arith.constant dense<0.000000e+00> : vector<9x64xf32>
    %636 = tpu.matmul %635, %386, %cst_251 {dimension_numbers = #tpu.dot_dimension_numbers<[1], [0], [0], [1], [0, 0, 1, 1], [], []>} : vector<9x64xbf16>, vector<64x64xbf16>, vector<9x64xf32> -> vector<9x64xf32>
    %637 = vector.broadcast %404 : vector<1x64xf32> to vector<9x64xf32>
    %638 = arith.addf %636, %637 : vector<9x64xf32>
    %639 = arith.addf %539, %638 : vector<9x64xf32>
    %cst_252 = arith.constant dense<0.000000e+00> : vector<9xf32>
    %640 = vector.multi_reduction <add>, %639, %cst_252 [1] : vector<9x64xf32> to vector<9xf32>
    %641 = vector.shape_cast %640 : vector<9xf32> to vector<9x1xf32>
    %cst_253 = arith.constant 6.400000e+01 : f32
    %642 = vector.broadcast %cst_253 : f32 to vector<9x1xf32>
    %643 = arith.divf %641, %642 : vector<9x1xf32>
    %644 = vector.broadcast %643 : vector<9x1xf32> to vector<9x64xf32>
    %645 = arith.subf %639, %644 : vector<9x64xf32>
    %646 = arith.mulf %645, %645 : vector<9x64xf32>
    %cst_254 = arith.constant dense<0.000000e+00> : vector<9xf32>
    %647 = vector.multi_reduction <add>, %646, %cst_254 [1] : vector<9x64xf32> to vector<9xf32>
    %648 = vector.shape_cast %647 : vector<9xf32> to vector<9x1xf32>
    %cst_255 = arith.constant 6.400000e+01 : f32
    %649 = vector.broadcast %cst_255 : f32 to vector<9x1xf32>
    %650 = arith.divf %648, %649 : vector<9x1xf32>
    %651 = vector.broadcast %643 : vector<9x1xf32> to vector<9x64xf32>
    %652 = arith.subf %639, %651 : vector<9x64xf32>
    %cst_256 = arith.constant 9.99999974E-6 : f32
    %653 = vector.broadcast %cst_256 : f32 to vector<9x1xf32>
    %654 = arith.addf %650, %653 : vector<9x1xf32>
    %655 = math.rsqrt %654 : vector<9x1xf32>
    %656 = vector.broadcast %655 : vector<9x1xf32> to vector<9x64xf32>
    %657 = arith.mulf %652, %656 : vector<9x64xf32>
    %658 = vector.broadcast %406 : vector<1x64xf32> to vector<9x64xf32>
    %659 = arith.mulf %657, %658 : vector<9x64xf32>
    %660 = vector.broadcast %408 : vector<1x64xf32> to vector<9x64xf32>
    %661 = arith.addf %659, %660 : vector<9x64xf32>
    %662 = arith.truncf %661 : vector<9x64xf32> to vector<9x64xbf16>
    %cst_257 = arith.constant dense<0.000000e+00> : vector<9x256xf32>
    %663 = tpu.matmul %662, %388, %cst_257 {dimension_numbers = #tpu.dot_dimension_numbers<[1], [0], [0], [1], [0, 0, 1, 1], [], []>} : vector<9x64xbf16>, vector<64x256xbf16>, vector<9x256xf32> -> vector<9x256xf32>
    %664 = vector.broadcast %410 : vector<1x256xf32> to vector<9x256xf32>
    %665 = arith.addf %663, %664 : vector<9x256xf32>
    %cst_258 = arith.constant 0.000000e+00 : f32
    %666 = vector.broadcast %cst_258 : f32 to vector<9x256xf32>
    %667 = arith.maximumf %665, %666 : vector<9x256xf32>
    %668 = arith.truncf %667 : vector<9x256xf32> to vector<9x256xbf16>
    %cst_259 = arith.constant dense<0.000000e+00> : vector<9x64xf32>
    %669 = tpu.matmul %668, %390, %cst_259 {dimension_numbers = #tpu.dot_dimension_numbers<[1], [0], [0], [1], [0, 0, 1, 1], [], []>} : vector<9x256xbf16>, vector<256x64xbf16>, vector<9x64xf32> -> vector<9x64xf32>
    %670 = vector.broadcast %412 : vector<1x64xf32> to vector<9x64xf32>
    %671 = arith.addf %669, %670 : vector<9x64xf32>
    %672 = arith.addf %661, %671 : vector<9x64xf32>
    %cst_260 = arith.constant dense<0.000000e+00> : vector<9xf32>
    %673 = vector.multi_reduction <add>, %672, %cst_260 [1] : vector<9x64xf32> to vector<9xf32>
    %674 = vector.shape_cast %673 : vector<9xf32> to vector<9x1xf32>
    %cst_261 = arith.constant 6.400000e+01 : f32
    %675 = vector.broadcast %cst_261 : f32 to vector<9x1xf32>
    %676 = arith.divf %674, %675 : vector<9x1xf32>
    %677 = vector.broadcast %676 : vector<9x1xf32> to vector<9x64xf32>
    %678 = arith.subf %672, %677 : vector<9x64xf32>
    %679 = arith.mulf %678, %678 : vector<9x64xf32>
    %cst_262 = arith.constant dense<0.000000e+00> : vector<9xf32>
    %680 = vector.multi_reduction <add>, %679, %cst_262 [1] : vector<9x64xf32> to vector<9xf32>
    %681 = vector.shape_cast %680 : vector<9xf32> to vector<9x1xf32>
    %cst_263 = arith.constant 6.400000e+01 : f32
    %682 = vector.broadcast %cst_263 : f32 to vector<9x1xf32>
    %683 = arith.divf %681, %682 : vector<9x1xf32>
    %684 = vector.broadcast %676 : vector<9x1xf32> to vector<9x64xf32>
    %685 = arith.subf %672, %684 : vector<9x64xf32>
    %cst_264 = arith.constant 9.99999974E-6 : f32
    %686 = vector.broadcast %cst_264 : f32 to vector<9x1xf32>
    %687 = arith.addf %683, %686 : vector<9x1xf32>
    %688 = math.rsqrt %687 : vector<9x1xf32>
    %689 = vector.broadcast %688 : vector<9x1xf32> to vector<9x64xf32>
    %690 = arith.mulf %685, %689 : vector<9x64xf32>
    %691 = vector.broadcast %414 : vector<1x64xf32> to vector<9x64xf32>
    %692 = arith.mulf %690, %691 : vector<9x64xf32>
    %693 = vector.broadcast %416 : vector<1x64xf32> to vector<9x64xf32>
    %694 = arith.addf %692, %693 : vector<9x64xf32>
    %c1_265 = arith.constant 1 : index
    %c0_266 = arith.constant 0 : index
    %c0_267 = arith.constant 0 : index
    %695 = vector.load %arg8[%c1_265, %c0_266, %c0_267] : memref<2x640x256xbf16, #tpu.memory_space<vmem>>, vector<1x64x192xbf16>
    %696 = vector.shape_cast %695 : vector<1x64x192xbf16> to vector<64x192xbf16>
    %c1_268 = arith.constant 1 : index
    %c64_269 = arith.constant 64 : index
    %c0_270 = arith.constant 0 : index
    %697 = vector.load %arg8[%c1_268, %c64_269, %c0_270] : memref<2x640x256xbf16, #tpu.memory_space<vmem>>, vector<1x64x64xbf16>
    %698 = vector.shape_cast %697 : vector<1x64x64xbf16> to vector<64x64xbf16>
    %c1_271 = arith.constant 1 : index
    %c128_272 = arith.constant 128 : index
    %c0_273 = arith.constant 0 : index
    %699 = vector.load %arg8[%c1_271, %c128_272, %c0_273] : memref<2x640x256xbf16, #tpu.memory_space<vmem>>, vector<1x64x64xbf16>
    %700 = vector.shape_cast %699 : vector<1x64x64xbf16> to vector<64x64xbf16>
    %c1_274 = arith.constant 1 : index
    %c192_275 = arith.constant 192 : index
    %c0_276 = arith.constant 0 : index
    %701 = vector.load %arg8[%c1_274, %c192_275, %c0_276] : memref<2x640x256xbf16, #tpu.memory_space<vmem>>, vector<1x64x128xbf16>
    %702 = vector.shape_cast %701 : vector<1x64x128xbf16> to vector<64x128xbf16>
    %c1_277 = arith.constant 1 : index
    %c256_278 = arith.constant 256 : index
    %c0_279 = arith.constant 0 : index
    %703 = vector.load %arg8[%c1_277, %c256_278, %c0_279] : memref<2x640x256xbf16, #tpu.memory_space<vmem>>, vector<1x64x64xbf16>
    %704 = vector.shape_cast %703 : vector<1x64x64xbf16> to vector<64x64xbf16>
    %c1_280 = arith.constant 1 : index
    %c320_281 = arith.constant 320 : index
    %c0_282 = arith.constant 0 : index
    %705 = vector.load %arg8[%c1_280, %c320_281, %c0_282] : memref<2x640x256xbf16, #tpu.memory_space<vmem>>, vector<1x64x256xbf16>
    %706 = vector.shape_cast %705 : vector<1x64x256xbf16> to vector<64x256xbf16>
    %c1_283 = arith.constant 1 : index
    %c384_284 = arith.constant 384 : index
    %c0_285 = arith.constant 0 : index
    %707 = vector.load %arg8[%c1_283, %c384_284, %c0_285] : memref<2x640x256xbf16, #tpu.memory_space<vmem>>, vector<1x256x64xbf16>
    %708 = vector.shape_cast %707 : vector<1x256x64xbf16> to vector<256x64xbf16>
    %c1_286 = arith.constant 1 : index
    %c0_287 = arith.constant 0 : index
    %c0_288 = arith.constant 0 : index
    %709 = vector.load %arg9[%c1_286, %c0_287, %c0_288] : memref<2x16x256xf32, #tpu.memory_space<vmem>>, vector<1x1x192xf32>
    %710 = vector.shape_cast %709 : vector<1x1x192xf32> to vector<1x192xf32>
    %c1_289 = arith.constant 1 : index
    %c1_290 = arith.constant 1 : index
    %c0_291 = arith.constant 0 : index
    %711 = vector.load %arg9[%c1_289, %c1_290, %c0_291] : memref<2x16x256xf32, #tpu.memory_space<vmem>>, vector<1x1x64xf32>
    %712 = vector.shape_cast %711 : vector<1x1x64xf32> to vector<1x64xf32>
    %c1_292 = arith.constant 1 : index
    %c2_293 = arith.constant 2 : index
    %c0_294 = arith.constant 0 : index
    %713 = vector.load %arg9[%c1_292, %c2_293, %c0_294] : memref<2x16x256xf32, #tpu.memory_space<vmem>>, vector<1x1x64xf32>
    %714 = vector.shape_cast %713 : vector<1x1x64xf32> to vector<1x64xf32>
    %c1_295 = arith.constant 1 : index
    %c3_296 = arith.constant 3 : index
    %c0_297 = arith.constant 0 : index
    %715 = vector.load %arg9[%c1_295, %c3_296, %c0_297] : memref<2x16x256xf32, #tpu.memory_space<vmem>>, vector<1x1x64xf32>
    %716 = vector.shape_cast %715 : vector<1x1x64xf32> to vector<1x64xf32>
    %c1_298 = arith.constant 1 : index
    %c4_299 = arith.constant 4 : index
    %c0_300 = arith.constant 0 : index
    %717 = vector.load %arg9[%c1_298, %c4_299, %c0_300] : memref<2x16x256xf32, #tpu.memory_space<vmem>>, vector<1x1x64xf32>
    %718 = vector.shape_cast %717 : vector<1x1x64xf32> to vector<1x64xf32>
    %c1_301 = arith.constant 1 : index
    %c5_302 = arith.constant 5 : index
    %c0_303 = arith.constant 0 : index
    %719 = vector.load %arg9[%c1_301, %c5_302, %c0_303] : memref<2x16x256xf32, #tpu.memory_space<vmem>>, vector<1x1x128xf32>
    %720 = vector.shape_cast %719 : vector<1x1x128xf32> to vector<1x128xf32>
    %c1_304 = arith.constant 1 : index
    %c6_305 = arith.constant 6 : index
    %c0_306 = arith.constant 0 : index
    %721 = vector.load %arg9[%c1_304, %c6_305, %c0_306] : memref<2x16x256xf32, #tpu.memory_space<vmem>>, vector<1x1x64xf32>
    %722 = vector.shape_cast %721 : vector<1x1x64xf32> to vector<1x64xf32>
    %c1_307 = arith.constant 1 : index
    %c7_308 = arith.constant 7 : index
    %c0_309 = arith.constant 0 : index
    %723 = vector.load %arg9[%c1_307, %c7_308, %c0_309] : memref<2x16x256xf32, #tpu.memory_space<vmem>>, vector<1x1x64xf32>
    %724 = vector.shape_cast %723 : vector<1x1x64xf32> to vector<1x64xf32>
    %c1_310 = arith.constant 1 : index
    %c8_311 = arith.constant 8 : index
    %c0_312 = arith.constant 0 : index
    %725 = vector.load %arg9[%c1_310, %c8_311, %c0_312] : memref<2x16x256xf32, #tpu.memory_space<vmem>>, vector<1x1x64xf32>
    %726 = vector.shape_cast %725 : vector<1x1x64xf32> to vector<1x64xf32>
    %c1_313 = arith.constant 1 : index
    %c9_314 = arith.constant 9 : index
    %c0_315 = arith.constant 0 : index
    %727 = vector.load %arg9[%c1_313, %c9_314, %c0_315] : memref<2x16x256xf32, #tpu.memory_space<vmem>>, vector<1x1x256xf32>
    %728 = vector.shape_cast %727 : vector<1x1x256xf32> to vector<1x256xf32>
    %c1_316 = arith.constant 1 : index
    %c10_317 = arith.constant 10 : index
    %c0_318 = arith.constant 0 : index
    %729 = vector.load %arg9[%c1_316, %c10_317, %c0_318] : memref<2x16x256xf32, #tpu.memory_space<vmem>>, vector<1x1x64xf32>
    %730 = vector.shape_cast %729 : vector<1x1x64xf32> to vector<1x64xf32>
    %c1_319 = arith.constant 1 : index
    %c11_320 = arith.constant 11 : index
    %c0_321 = arith.constant 0 : index
    %731 = vector.load %arg9[%c1_319, %c11_320, %c0_321] : memref<2x16x256xf32, #tpu.memory_space<vmem>>, vector<1x1x64xf32>
    %732 = vector.shape_cast %731 : vector<1x1x64xf32> to vector<1x64xf32>
    %c1_322 = arith.constant 1 : index
    %c12_323 = arith.constant 12 : index
    %c0_324 = arith.constant 0 : index
    %733 = vector.load %arg9[%c1_322, %c12_323, %c0_324] : memref<2x16x256xf32, #tpu.memory_space<vmem>>, vector<1x1x64xf32>
    %734 = vector.shape_cast %733 : vector<1x1x64xf32> to vector<1x64xf32>
    %735 = arith.truncf %694 : vector<9x64xf32> to vector<9x64xbf16>
    %cst_325 = arith.constant dense<0.000000e+00> : vector<9x192xf32>
    %736 = tpu.matmul %735, %696, %cst_325 {dimension_numbers = #tpu.dot_dimension_numbers<[1], [0], [0], [1], [0, 0, 1, 1], [], []>} : vector<9x64xbf16>, vector<64x192xbf16>, vector<9x192xf32> -> vector<9x192xf32>
    %737 = vector.broadcast %710 : vector<1x192xf32> to vector<9x192xf32>
    %738 = arith.addf %736, %737 : vector<9x192xf32>
    %739 = vector.extract_strided_slice %738 {offsets = [0, 0], sizes = [9, 64], strides = [1, 1]} : vector<9x192xf32> to vector<9x64xf32>
    %740 = vector.extract_strided_slice %738 {offsets = [0, 64], sizes = [9, 64], strides = [1, 1]} : vector<9x192xf32> to vector<9x64xf32>
    %741 = vector.extract_strided_slice %738 {offsets = [0, 128], sizes = [9, 64], strides = [1, 1]} : vector<9x192xf32> to vector<9x64xf32>
    %742 = vector.extract_strided_slice %739 {offsets = [0, 0], sizes = [9, 16], strides = [1, 1]} : vector<9x64xf32> to vector<9x16xf32>
    %cst_326 = arith.constant 2.500000e-01 : f32
    %743 = vector.broadcast %cst_326 : f32 to vector<9x16xf32>
    %744 = arith.mulf %742, %743 : vector<9x16xf32>
    %745 = arith.truncf %744 : vector<9x16xf32> to vector<9x16xbf16>
    %746 = vector.extract_strided_slice %740 {offsets = [0, 0], sizes = [9, 16], strides = [1, 1]} : vector<9x64xf32> to vector<9x16xf32>
    %747 = arith.truncf %746 : vector<9x16xf32> to vector<9x16xbf16>
    %748 = vector.extract_strided_slice %741 {offsets = [0, 0], sizes = [9, 16], strides = [1, 1]} : vector<9x64xf32> to vector<9x16xf32>
    %749 = arith.truncf %748 : vector<9x16xf32> to vector<9x16xbf16>
    %cst_327 = arith.constant dense<0.000000e+00> : vector<9x9xf32>
    %750 = tpu.matmul %745, %747, %cst_327 {dimension_numbers = #tpu.dot_dimension_numbers<[1], [1], [0], [0], [0, 0, 1, 0], [], []>} : vector<9x16xbf16>, vector<9x16xbf16>, vector<9x9xf32> -> vector<9x9xf32>
    %751 = arith.addf %750, %376 : vector<9x9xf32>
    %cst_328 = arith.constant dense<0xFF800000> : vector<9xf32>
    %752 = vector.multi_reduction <maximumf>, %751, %cst_328 [1] : vector<9x9xf32> to vector<9xf32>
    %753 = vector.shape_cast %752 : vector<9xf32> to vector<9x1xf32>
    %754 = vector.broadcast %753 : vector<9x1xf32> to vector<9x9xf32>
    %755 = arith.subf %751, %754 : vector<9x9xf32>
    %756 = math.exp %755 : vector<9x9xf32>
    %cst_329 = arith.constant dense<0.000000e+00> : vector<9xf32>
    %757 = vector.multi_reduction <add>, %756, %cst_329 [1] : vector<9x9xf32> to vector<9xf32>
    %758 = vector.shape_cast %757 : vector<9xf32> to vector<9x1xf32>
    %759 = tpu.reciprocal %758 {approx = true} : vector<9x1xf32> -> vector<9x1xf32>
    %760 = vector.broadcast %759 : vector<9x1xf32> to vector<9x9xf32>
    %761 = arith.mulf %756, %760 : vector<9x9xf32>
    %762 = arith.truncf %761 : vector<9x9xf32> to vector<9x9xbf16>
    %cst_330 = arith.constant dense<0.000000e+00> : vector<9x16xf32>
    %763 = tpu.matmul %762, %749, %cst_330 {dimension_numbers = #tpu.dot_dimension_numbers<[1], [0], [0], [1], [0, 0, 1, 1], [], []>} : vector<9x9xbf16>, vector<9x16xbf16>, vector<9x16xf32> -> vector<9x16xf32>
    %764 = vector.extract_strided_slice %739 {offsets = [0, 16], sizes = [9, 16], strides = [1, 1]} : vector<9x64xf32> to vector<9x16xf32>
    %cst_331 = arith.constant 2.500000e-01 : f32
    %765 = vector.broadcast %cst_331 : f32 to vector<9x16xf32>
    %766 = arith.mulf %764, %765 : vector<9x16xf32>
    %767 = arith.truncf %766 : vector<9x16xf32> to vector<9x16xbf16>
    %768 = vector.extract_strided_slice %740 {offsets = [0, 16], sizes = [9, 16], strides = [1, 1]} : vector<9x64xf32> to vector<9x16xf32>
    %769 = arith.truncf %768 : vector<9x16xf32> to vector<9x16xbf16>
    %770 = vector.extract_strided_slice %741 {offsets = [0, 16], sizes = [9, 16], strides = [1, 1]} : vector<9x64xf32> to vector<9x16xf32>
    %771 = arith.truncf %770 : vector<9x16xf32> to vector<9x16xbf16>
    %cst_332 = arith.constant dense<0.000000e+00> : vector<9x9xf32>
    %772 = tpu.matmul %767, %769, %cst_332 {dimension_numbers = #tpu.dot_dimension_numbers<[1], [1], [0], [0], [0, 0, 1, 0], [], []>} : vector<9x16xbf16>, vector<9x16xbf16>, vector<9x9xf32> -> vector<9x9xf32>
    %773 = arith.addf %772, %376 : vector<9x9xf32>
    %cst_333 = arith.constant dense<0xFF800000> : vector<9xf32>
    %774 = vector.multi_reduction <maximumf>, %773, %cst_333 [1] : vector<9x9xf32> to vector<9xf32>
    %775 = vector.shape_cast %774 : vector<9xf32> to vector<9x1xf32>
    %776 = vector.broadcast %775 : vector<9x1xf32> to vector<9x9xf32>
    %777 = arith.subf %773, %776 : vector<9x9xf32>
    %778 = math.exp %777 : vector<9x9xf32>
    %cst_334 = arith.constant dense<0.000000e+00> : vector<9xf32>
    %779 = vector.multi_reduction <add>, %778, %cst_334 [1] : vector<9x9xf32> to vector<9xf32>
    %780 = vector.shape_cast %779 : vector<9xf32> to vector<9x1xf32>
    %781 = tpu.reciprocal %780 {approx = true} : vector<9x1xf32> -> vector<9x1xf32>
    %782 = vector.broadcast %781 : vector<9x1xf32> to vector<9x9xf32>
    %783 = arith.mulf %778, %782 : vector<9x9xf32>
    %784 = arith.truncf %783 : vector<9x9xf32> to vector<9x9xbf16>
    %cst_335 = arith.constant dense<0.000000e+00> : vector<9x16xf32>
    %785 = tpu.matmul %784, %771, %cst_335 {dimension_numbers = #tpu.dot_dimension_numbers<[1], [0], [0], [1], [0, 0, 1, 1], [], []>} : vector<9x9xbf16>, vector<9x16xbf16>, vector<9x16xf32> -> vector<9x16xf32>
    %786 = vector.extract_strided_slice %739 {offsets = [0, 32], sizes = [9, 16], strides = [1, 1]} : vector<9x64xf32> to vector<9x16xf32>
    %cst_336 = arith.constant 2.500000e-01 : f32
    %787 = vector.broadcast %cst_336 : f32 to vector<9x16xf32>
    %788 = arith.mulf %786, %787 : vector<9x16xf32>
    %789 = arith.truncf %788 : vector<9x16xf32> to vector<9x16xbf16>
    %790 = vector.extract_strided_slice %740 {offsets = [0, 32], sizes = [9, 16], strides = [1, 1]} : vector<9x64xf32> to vector<9x16xf32>
    %791 = arith.truncf %790 : vector<9x16xf32> to vector<9x16xbf16>
    %792 = vector.extract_strided_slice %741 {offsets = [0, 32], sizes = [9, 16], strides = [1, 1]} : vector<9x64xf32> to vector<9x16xf32>
    %793 = arith.truncf %792 : vector<9x16xf32> to vector<9x16xbf16>
    %cst_337 = arith.constant dense<0.000000e+00> : vector<9x9xf32>
    %794 = tpu.matmul %789, %791, %cst_337 {dimension_numbers = #tpu.dot_dimension_numbers<[1], [1], [0], [0], [0, 0, 1, 0], [], []>} : vector<9x16xbf16>, vector<9x16xbf16>, vector<9x9xf32> -> vector<9x9xf32>
    %795 = arith.addf %794, %376 : vector<9x9xf32>
    %cst_338 = arith.constant dense<0xFF800000> : vector<9xf32>
    %796 = vector.multi_reduction <maximumf>, %795, %cst_338 [1] : vector<9x9xf32> to vector<9xf32>
    %797 = vector.shape_cast %796 : vector<9xf32> to vector<9x1xf32>
    %798 = vector.broadcast %797 : vector<9x1xf32> to vector<9x9xf32>
    %799 = arith.subf %795, %798 : vector<9x9xf32>
    %800 = math.exp %799 : vector<9x9xf32>
    %cst_339 = arith.constant dense<0.000000e+00> : vector<9xf32>
    %801 = vector.multi_reduction <add>, %800, %cst_339 [1] : vector<9x9xf32> to vector<9xf32>
    %802 = vector.shape_cast %801 : vector<9xf32> to vector<9x1xf32>
    %803 = tpu.reciprocal %802 {approx = true} : vector<9x1xf32> -> vector<9x1xf32>
    %804 = vector.broadcast %803 : vector<9x1xf32> to vector<9x9xf32>
    %805 = arith.mulf %800, %804 : vector<9x9xf32>
    %806 = arith.truncf %805 : vector<9x9xf32> to vector<9x9xbf16>
    %cst_340 = arith.constant dense<0.000000e+00> : vector<9x16xf32>
    %807 = tpu.matmul %806, %793, %cst_340 {dimension_numbers = #tpu.dot_dimension_numbers<[1], [0], [0], [1], [0, 0, 1, 1], [], []>} : vector<9x9xbf16>, vector<9x16xbf16>, vector<9x16xf32> -> vector<9x16xf32>
    %808 = vector.extract_strided_slice %739 {offsets = [0, 48], sizes = [9, 16], strides = [1, 1]} : vector<9x64xf32> to vector<9x16xf32>
    %cst_341 = arith.constant 2.500000e-01 : f32
    %809 = vector.broadcast %cst_341 : f32 to vector<9x16xf32>
    %810 = arith.mulf %808, %809 : vector<9x16xf32>
    %811 = arith.truncf %810 : vector<9x16xf32> to vector<9x16xbf16>
    %812 = vector.extract_strided_slice %740 {offsets = [0, 48], sizes = [9, 16], strides = [1, 1]} : vector<9x64xf32> to vector<9x16xf32>
    %813 = arith.truncf %812 : vector<9x16xf32> to vector<9x16xbf16>
    %814 = vector.extract_strided_slice %741 {offsets = [0, 48], sizes = [9, 16], strides = [1, 1]} : vector<9x64xf32> to vector<9x16xf32>
    %815 = arith.truncf %814 : vector<9x16xf32> to vector<9x16xbf16>
    %cst_342 = arith.constant dense<0.000000e+00> : vector<9x9xf32>
    %816 = tpu.matmul %811, %813, %cst_342 {dimension_numbers = #tpu.dot_dimension_numbers<[1], [1], [0], [0], [0, 0, 1, 0], [], []>} : vector<9x16xbf16>, vector<9x16xbf16>, vector<9x9xf32> -> vector<9x9xf32>
    %817 = arith.addf %816, %376 : vector<9x9xf32>
    %cst_343 = arith.constant dense<0xFF800000> : vector<9xf32>
    %818 = vector.multi_reduction <maximumf>, %817, %cst_343 [1] : vector<9x9xf32> to vector<9xf32>
    %819 = vector.shape_cast %818 : vector<9xf32> to vector<9x1xf32>
    %820 = vector.broadcast %819 : vector<9x1xf32> to vector<9x9xf32>
    %821 = arith.subf %817, %820 : vector<9x9xf32>
    %822 = math.exp %821 : vector<9x9xf32>
    %cst_344 = arith.constant dense<0.000000e+00> : vector<9xf32>
    %823 = vector.multi_reduction <add>, %822, %cst_344 [1] : vector<9x9xf32> to vector<9xf32>
    %824 = vector.shape_cast %823 : vector<9xf32> to vector<9x1xf32>
    %825 = tpu.reciprocal %824 {approx = true} : vector<9x1xf32> -> vector<9x1xf32>
    %826 = vector.broadcast %825 : vector<9x1xf32> to vector<9x9xf32>
    %827 = arith.mulf %822, %826 : vector<9x9xf32>
    %828 = arith.truncf %827 : vector<9x9xf32> to vector<9x9xbf16>
    %cst_345 = arith.constant dense<0.000000e+00> : vector<9x16xf32>
    %829 = tpu.matmul %828, %815, %cst_345 {dimension_numbers = #tpu.dot_dimension_numbers<[1], [0], [0], [1], [0, 0, 1, 1], [], []>} : vector<9x9xbf16>, vector<9x16xbf16>, vector<9x16xf32> -> vector<9x16xf32>
    %830 = tpu.concatenate %763, %785, %807, %829 in 1 : vector<9x16xf32>, vector<9x16xf32>, vector<9x16xf32>, vector<9x16xf32> -> vector<9x64xf32>
    %831 = arith.truncf %830 : vector<9x64xf32> to vector<9x64xbf16>
    %cst_346 = arith.constant dense<0.000000e+00> : vector<9x64xf32>
    %832 = tpu.matmul %831, %698, %cst_346 {dimension_numbers = #tpu.dot_dimension_numbers<[1], [0], [0], [1], [0, 0, 1, 1], [], []>} : vector<9x64xbf16>, vector<64x64xbf16>, vector<9x64xf32> -> vector<9x64xf32>
    %833 = vector.broadcast %712 : vector<1x64xf32> to vector<9x64xf32>
    %834 = arith.addf %832, %833 : vector<9x64xf32>
    %835 = arith.addf %694, %834 : vector<9x64xf32>
    %cst_347 = arith.constant dense<0.000000e+00> : vector<9xf32>
    %836 = vector.multi_reduction <add>, %835, %cst_347 [1] : vector<9x64xf32> to vector<9xf32>
    %837 = vector.shape_cast %836 : vector<9xf32> to vector<9x1xf32>
    %cst_348 = arith.constant 6.400000e+01 : f32
    %838 = vector.broadcast %cst_348 : f32 to vector<9x1xf32>
    %839 = arith.divf %837, %838 : vector<9x1xf32>
    %840 = vector.broadcast %839 : vector<9x1xf32> to vector<9x64xf32>
    %841 = arith.subf %835, %840 : vector<9x64xf32>
    %842 = arith.mulf %841, %841 : vector<9x64xf32>
    %cst_349 = arith.constant dense<0.000000e+00> : vector<9xf32>
    %843 = vector.multi_reduction <add>, %842, %cst_349 [1] : vector<9x64xf32> to vector<9xf32>
    %844 = vector.shape_cast %843 : vector<9xf32> to vector<9x1xf32>
    %cst_350 = arith.constant 6.400000e+01 : f32
    %845 = vector.broadcast %cst_350 : f32 to vector<9x1xf32>
    %846 = arith.divf %844, %845 : vector<9x1xf32>
    %847 = vector.broadcast %839 : vector<9x1xf32> to vector<9x64xf32>
    %848 = arith.subf %835, %847 : vector<9x64xf32>
    %cst_351 = arith.constant 9.99999974E-6 : f32
    %849 = vector.broadcast %cst_351 : f32 to vector<9x1xf32>
    %850 = arith.addf %846, %849 : vector<9x1xf32>
    %851 = math.rsqrt %850 : vector<9x1xf32>
    %852 = vector.broadcast %851 : vector<9x1xf32> to vector<9x64xf32>
    %853 = arith.mulf %848, %852 : vector<9x64xf32>
    %854 = vector.broadcast %714 : vector<1x64xf32> to vector<9x64xf32>
    %855 = arith.mulf %853, %854 : vector<9x64xf32>
    %856 = vector.broadcast %716 : vector<1x64xf32> to vector<9x64xf32>
    %857 = arith.addf %855, %856 : vector<9x64xf32>
    %858 = arith.truncf %857 : vector<9x64xf32> to vector<9x64xbf16>
    %cst_352 = arith.constant dense<0.000000e+00> : vector<9x64xf32>
    %859 = tpu.matmul %858, %700, %cst_352 {dimension_numbers = #tpu.dot_dimension_numbers<[1], [0], [0], [1], [0, 0, 1, 1], [], []>} : vector<9x64xbf16>, vector<64x64xbf16>, vector<9x64xf32> -> vector<9x64xf32>
    %860 = vector.broadcast %718 : vector<1x64xf32> to vector<9x64xf32>
    %861 = arith.addf %859, %860 : vector<9x64xf32>
    %862 = arith.truncf %359 : vector<8x64xf32> to vector<8x64xbf16>
    %cst_353 = arith.constant dense<0.000000e+00> : vector<8x128xf32>
    %863 = tpu.matmul %862, %702, %cst_353 {dimension_numbers = #tpu.dot_dimension_numbers<[1], [0], [0], [1], [0, 0, 1, 1], [], []>} : vector<8x64xbf16>, vector<64x128xbf16>, vector<8x128xf32> -> vector<8x128xf32>
    %864 = vector.broadcast %720 : vector<1x128xf32> to vector<8x128xf32>
    %865 = arith.addf %863, %864 : vector<8x128xf32>
    %866 = vector.extract_strided_slice %865 {offsets = [0, 0], sizes = [8, 64], strides = [1, 1]} : vector<8x128xf32> to vector<8x64xf32>
    %867 = vector.extract_strided_slice %865 {offsets = [0, 64], sizes = [8, 64], strides = [1, 1]} : vector<8x128xf32> to vector<8x64xf32>
    %868 = vector.extract_strided_slice %861 {offsets = [0, 0], sizes = [9, 16], strides = [1, 1]} : vector<9x64xf32> to vector<9x16xf32>
    %cst_354 = arith.constant 2.500000e-01 : f32
    %869 = vector.broadcast %cst_354 : f32 to vector<9x16xf32>
    %870 = arith.mulf %868, %869 : vector<9x16xf32>
    %871 = arith.truncf %870 : vector<9x16xf32> to vector<9x16xbf16>
    %872 = vector.extract_strided_slice %866 {offsets = [0, 0], sizes = [8, 16], strides = [1, 1]} : vector<8x64xf32> to vector<8x16xf32>
    %873 = arith.truncf %872 : vector<8x16xf32> to vector<8x16xbf16>
    %874 = vector.extract_strided_slice %867 {offsets = [0, 0], sizes = [8, 16], strides = [1, 1]} : vector<8x64xf32> to vector<8x16xf32>
    %875 = arith.truncf %874 : vector<8x16xf32> to vector<8x16xbf16>
    %cst_355 = arith.constant dense<0.000000e+00> : vector<9x8xf32>
    %876 = tpu.matmul %871, %873, %cst_355 {dimension_numbers = #tpu.dot_dimension_numbers<[1], [1], [0], [0], [0, 0, 1, 0], [], []>} : vector<9x16xbf16>, vector<8x16xbf16>, vector<9x8xf32> -> vector<9x8xf32>
    %cst_356 = arith.constant dense<0xFF800000> : vector<9xf32>
    %877 = vector.multi_reduction <maximumf>, %876, %cst_356 [1] : vector<9x8xf32> to vector<9xf32>
    %878 = vector.shape_cast %877 : vector<9xf32> to vector<9x1xf32>
    %879 = vector.broadcast %878 : vector<9x1xf32> to vector<9x8xf32>
    %880 = arith.subf %876, %879 : vector<9x8xf32>
    %881 = math.exp %880 : vector<9x8xf32>
    %cst_357 = arith.constant dense<0.000000e+00> : vector<9xf32>
    %882 = vector.multi_reduction <add>, %881, %cst_357 [1] : vector<9x8xf32> to vector<9xf32>
    %883 = vector.shape_cast %882 : vector<9xf32> to vector<9x1xf32>
    %884 = tpu.reciprocal %883 {approx = true} : vector<9x1xf32> -> vector<9x1xf32>
    %885 = vector.broadcast %884 : vector<9x1xf32> to vector<9x8xf32>
    %886 = arith.mulf %881, %885 : vector<9x8xf32>
    %887 = arith.truncf %886 : vector<9x8xf32> to vector<9x8xbf16>
    %cst_358 = arith.constant dense<0.000000e+00> : vector<9x16xf32>
    %888 = tpu.matmul %887, %875, %cst_358 {dimension_numbers = #tpu.dot_dimension_numbers<[1], [0], [0], [1], [0, 0, 1, 1], [], []>} : vector<9x8xbf16>, vector<8x16xbf16>, vector<9x16xf32> -> vector<9x16xf32>
    %889 = vector.extract_strided_slice %861 {offsets = [0, 16], sizes = [9, 16], strides = [1, 1]} : vector<9x64xf32> to vector<9x16xf32>
    %cst_359 = arith.constant 2.500000e-01 : f32
    %890 = vector.broadcast %cst_359 : f32 to vector<9x16xf32>
    %891 = arith.mulf %889, %890 : vector<9x16xf32>
    %892 = arith.truncf %891 : vector<9x16xf32> to vector<9x16xbf16>
    %893 = vector.extract_strided_slice %866 {offsets = [0, 16], sizes = [8, 16], strides = [1, 1]} : vector<8x64xf32> to vector<8x16xf32>
    %894 = arith.truncf %893 : vector<8x16xf32> to vector<8x16xbf16>
    %895 = vector.extract_strided_slice %867 {offsets = [0, 16], sizes = [8, 16], strides = [1, 1]} : vector<8x64xf32> to vector<8x16xf32>
    %896 = arith.truncf %895 : vector<8x16xf32> to vector<8x16xbf16>
    %cst_360 = arith.constant dense<0.000000e+00> : vector<9x8xf32>
    %897 = tpu.matmul %892, %894, %cst_360 {dimension_numbers = #tpu.dot_dimension_numbers<[1], [1], [0], [0], [0, 0, 1, 0], [], []>} : vector<9x16xbf16>, vector<8x16xbf16>, vector<9x8xf32> -> vector<9x8xf32>
    %cst_361 = arith.constant dense<0xFF800000> : vector<9xf32>
    %898 = vector.multi_reduction <maximumf>, %897, %cst_361 [1] : vector<9x8xf32> to vector<9xf32>
    %899 = vector.shape_cast %898 : vector<9xf32> to vector<9x1xf32>
    %900 = vector.broadcast %899 : vector<9x1xf32> to vector<9x8xf32>
    %901 = arith.subf %897, %900 : vector<9x8xf32>
    %902 = math.exp %901 : vector<9x8xf32>
    %cst_362 = arith.constant dense<0.000000e+00> : vector<9xf32>
    %903 = vector.multi_reduction <add>, %902, %cst_362 [1] : vector<9x8xf32> to vector<9xf32>
    %904 = vector.shape_cast %903 : vector<9xf32> to vector<9x1xf32>
    %905 = tpu.reciprocal %904 {approx = true} : vector<9x1xf32> -> vector<9x1xf32>
    %906 = vector.broadcast %905 : vector<9x1xf32> to vector<9x8xf32>
    %907 = arith.mulf %902, %906 : vector<9x8xf32>
    %908 = arith.truncf %907 : vector<9x8xf32> to vector<9x8xbf16>
    %cst_363 = arith.constant dense<0.000000e+00> : vector<9x16xf32>
    %909 = tpu.matmul %908, %896, %cst_363 {dimension_numbers = #tpu.dot_dimension_numbers<[1], [0], [0], [1], [0, 0, 1, 1], [], []>} : vector<9x8xbf16>, vector<8x16xbf16>, vector<9x16xf32> -> vector<9x16xf32>
    %910 = vector.extract_strided_slice %861 {offsets = [0, 32], sizes = [9, 16], strides = [1, 1]} : vector<9x64xf32> to vector<9x16xf32>
    %cst_364 = arith.constant 2.500000e-01 : f32
    %911 = vector.broadcast %cst_364 : f32 to vector<9x16xf32>
    %912 = arith.mulf %910, %911 : vector<9x16xf32>
    %913 = arith.truncf %912 : vector<9x16xf32> to vector<9x16xbf16>
    %914 = vector.extract_strided_slice %866 {offsets = [0, 32], sizes = [8, 16], strides = [1, 1]} : vector<8x64xf32> to vector<8x16xf32>
    %915 = arith.truncf %914 : vector<8x16xf32> to vector<8x16xbf16>
    %916 = vector.extract_strided_slice %867 {offsets = [0, 32], sizes = [8, 16], strides = [1, 1]} : vector<8x64xf32> to vector<8x16xf32>
    %917 = arith.truncf %916 : vector<8x16xf32> to vector<8x16xbf16>
    %cst_365 = arith.constant dense<0.000000e+00> : vector<9x8xf32>
    %918 = tpu.matmul %913, %915, %cst_365 {dimension_numbers = #tpu.dot_dimension_numbers<[1], [1], [0], [0], [0, 0, 1, 0], [], []>} : vector<9x16xbf16>, vector<8x16xbf16>, vector<9x8xf32> -> vector<9x8xf32>
    %cst_366 = arith.constant dense<0xFF800000> : vector<9xf32>
    %919 = vector.multi_reduction <maximumf>, %918, %cst_366 [1] : vector<9x8xf32> to vector<9xf32>
    %920 = vector.shape_cast %919 : vector<9xf32> to vector<9x1xf32>
    %921 = vector.broadcast %920 : vector<9x1xf32> to vector<9x8xf32>
    %922 = arith.subf %918, %921 : vector<9x8xf32>
    %923 = math.exp %922 : vector<9x8xf32>
    %cst_367 = arith.constant dense<0.000000e+00> : vector<9xf32>
    %924 = vector.multi_reduction <add>, %923, %cst_367 [1] : vector<9x8xf32> to vector<9xf32>
    %925 = vector.shape_cast %924 : vector<9xf32> to vector<9x1xf32>
    %926 = tpu.reciprocal %925 {approx = true} : vector<9x1xf32> -> vector<9x1xf32>
    %927 = vector.broadcast %926 : vector<9x1xf32> to vector<9x8xf32>
    %928 = arith.mulf %923, %927 : vector<9x8xf32>
    %929 = arith.truncf %928 : vector<9x8xf32> to vector<9x8xbf16>
    %cst_368 = arith.constant dense<0.000000e+00> : vector<9x16xf32>
    %930 = tpu.matmul %929, %917, %cst_368 {dimension_numbers = #tpu.dot_dimension_numbers<[1], [0], [0], [1], [0, 0, 1, 1], [], []>} : vector<9x8xbf16>, vector<8x16xbf16>, vector<9x16xf32> -> vector<9x16xf32>
    %931 = vector.extract_strided_slice %861 {offsets = [0, 48], sizes = [9, 16], strides = [1, 1]} : vector<9x64xf32> to vector<9x16xf32>
    %cst_369 = arith.constant 2.500000e-01 : f32
    %932 = vector.broadcast %cst_369 : f32 to vector<9x16xf32>
    %933 = arith.mulf %931, %932 : vector<9x16xf32>
    %934 = arith.truncf %933 : vector<9x16xf32> to vector<9x16xbf16>
    %935 = vector.extract_strided_slice %866 {offsets = [0, 48], sizes = [8, 16], strides = [1, 1]} : vector<8x64xf32> to vector<8x16xf32>
    %936 = arith.truncf %935 : vector<8x16xf32> to vector<8x16xbf16>
    %937 = vector.extract_strided_slice %867 {offsets = [0, 48], sizes = [8, 16], strides = [1, 1]} : vector<8x64xf32> to vector<8x16xf32>
    %938 = arith.truncf %937 : vector<8x16xf32> to vector<8x16xbf16>
    %cst_370 = arith.constant dense<0.000000e+00> : vector<9x8xf32>
    %939 = tpu.matmul %934, %936, %cst_370 {dimension_numbers = #tpu.dot_dimension_numbers<[1], [1], [0], [0], [0, 0, 1, 0], [], []>} : vector<9x16xbf16>, vector<8x16xbf16>, vector<9x8xf32> -> vector<9x8xf32>
    %cst_371 = arith.constant dense<0xFF800000> : vector<9xf32>
    %940 = vector.multi_reduction <maximumf>, %939, %cst_371 [1] : vector<9x8xf32> to vector<9xf32>
    %941 = vector.shape_cast %940 : vector<9xf32> to vector<9x1xf32>
    %942 = vector.broadcast %941 : vector<9x1xf32> to vector<9x8xf32>
    %943 = arith.subf %939, %942 : vector<9x8xf32>
    %944 = math.exp %943 : vector<9x8xf32>
    %cst_372 = arith.constant dense<0.000000e+00> : vector<9xf32>
    %945 = vector.multi_reduction <add>, %944, %cst_372 [1] : vector<9x8xf32> to vector<9xf32>
    %946 = vector.shape_cast %945 : vector<9xf32> to vector<9x1xf32>
    %947 = tpu.reciprocal %946 {approx = true} : vector<9x1xf32> -> vector<9x1xf32>
    %948 = vector.broadcast %947 : vector<9x1xf32> to vector<9x8xf32>
    %949 = arith.mulf %944, %948 : vector<9x8xf32>
    %950 = arith.truncf %949 : vector<9x8xf32> to vector<9x8xbf16>
    %cst_373 = arith.constant dense<0.000000e+00> : vector<9x16xf32>
    %951 = tpu.matmul %950, %938, %cst_373 {dimension_numbers = #tpu.dot_dimension_numbers<[1], [0], [0], [1], [0, 0, 1, 1], [], []>} : vector<9x8xbf16>, vector<8x16xbf16>, vector<9x16xf32> -> vector<9x16xf32>
    %952 = tpu.concatenate %888, %909, %930, %951 in 1 : vector<9x16xf32>, vector<9x16xf32>, vector<9x16xf32>, vector<9x16xf32> -> vector<9x64xf32>
    %953 = arith.truncf %952 : vector<9x64xf32> to vector<9x64xbf16>
    %cst_374 = arith.constant dense<0.000000e+00> : vector<9x64xf32>
    %954 = tpu.matmul %953, %704, %cst_374 {dimension_numbers = #tpu.dot_dimension_numbers<[1], [0], [0], [1], [0, 0, 1, 1], [], []>} : vector<9x64xbf16>, vector<64x64xbf16>, vector<9x64xf32> -> vector<9x64xf32>
    %955 = vector.broadcast %722 : vector<1x64xf32> to vector<9x64xf32>
    %956 = arith.addf %954, %955 : vector<9x64xf32>
    %957 = arith.addf %857, %956 : vector<9x64xf32>
    %cst_375 = arith.constant dense<0.000000e+00> : vector<9xf32>
    %958 = vector.multi_reduction <add>, %957, %cst_375 [1] : vector<9x64xf32> to vector<9xf32>
    %959 = vector.shape_cast %958 : vector<9xf32> to vector<9x1xf32>
    %cst_376 = arith.constant 6.400000e+01 : f32
    %960 = vector.broadcast %cst_376 : f32 to vector<9x1xf32>
    %961 = arith.divf %959, %960 : vector<9x1xf32>
    %962 = vector.broadcast %961 : vector<9x1xf32> to vector<9x64xf32>
    %963 = arith.subf %957, %962 : vector<9x64xf32>
    %964 = arith.mulf %963, %963 : vector<9x64xf32>
    %cst_377 = arith.constant dense<0.000000e+00> : vector<9xf32>
    %965 = vector.multi_reduction <add>, %964, %cst_377 [1] : vector<9x64xf32> to vector<9xf32>
    %966 = vector.shape_cast %965 : vector<9xf32> to vector<9x1xf32>
    %cst_378 = arith.constant 6.400000e+01 : f32
    %967 = vector.broadcast %cst_378 : f32 to vector<9x1xf32>
    %968 = arith.divf %966, %967 : vector<9x1xf32>
    %969 = vector.broadcast %961 : vector<9x1xf32> to vector<9x64xf32>
    %970 = arith.subf %957, %969 : vector<9x64xf32>
    %cst_379 = arith.constant 9.99999974E-6 : f32
    %971 = vector.broadcast %cst_379 : f32 to vector<9x1xf32>
    %972 = arith.addf %968, %971 : vector<9x1xf32>
    %973 = math.rsqrt %972 : vector<9x1xf32>
    %974 = vector.broadcast %973 : vector<9x1xf32> to vector<9x64xf32>
    %975 = arith.mulf %970, %974 : vector<9x64xf32>
    %976 = vector.broadcast %724 : vector<1x64xf32> to vector<9x64xf32>
    %977 = arith.mulf %975, %976 : vector<9x64xf32>
    %978 = vector.broadcast %726 : vector<1x64xf32> to vector<9x64xf32>
    %979 = arith.addf %977, %978 : vector<9x64xf32>
    %980 = arith.truncf %979 : vector<9x64xf32> to vector<9x64xbf16>
    %cst_380 = arith.constant dense<0.000000e+00> : vector<9x256xf32>
    %981 = tpu.matmul %980, %706, %cst_380 {dimension_numbers = #tpu.dot_dimension_numbers<[1], [0], [0], [1], [0, 0, 1, 1], [], []>} : vector<9x64xbf16>, vector<64x256xbf16>, vector<9x256xf32> -> vector<9x256xf32>
    %982 = vector.broadcast %728 : vector<1x256xf32> to vector<9x256xf32>
    %983 = arith.addf %981, %982 : vector<9x256xf32>
    %cst_381 = arith.constant 0.000000e+00 : f32
    %984 = vector.broadcast %cst_381 : f32 to vector<9x256xf32>
    %985 = arith.maximumf %983, %984 : vector<9x256xf32>
    %986 = arith.truncf %985 : vector<9x256xf32> to vector<9x256xbf16>
    %cst_382 = arith.constant dense<0.000000e+00> : vector<9x64xf32>
    %987 = tpu.matmul %986, %708, %cst_382 {dimension_numbers = #tpu.dot_dimension_numbers<[1], [0], [0], [1], [0, 0, 1, 1], [], []>} : vector<9x256xbf16>, vector<256x64xbf16>, vector<9x64xf32> -> vector<9x64xf32>
    %988 = vector.broadcast %730 : vector<1x64xf32> to vector<9x64xf32>
    %989 = arith.addf %987, %988 : vector<9x64xf32>
    %990 = arith.addf %979, %989 : vector<9x64xf32>
    %cst_383 = arith.constant dense<0.000000e+00> : vector<9xf32>
    %991 = vector.multi_reduction <add>, %990, %cst_383 [1] : vector<9x64xf32> to vector<9xf32>
    %992 = vector.shape_cast %991 : vector<9xf32> to vector<9x1xf32>
    %cst_384 = arith.constant 6.400000e+01 : f32
    %993 = vector.broadcast %cst_384 : f32 to vector<9x1xf32>
    %994 = arith.divf %992, %993 : vector<9x1xf32>
    %995 = vector.broadcast %994 : vector<9x1xf32> to vector<9x64xf32>
    %996 = arith.subf %990, %995 : vector<9x64xf32>
    %997 = arith.mulf %996, %996 : vector<9x64xf32>
    %cst_385 = arith.constant dense<0.000000e+00> : vector<9xf32>
    %998 = vector.multi_reduction <add>, %997, %cst_385 [1] : vector<9x64xf32> to vector<9xf32>
    %999 = vector.shape_cast %998 : vector<9xf32> to vector<9x1xf32>
    %cst_386 = arith.constant 6.400000e+01 : f32
    %1000 = vector.broadcast %cst_386 : f32 to vector<9x1xf32>
    %1001 = arith.divf %999, %1000 : vector<9x1xf32>
    %1002 = vector.broadcast %994 : vector<9x1xf32> to vector<9x64xf32>
    %1003 = arith.subf %990, %1002 : vector<9x64xf32>
    %cst_387 = arith.constant 9.99999974E-6 : f32
    %1004 = vector.broadcast %cst_387 : f32 to vector<9x1xf32>
    %1005 = arith.addf %1001, %1004 : vector<9x1xf32>
    %1006 = math.rsqrt %1005 : vector<9x1xf32>
    %1007 = vector.broadcast %1006 : vector<9x1xf32> to vector<9x64xf32>
    %1008 = arith.mulf %1003, %1007 : vector<9x64xf32>
    %1009 = vector.broadcast %732 : vector<1x64xf32> to vector<9x64xf32>
    %1010 = arith.mulf %1008, %1009 : vector<9x64xf32>
    %1011 = vector.broadcast %734 : vector<1x64xf32> to vector<9x64xf32>
    %1012 = arith.addf %1010, %1011 : vector<9x64xf32>
    %1013 = arith.truncf %1012 : vector<9x64xf32> to vector<9x64xbf16>
    %c32 = arith.constant 32 : index
    %c0_388 = arith.constant 0 : index
    %1014 = vector.load %arg4[%c32, %c0_388] : memref<96x64xbf16, #tpu.memory_space<vmem>>, vector<64x8xbf16>
    %cst_389 = arith.constant dense<0.000000e+00> : vector<9x8xf32>
    %1015 = tpu.matmul %1013, %1014, %cst_389 {dimension_numbers = #tpu.dot_dimension_numbers<[1], [0], [0], [1], [0, 0, 1, 1], [], []>} : vector<9x64xbf16>, vector<64x8xbf16>, vector<9x8xf32> -> vector<9x8xf32>
    %c2_390 = arith.constant 2 : index
    %c0_391 = arith.constant 0 : index
    %1016 = vector.load %arg5[%c2_390, %c0_391] : memref<8x64xf32, #tpu.memory_space<vmem>>, vector<1x8xf32>
    %1017 = vector.broadcast %1016 : vector<1x8xf32> to vector<9x8xf32>
    %1018 = arith.addf %1015, %1017 : vector<9x8xf32>
    %1019 = tpu.iota {dimensions = array<i32: 1>} : vector<9x8xi32>
    %cst_392 = arith.constant 0.000000e+00 : f32
    %1020 = vector.broadcast %cst_392 : f32 to vector<9x8xf32>
    %1021 = arith.subf %1020, %1018 : vector<9x8xf32>
    %1022 = math.exp %1021 : vector<9x8xf32>
    %cst_393 = arith.constant 1.000000e+00 : f32
    %1023 = vector.broadcast %cst_393 : f32 to vector<9x8xf32>
    %1024 = arith.addf %1023, %1022 : vector<9x8xf32>
    %cst_394 = arith.constant 1.000000e+00 : f32
    %1025 = vector.broadcast %cst_394 : f32 to vector<9x8xf32>
    %1026 = arith.divf %1025, %1024 : vector<9x8xf32>
    %c6_i32 = arith.constant 6 : i32
    %1027 = vector.broadcast %c6_i32 : i32 to vector<9x8xi32>
    %1028 = arith.cmpi eq, %1019, %1027 : vector<9x8xi32>
    %1029 = arith.select %1028, %1026, %1018 : vector<9x8xi1>, vector<9x8xf32>
    %c0_395 = arith.constant 0 : index
    %c0_396 = arith.constant 0 : index
    %c0_397 = arith.constant 0 : index
    %1030 = vector.load %arg10[%c0_395, %c0_396, %c0_397] : memref<1x9x8xf32, #tpu.memory_space<vmem>>, vector<1x9x8xf32>
    %1031 = vector.shape_cast %1030 : vector<1x9x8xf32> to vector<9x8xf32>
    %1032 = vector.shape_cast %1029 : vector<9x8xf32> to vector<1x9x8xf32>
    tpu.vector_store %arg10[%c0_395, %c0_396, %c0_397], %1032 {strides = array<i32>} : memref<1x9x8xf32, #tpu.memory_space<vmem>>, vector<1x9x8xf32>,
    return
  }
  func.func @transform_0(%arg0: i32) -> (i32, i32, i32) {
    %c0_i32 = arith.constant 0 : i32
    %c0_i32_0 = arith.constant 0 : i32
    %c0_i32_1 = arith.constant 0 : i32
    return %arg0, %c0_i32, %c0_i32_0 : i32, i32, i32
  }
  func.func @transform_1(%arg0: i32) -> (i32, i32, i32) {
    %c0_i32 = arith.constant 0 : i32
    %c0_i32_0 = arith.constant 0 : i32
    %c0_i32_1 = arith.constant 0 : i32
    return %arg0, %c0_i32, %c0_i32_0 : i32, i32, i32
  }
  func.func @transform_2(%arg0: i32) -> (i32, i32, i32) {
    %c0_i32 = arith.constant 0 : i32
    %c0_i32_0 = arith.constant 0 : i32
    %c0_i32_1 = arith.constant 0 : i32
    %c0_i32_2 = arith.constant 0 : i32
    return %c0_i32, %c0_i32_0, %c0_i32_1 : i32, i32, i32
  }
  func.func @transform_3(%arg0: i32) -> (i32, i32) {
    %c0_i32 = arith.constant 0 : i32
    %c0_i32_0 = arith.constant 0 : i32
    %c0_i32_1 = arith.constant 0 : i32
    return %c0_i32, %c0_i32_0 : i32, i32
  }
  func.func @transform_4(%arg0: i32) -> (i32, i32) {
    %c0_i32 = arith.constant 0 : i32
    %c0_i32_0 = arith.constant 0 : i32
    %c0_i32_1 = arith.constant 0 : i32
    return %c0_i32, %c0_i32_0 : i32, i32
  }
  func.func @transform_5(%arg0: i32) -> (i32, i32, i32) {
    %c0_i32 = arith.constant 0 : i32
    %c0_i32_0 = arith.constant 0 : i32
    %c0_i32_1 = arith.constant 0 : i32
    %c0_i32_2 = arith.constant 0 : i32
    return %c0_i32, %c0_i32_0, %c0_i32_1 : i32, i32, i32
  }
  func.func @transform_6(%arg0: i32) -> (i32, i32, i32) {
    %c0_i32 = arith.constant 0 : i32
    %c0_i32_0 = arith.constant 0 : i32
    %c0_i32_1 = arith.constant 0 : i32
    %c0_i32_2 = arith.constant 0 : i32
    return %c0_i32, %c0_i32_0, %c0_i32_1 : i32, i32, i32
  }
  func.func @transform_7(%arg0: i32) -> (i32, i32, i32) {
    %c0_i32 = arith.constant 0 : i32
    %c0_i32_0 = arith.constant 0 : i32
    %c0_i32_1 = arith.constant 0 : i32
    %c0_i32_2 = arith.constant 0 : i32
    return %c0_i32, %c0_i32_0, %c0_i32_1 : i32, i32, i32
  }
  func.func @transform_8(%arg0: i32) -> (i32, i32, i32) {
    %c0_i32 = arith.constant 0 : i32
    %c0_i32_0 = arith.constant 0 : i32
    %c0_i32_1 = arith.constant 0 : i32
    %c0_i32_2 = arith.constant 0 : i32
    return %c0_i32, %c0_i32_0, %c0_i32_1 : i32, i32, i32
  }
  func.func @transform_9(%arg0: i32) -> (i32, i32, i32) {
    %c0_i32 = arith.constant 0 : i32
    %c0_i32_0 = arith.constant 0 : i32
    %c0_i32_1 = arith.constant 0 : i32
    return %arg0, %c0_i32, %c0_i32_0 : i32, i32, i32
  }
}

</mosaic_0001>

<bundles_post_ra>
// kernel: point_transformer_forward.1
= control target key start
LH: loop header
LB: loop body
LE: loop exit
PB: predicated region body
PF: predicated region fallthrough
CT: control target
= control target key end

     0   :  { %14 = vsyncpa [#allocation3], 0  ;;  %s8918_s0 = inlined_call_operand.vmem [shape: f32[2,8,8], index: 0, kind: input, shape index: {}]   ;;  %s8919_s1 = inlined_call_operand.vmem [shape: f32[2,9,8], index: 1, kind: input, shape index: {}]   ;;  %s8920_s2 = inlined_call_operand.vmem [shape: f32[1,9,64], index: 2, kind: input, shape index: {}]   ;;  %s8921_s3 = inlined_call_operand.vmem [shape: bf16[96,64], index: 3, kind: input, shape index: {}]   ;;  %s8922_s4 = inlined_call_operand.vmem [shape: f32[8,64], index: 4, kind: input, shape index: {}]   ;;  %s8923_s5 = inlined_call_operand.hbm [shape: bf16[2,448,256], index: 5, kind: input, shape index: {}]   ;;  %s8924_s6 = inlined_call_operand.vmem [shape: f32[2,8,256], index: 6, kind: input, shape index: {}]   ;;  %s8925_s7 = inlined_call_operand.hbm [shape: bf16[2,640,256], index: 7, kind: input, shape index: {}]   ;;  %s8926_s8 = inlined_call_operand.vmem [shape: f32[2,16,256], index: 8, kind: input, shape index: {}]   ;;  %s8927_s9 = inlined_call_operand.vmem [shape: f32[2,9,8], index: 9, kind: output, shape index: {}]  }
   0x1   :  { %15 = vsyncpa [#allocation5], 0  ;;  %s7925_s30 = smov 0  }
   0x2 LB: > { %s7931_s10 = sadd.s32 4294967295, %s7858_s30   ;;  %p6328_p0 = scmp.ge.s32.totalorder %s7858_s30, 1  ;;  %s7858_s30 = sphi %s7925_s30, %s21_s30  }
   0x3   : > { %p251_p1 = scmp.lt.s32.totalorder %s7858_s30, 3  ;;  %s7860_s11 = smov [#allocation2]  }
   0x4   : > { %s272_s12 = sshll.u32 %s7860_s11, 4  ;;  %p7301_p3 = scmp.eq.s32.totalorder %s7931_s10, 0  ;;  %s273_s12 = int_to_ptr.vmem [resolvable:$true] %s272_s12 }
   0x5   : > { %p7935_p2 = pnand %p6328_p0, %p251_p1  ;;  %s7861_s14 = smov [#allocation4]  }
   0x6   : > { %s288_s15 = sshll.u32 %s7861_s14, 4  ;;  %s7803_s17 = scalar_lea.vmem %s273_s12, 14336  ;;  %s289_s15 = int_to_ptr.vmem [resolvable:$true] %s288_s15 }
   0x7   : > { %p7294_p4 = pneg %p7935_p2  ;;  %p7804_p7 = scmp.ne.s32.totalorder %s273_s12, %s7803_s17 }
   0x8   : > { %p7811_p10 = scmp.lt.s32.totalorder %s273_s12, %s273_s12  ;;  %p7812_p11 = scmp.lt.s32.totalorder %s7803_s17, %s7803_s17 }
   0x9   : > { %p7944_p5 = pnand %p7301_p3, %p7294_p4 }
   0xa   : > { %p7813_p12 = por %p7812_p11, %p7811_p10 }
   0xb   : > { %p7794_p6 = pneg %p7944_p5 }
   0xd   : > { %p7806_p8 = pnand %p7804_p7, %p7794_p6 }
   0xf   : > { %p7807_p9 = pneg %p7806_p8 }
  0x11   : > { %p7814_p13 = pnand %p7813_p12, %p7807_p9 }
  0x13   : > { %7817 = shalt.err (!%p7814_p13)
}
  0x14   : > { %s7862_s18 = smov 128   ;;  %s7863_s19 = smov 8  }
  0x15   : > { %7297 = dma.hbm_to_vmem [thread:$0]  (!%p7944_p5), %s8923_s5, 14336, %s273_s12, [#allocation3], %s7862_s18, %s7862_s18, %s7863_s19  }
  0x16   : > { %s7829_s22 = scalar_lea.vmem %s289_s15, 20480  ;;  %p7837_p7 = scmp.lt.s32.totalorder %s289_s15, %s289_s15 }
  0x17   : > { %p7830_p0 = scmp.ne.s32.totalorder %s289_s15, %s7829_s22  ;;  %p7838_p8 = scmp.lt.s32.totalorder %s7829_s22, %s7829_s22 }
  0x19   : > { %p7832_p1 = pnand %p7830_p0, %p7794_p6  ;;  %p7839_p10 = por %p7838_p8, %p7837_p7 }
  0x1b   : > { %p7833_p4 = pneg %p7832_p1 }
  0x1d   : > { %p7840_p9 = pnand %p7839_p10, %p7833_p4 }
  0x1f   : > { %7843 = shalt.err (!%p7840_p9)
}
  0x20   : > { %7300 = dma.hbm_to_vmem [thread:$0]  (!%p7944_p5), %s8925_s7, 20480, %s289_s15, [#allocation5], %s7862_s18, %s7862_s18, %s7863_s19  }
  0x21   : > { %322 = sbr.rel (%p7935_p2) target bundleno = 13152 (0x3360), region = 56 }
  0x26   : > { %7849 = dma.done.wait (%p7301_p3), [#allocation3], 14336  }
  0x27   : > { %7851 = vsyncadd (%p7301_p3), [#allocation3], 4294952960 }
  0x28   : > { %7853 = dma.done.wait (%p7301_p3), [#allocation5], 20480  }
  0x29   : > { %7855 = vsyncadd (%p7301_p3), [#allocation5], 4294946816  ;;  %p366_p6 = scmp.lt.s32.totalorder %s7931_s10, 1  ;;  %v7864_v0 = vmov 0.0   ;;  %vm7865_vm0 = vmmov 0   ;;  %vm393_vm1 = vcmask 1043456   ;;  %v504_v21 = vlaneseq }
  0x2a   : > { %6854 = vmatprep.subr.bf16.mxu1 %v7864_v0  ;;  %6856 = vmatprep.mubr.msk.bf16.mxu1 %vm7865_vm0, %v7864_v0  ;;  %v383_v1 = vld [vmem:[%s8921_s3] sm:$0xf]  ;;  %v7390_v5 = vld [vmem:[#allocation2 + $0x34] ss:$8 sps:$4 sm:$0xff]   ;;  %vm389_vm2 = vcmask 64512   ;;  %v7866_v13 = vmov 0  }
  0x2b   : > { %s8931_s10 = smov (!%p366_p6, %s7931_s10), 1  ;;  %6860 = vmatprep.subr.bf16.mxu0 %v7864_v0  ;;  %6862 = vmatprep.mubr.msk.bf16.mxu0 %vm7865_vm0, %v7864_v0  ;;  %v395_v3 = vsel %vm393_vm1, %v383_v1, 0  ;;  %v7388_v6 = vld [vmem:[#allocation2 + $0x30] ss:$8 sps:$4 sm:$0xff]   ;;  %v7393_v7 = vld [vmem:[#allocation2 + $0x24] ss:$8 sps:$4 sm:$0xff]  }
  0x2c   : > { %s6335_s25 = sshll.u32 %s8931_s10, 3  ;;  %6855 = vmatpush3.bf16.msra.mxu1 %v395_v3  ;;  %v7391_v8 = vld [vmem:[#allocation2 + $0x20] ss:$8 sps:$4 sm:$0xff]   ;;  %v7396_v9 = vld [vmem:[#allocation2 + $0x14] ss:$8 sps:$4 sm:$0xff]   ;;  %vm554_vm3 = vcmask 523264  }
  0x2d   : > { %s369_s28 = scalar_lea.vmem %s8918_s0, %s6335_s25  ;;  %566 = vmatprep.subr.bf16.mxu1 %v7390_v5  ;;  %v7394_v10 = vld [vmem:[#allocation2 + $0x10] ss:$8 sps:$4 sm:$0xff]   ;;  %v7399_v11 = vld [vmem:[#allocation2 + $0x4] ss:$8 sps:$4 sm:$0xff]   ;;  %v7397_v12 = vld [vmem:[#allocation2] ss:$8 sps:$4 sm:$0xff]  }
  0x2e   : > { %v381_v2 = vld [vmem:[%s369_s28] sm:$0xff]  ;;  %v8008_v22 = vshrl.u32 %v504_v21, 7  ;;  %s7867_s16 = smov 64   ;;  %s7868_s17 = smov 112   ;;  %vm606_vm4 = vcmask 130048   ;;  %vm1056_vm5 = vcmask 261120  }
  0x2f   : > { %v382_v4 = vpack.c.bf16 %v381_v2, %v381_v2  ;;  %v6340_v14 = vld [vmem:[%s8922_s4] ss:$0 sm:$0xff]  ;;  %s7869_s18 = smov 48   ;;  %s7870_s19 = smov 32   ;;  %vm1058_vm6 = vcmask 392192   ;;  %vm2698_vm7 = vcmask 1044480  }
  0x30   : > { %v8011_v23 = vsub.s32 0, %v8008_v22  ;;  %v493_v24 = vld [vmem:[%s8924_s6] ss:$8 sm:$0x3]  ;;  %s7871_s20 = smov 96   ;;  %s7872_s21 = smov 16  }
  0x31   : > { %6857 = vmatmul.mubr.msk.bf16.vlgmr.msra.gmra.mxu1 %vm389_vm2, %v382_v4  ;;  %s7873_s22 = smov 80   ;;  %v8025_v34 = vsub.s32 1, %v8008_v22  ;;  %s6609_s14 = sshll.u32 %s8931_s10, 4  ;;  %vm2670_vm10 = vcmask 72704   ;;  %vm2674_vm11 = vcmask 65536   ;;  %vm3220_vm12 = vcmask 516096  }
  0x32   : > { %567 = vmatpush1.bf16.msra.mxu1 %v7388_v6  ;;  %590 = vmatprep.mubr.bf16.mxu1 %v7866_v13  ;;  %v507_v25 = vrot.slane %v493_v24, %v8011_v23  ;;  %s374_s26 = scalar_lea.vmem %s8919_s1, %s6609_s14  ;;  %vm3439_vm13 = vcmask 57344   ;;  %s379_s25 = scalar_lea.vmem %s8927_s9, %s6609_s14 }
  0x33   : > { %568 = vmatprep.subr.bf16.mxu1 %v7393_v7  ;;  %v511_v35 = vrot.slane %v493_v24, %v8025_v34 }
  0x36   : > { %569 = vmatpush1.bf16.msra.mxu1 %v7391_v8 }
  0x37   : > { %570 = vmatprep.subr.bf16.mxu1 %v7396_v9 }
  0x3a   : > { %571 = vmatpush1.bf16.msra.mxu1 %v7394_v10 }
  0x3b   : > { %572 = vmatprep.subr.bf16.mxu1 %v7399_v11 }
  0x3e   : > { %573 = vmatpush1.bf16.msra.mxu1 %v7397_v12 }
  0x3f   : > { %6872 = vmatprep.subr.bf16.mxu1 %v7864_v0 }
  0xf1   : > { %v431_v15 = vpop.f32.mrf.mxu1 }
  0xf2   : > { %v8000_v16 = vadd.f32 %v6340_v14, %v431_v15 }
  0xf3   : > { %v6858_v17 = vpop.f32.mrf.mxu1 }
  0xf4   : > { %v502_v18 = vpack.c.bf16 %v8000_v16, %v8000_v16 }
  0xf5   : > { %v434_v19 = vpop.f32.mrf.mxu1 }
  0xf6   : > { %6351 = vmatmul.mubr.msk.bf16.vlgmr.msra.gmra.mxu1 %vm554_vm3, %v502_v18 }
  0xf7   : > { %v6859_v20 = vpop.f32.mrf.mxu1  ;;  %6874 = vmatprep.mubr.msk.bf16.mxu1 %vm7865_vm0, %v7864_v0 }
 0x1b6   : > { %v592_v26 = vpop.f32.mrf.mxu1 }
 0x1b7   : > { %v593_v27 = vadd.f32 %v592_v26, %v507_v25 }
 0x1b8   : > { %v594_v28 = vpop.f32.mrf.mxu1 }
 0x1b9   : > { %v599_v29 = vmul.f32 0.25, %v593_v27  ;;  %v601_v30 = vpack.c.bf16 %v593_v27, %v593_v27  ;;  %v595_v37 = vadd.f32 %v594_v28, %v511_v35 }
 0x1ba   : > { %v596_v31 = vpop.f32.mrf.mxu1 }
 0x1bb   : > { %v600_v32 = vpack.c.bf16 %v599_v29, %v599_v29  ;;  %604 = vrot.lane.b32.xlu0 %v601_v30, %s7867_s16  ;;  %v8030_v41 = vpack.c.bf16 %v595_v37, %v595_v37 }
 0x1bc   : > { %v597_v33 = vpop.f32.mrf.mxu1 }
 0x1bd   : > { %712 = vrot.lane.b32.xlu1 %v600_v32, %s7868_s17  ;;  %v669_v43 = vsel %vm393_vm1, %v8030_v41, 0 }
 0x1bf   : > { %714 = vrot.lane.b32.xlu0 %v601_v30, %s7869_s18 }
 0x1c1   : > { %825 = vrot.lane.b32.xlu1 %v601_v30, %s7870_s19 }
 0x1c3   : > { %823 = vrot.lane.b32.xlu0 %v600_v32, %s7871_s20 }
 0x1c5   : > { %935 = vrot.lane.b32.xlu1 %v601_v30, %s7872_s21 }
 0x1c7   : > { %933 = vrot.lane.b32.xlu0 %v600_v32, %s7873_s22 }
 0x22d   : > { %v605_v36 = vpop.permute.xlu0 %604 }
 0x22e   : > { %v611_v38 = vsel %vm606_vm4, %v605_v36, 0 }
 0x22f   : > { %6861 = vmatpush3.bf16.xpose.msra.mxu0 %v611_v38  ;;  %v713_v39 = vpop.permute.xlu1 %712 }
 0x230   : > { %6866 = vmatprep.subr.bf16.mxu0 %v7864_v0 }
 0x231   : > { %v715_v40 = vpop.permute.xlu0 %714 }
 0x232   : > { %v720_v42 = vsel %vm606_vm4, %v715_v40, 0 }
 0x233   : > { %6873 = vmatpush3.bf16.xpose.msra.mxu1 %v720_v42  ;;  %v826_v44 = vpop.permute.xlu1 %825 }
 0x234   : > { %6884 = vmatprep.subr.bf16.mxu1 %v7864_v0  ;;  %v831_v45 = vsel %vm606_vm4, %v826_v44, 0 }
 0x235   : > { %v824_v47 = vpop.permute.xlu0 %823 }
 0x236   : > { %6863 = vmatmul.mubr.msk.bf16.vlgmr.msra.gmra.mxu0 %vm606_vm4, %v600_v32 }
 0x237   : > { %6867 = vmatpush3.bf16.msra.mxu0 %v669_v43  ;;  %6868 = vmatprep.mubr.msk.bf16.mxu0 %vm7865_vm0, %v7864_v0  ;;  %v936_v46 = vpop.permute.xlu1 %935 }
 0x238   : > { %6878 = vmatprep.subr.bf16.mxu0 %v7864_v0  ;;  %v941_v48 = vsel %vm606_vm4, %v936_v46, 0 }
 0x239   : > { %v934_v49 = vpop.permute.xlu0 %933 }
 0x23a   : > { %6875 = vmatmul.mubr.msk.bf16.vlgmr.msra.gmra.mxu1 %vm606_vm4, %v713_v39 }
 0x23b   : > { %6885 = vmatpush3.bf16.xpose.msra.mxu1 %v831_v45  ;;  %6886 = vmatprep.mubr.msk.bf16.mxu1 %vm7865_vm0, %v7864_v0 }
 0x23c   : > { %6896 = vmatprep.subr.bf16.mxu1 %v7864_v0 }
 0x242   : > { %6887 = vmatmul.mubr.msk.bf16.vlgmr.msra.gmra.mxu1 %vm606_vm4, %v824_v47 }
 0x243   : > { %6897 = vmatpush3.bf16.xpose.msra.mxu1 %v941_v48  ;;  %6898 = vmatprep.mubr.msk.bf16.mxu1 %vm7865_vm0, %v7864_v0 }
 0x244   : > { %6908 = vmatprep.subr.bf16.mxu1 %v7864_v0 }
 0x24a   : > { %6899 = vmatmul.mubr.msk.bf16.vlgmr.msra.gmra.mxu1 %vm606_vm4, %v934_v49 }
 0x24b   : > { %6916 = vmatprep.mubr.msk.bf16.mxu1 %vm7865_vm0, %v7864_v0 }
 0x2f6   : > { %v647_v50 = vpop.f32.mrf.mxu0 }
 0x2f7   : > { %v653_v51 = vsel %vm389_vm2, %v647_v50, -inf }
 0x2f8   : > { %654 = vmax.xlane.f32.xlu1 %v653_v51  ;;  %v6864_v52 = vpop.f32.mrf.mxu0 }
 0x2fa   : > { %v650_v53 = vpop.f32.mrf.mxu0  ;;  %v756_v54 = vpop.f32.mrf.mxu1 }
 0x2fb   : > { %v762_v55 = vsel %vm389_vm2, %v756_v54, -inf }
 0x2fc   : > { %763 = vmax.xlane.f32.xlu0 %v762_v55  ;;  %v6865_v56 = vpop.f32.mrf.mxu0  ;;  %v6876_v57 = vpop.f32.mrf.mxu1 }
 0x2fe   : > { %v759_v58 = vpop.f32.mrf.mxu1 }
 0x2ff   : > { %v7400_v58 = vld [vmem:[#allocation2 + $0x70] ss:$8 sps:$4 sm:$0xff]  }
 0x300   : > { %v6877_v59 = vpop.f32.mrf.mxu1  ;;  %6909 = vmatpush3.bf16.msra.mxu1 %v7400_v58 }
 0x301   : > { %6910 = vmatprep.subr.bf16.mxu1 %v7864_v0 }
 0x302   : > { %v867_v60 = vpop.f32.mrf.mxu1 }
 0x303   : > { %v873_v61 = vsel %vm389_vm2, %v867_v60, -inf }
 0x304   : > { %874 = vmax.xlane.f32.xlu0 %v873_v61  ;;  %v6888_v62 = vpop.f32.mrf.mxu1 }
 0x306   : > { %v870_v63 = vpop.f32.mrf.mxu1 }
 0x307   : > { %v7402_v63 = vld [vmem:[#allocation2 + $0x50] ss:$8 sps:$4 sm:$0xff]  }
 0x308   : > { %v6889_v1 = vpop.f32.mrf.mxu1 }
 0x30a   : > { %v977_v2 = vpop.f32.mrf.mxu1 }
 0x30b   : > { %v983_v3 = vsel %vm389_vm2, %v977_v2, -inf }
 0x30c   : > { %v6900_v4 = vpop.f32.mrf.mxu1  ;;  %984 = vmax.xlane.f32.xlu1 %v983_v3 }
 0x30e   : > { %v980_v5 = vpop.f32.mrf.mxu1 }
 0x310   : > { %v6901_v6 = vpop.f32.mrf.mxu1 }
 0x381   : > { %v655_v7 = vpop.xlane.xlu1 %654 }
 0x382   : > { %v656_v8 = vsub.f32 %v647_v50, %v655_v7  ;;  %v7403_v7 = vld [vmem:[#allocation2 + $0x40] ss:$8 sps:$4 sm:$0xff]  }
 0x384   : > { %v657_v9 = vmul.f32 1.442695, %v656_v8 }
 0x385   : > { %v764_v10 = vpop.xlane.xlu0 %763 }
 0x386   : > { %7592 = vpow2.f32 %v657_v9  ;;  %v765_v11 = vsub.f32 %v756_v54, %v764_v10 }
 0x388   : > { %v766_v12 = vmul.f32 1.442695, %v765_v11 }
 0x38a   : > { %7594 = vpow2.f32 %v766_v12 }
 0x38d   : > { %v875_v14 = vpop.xlane.xlu0 %874 }
 0x38e   : > { %v876_v15 = vsub.f32 %v867_v60, %v875_v14  ;;  %v7401_v60 = vld [vmem:[#allocation2 + $0x60] ss:$8 sps:$4 sm:$0xff]  }
 0x38f   : > { %6911 = vmatpush3.bf16.msra.mxu1 %v7401_v60 }
 0x390   : > { %v877_v17 = vmul.f32 1.442695, %v876_v15  ;;  %6912 = vmatprep.subr.bf16.mxu1 %v7864_v0 }
 0x392   : > { %7596 = vpow2.f32 %v877_v17 }
 0x393   : > { %v7593_v18 = vpop.eup %7592  ;;  %6913 = vmatpush3.bf16.msra.mxu1 %v7402_v63  ;;  %v496_v63 = vld [vmem:[%s8924_s6 + $0x3] ss:$0 sm:$0xff] }
 0x394   : > { %v659_v19 = vsel %vm389_vm2, %v7593_v18, 0.0  ;;  %6914 = vmatprep.subr.bf16.mxu1 %v7864_v0 }
 0x395   : > { %660 = vadd.xlane.f32.xlu0 %v659_v19  ;;  %v985_v27 = vpop.xlane.xlu1 %984 }
 0x396   : > { %v986_v28 = vsub.f32 %v977_v2, %v985_v27 }
 0x397   : > { %v7595_v20 = vpop.eup %7594  ;;  %6915 = vmatpush3.bf16.msra.mxu1 %v7403_v7  ;;  %v7431_v7 = vld [vmem:[#allocation2 + $0xc0] ss:$8 sps:$4 sm:$0xff]  }
 0x398   : > { %v768_v24 = vsel %vm389_vm2, %v7595_v20, 0.0  ;;  %v987_v29 = vmul.f32 1.442695, %v986_v28 }
 0x399   : > { %769 = vadd.xlane.f32.xlu1 %v768_v24  ;;  %v494_v24 = vld [vmem:[%s8924_s6 + $0x1] ss:$0 sm:$0xff] }
 0x39a   : > { %7598 = vpow2.f32 %v987_v29 }
 0x39f   : > { %v7597_v25 = vpop.eup %7596 }
 0x3a0   : > { %v879_v26 = vsel %vm389_vm2, %v7597_v25, 0.0 }
 0x3a1   : > { %880 = vadd.xlane.f32.xlu0 %v879_v26 }
 0x3a7   : > { %v7599_v30 = vpop.eup %7598 }
 0x3a8   : > { %v989_v31 = vsel %vm389_vm2, %v7599_v30, 0.0 }
 0x3aa   : > { %885 = vrot.lane.b32.xlu1 %v8030_v41, %s7871_s20 }
 0x3b7   : > { %775 = vrot.lane.b32.xlu0 %v8030_v41, %s7868_s17 }
 0x3ce   : > { %990 = vadd.xlane.f32.xlu1 %v989_v31 }
 0x3df   : > { %995 = vrot.lane.b32.xlu1 %v8030_v41, %s7873_s22 }
 0x41e   : > { %v661_v32 = vpop.xlane.xlu0 %660 }
 0x41f   : > { %7600 = vrcp.f32 %v661_v32 }
 0x422   : > { %v770_v33 = vpop.xlane.xlu1 %769 }
 0x423   : > { %7602 = vrcp.f32 %v770_v33 }
 0x426   : > { %v886_v43 = vpop.permute.xlu1 %885 }
 0x427   : > { %v891_v46 = vsel %vm393_vm1, %v886_v43, 0  ;;  %v7415_v43 = vld [vmem:[#allocation2 + $0x84] ss:$8 sps:$4 sm:$0xff]  }
 0x42a   : > { %v881_v35 = vpop.xlane.xlu0 %880 }
 0x42b   : > { %7604 = vrcp.f32 %v881_v35 }
 0x42c   : > { %v7601_v36 = vpop.eup %7600 }
 0x42d   : > { %v663_v37 = vmul.f32 %v7601_v36, %v7593_v18 }
 0x42e   : > { %v776_v38 = vpop.permute.xlu0 %775 }
 0x42f   : > { %v781_v39 = vsel %vm393_vm1, %v776_v38, 0  ;;  %v664_v40 = vpack.c.bf16 %v663_v37, %v663_v37  ;;  %v7406_v38 = vld [vmem:[#allocation2 + $0xb4] ss:$8 sps:$4 sm:$0xff]  }
 0x430   : > { %v7603_v42 = vpop.eup %7602 }
 0x431   : > { %6869 = vmatmul.mubr.msk.bf16.vlgmr.msra.gmra.mxu0 %vm389_vm2, %v664_v40  ;;  %v772_v41 = vmul.f32 %v7603_v42, %v7595_v20  ;;  %v7409_v40 = vld [vmem:[#allocation2 + $0xa4] ss:$8 sps:$4 sm:$0xff]   ;;  %v7407_v42 = vld [vmem:[#allocation2 + $0xa0] ss:$8 sps:$4 sm:$0xff]  }
 0x432   : > { %6879 = vmatpush3.bf16.msra.mxu0 %v781_v39  ;;  %6880 = vmatprep.mubr.msk.bf16.mxu0 %vm7865_vm0, %v7864_v0  ;;  %v7404_v39 = vld [vmem:[#allocation2 + $0xb0] ss:$8 sps:$4 sm:$0xff]  }
 0x433   : > { %6890 = vmatprep.subr.bf16.mxu0 %v7864_v0  ;;  %v773_v44 = vpack.c.bf16 %v772_v41, %v772_v41  ;;  %v7410_v41 = vld [vmem:[#allocation2 + $0x90] ss:$8 sps:$4 sm:$0xff]  }
 0x438   : > { %v7605_v45 = vpop.eup %7604 }
 0x439   : > { %6881 = vmatmul.mubr.msk.bf16.vlgmr.msra.gmra.mxu0 %vm389_vm2, %v773_v44  ;;  %v883_v47 = vmul.f32 %v7605_v45, %v7597_v25  ;;  %v7413_v44 = vld [vmem:[#allocation2 + $0x80] ss:$8 sps:$4 sm:$0xff]   ;;  %v7416_v45 = vld [vmem:[#allocation2 + $0x1b0] ss:$8 sps:$4 sm:$0xff]  }
 0x43a   : > { %6891 = vmatpush3.bf16.msra.mxu0 %v891_v46  ;;  %6892 = vmatprep.mubr.msk.bf16.mxu0 %vm7865_vm0, %v7864_v0  ;;  %v7417_v46 = vld [vmem:[#allocation2 + $0x130] ss:$8 sps:$4 sm:$0xff]  }
 0x43b   : > { %6902 = vmatprep.subr.bf16.mxu0 %v7864_v0  ;;  %v884_v48 = vpack.c.bf16 %v883_v47, %v883_v47  ;;  %v7418_v47 = vld [vmem:[#allocation2 + $0x1a0] ss:$8 sps:$4 sm:$0xff]   ;;  %6634 = vmatprep.subr.bf16.mxu1 %v7416_v45  ;;  %v7438_v45 = vld [vmem:[#allocation2 + $0x1d0] ss:$8 sps:$4 sm:$0xff]  }
 0x441   : > { %6893 = vmatmul.mubr.msk.bf16.vlgmr.msra.gmra.mxu0 %vm389_vm2, %v884_v48  ;;  %v7419_v48 = vld [vmem:[#allocation2 + $0x120] ss:$8 sps:$4 sm:$0xff]  }
 0x442   : > { %6904 = vmatprep.mubr.msk.bf16.mxu0 %vm7865_vm0, %v7864_v0 }
 0x457   : > { %v991_v49 = vpop.xlane.xlu1 %990 }
 0x458   : > { %7606 = vrcp.f32 %v991_v49  ;;  %v7420_v49 = vld [vmem:[#allocation2 + $0x190] ss:$8 sps:$4 sm:$0xff]  }
 0x45b   : > { %v996_v50 = vpop.permute.xlu1 %995 }
 0x45c   : > { %v1001_v51 = vsel %vm393_vm1, %v996_v50, 0  ;;  %v7421_v50 = vld [vmem:[#allocation2 + $0x110] ss:$8 sps:$4 sm:$0xff]  }
 0x45d   : > { %6903 = vmatpush3.bf16.msra.mxu0 %v1001_v51  ;;  %v7422_v51 = vld [vmem:[#allocation2 + $0x180] ss:$8 sps:$4 sm:$0xff]  }
 0x45e   : > { %1208 = vmatprep.subr.bf16.mxu0 %v7406_v38 }
 0x465   : > { %v7607_v52 = vpop.eup %7606 }
 0x466   : > { %v993_v53 = vmul.f32 %v7607_v52, %v7599_v30  ;;  %v7423_v52 = vld [vmem:[#allocation2 + $0x100] ss:$8 sps:$4 sm:$0xff]  }
 0x468   : > { %v994_v54 = vpack.c.bf16 %v993_v53, %v993_v53  ;;  %v7424_v53 = vld [vmem:[#allocation2 + $0x170] ss:$8 sps:$4 sm:$0xff]  }
 0x46a   : > { %6905 = vmatmul.mubr.msk.bf16.vlgmr.msra.gmra.mxu0 %vm389_vm2, %v994_v54  ;;  %v7425_v54 = vld [vmem:[#allocation2 + $0xf0] ss:$8 sps:$4 sm:$0xff]  }
 0x46b   : > { %1232 = vmatprep.mubr.bf16.mxu0 %v7866_v13  ;;  %1209 = vmatpush1.bf16.msra.mxu0 %v7404_v39 }
 0x46c   : > { %1210 = vmatprep.subr.bf16.mxu0 %v7409_v40 }
 0x46f   : > { %1211 = vmatpush1.bf16.msra.mxu0 %v7407_v42  ;;  %v7434_v42 = vld [vmem:[#allocation2 + $0x1f4] ss:$8 sps:$4 sm:$0xff]  }
 0x4f1   : > { %v705_v55 = vpop.f32.mrf.mxu0 }
 0x4f3   : > { %v6870_v56 = vpop.f32.mrf.mxu0 }
 0x4f4   : > { %v7427_v56 = vld [vmem:[#allocation2 + $0xe0] ss:$8 sps:$4 sm:$0xff]  }
 0x4f5   : > { %v708_v57 = vpop.f32.mrf.mxu0 }
 0x4f7   : > { %v6871_v59 = vpop.f32.mrf.mxu0 }
 0x4f9   : > { %v817_v61 = vpop.f32.mrf.mxu0 }
 0x4fa   : > { %1044 = vrot.lane.b32.xlu0 %v817_v61, %s7872_s21  ;;  %v495_v61 = vld [vmem:[%s8924_s6 + $0x2] ss:$0 sm:$0xff] }
 0x4fb   : > { %v6882_v62 = vpop.f32.mrf.mxu0 }
 0x4fd   : > { %v820_v1 = vpop.f32.mrf.mxu0 }
 0x4ff   : > { %v6883_v2 = vpop.f32.mrf.mxu0 }
 0x501   : > { %v927_v3 = vpop.f32.mrf.mxu0 }
 0x502   : > { %1048 = vrot.lane.b32.xlu1 %v927_v3, %s7870_s19 }
 0x503   : > { %v6894_v4 = vpop.f32.mrf.mxu0 }
 0x504   : > { %v7428_v4 = vld [vmem:[#allocation2 + $0x150] ss:$8 sps:$4 sm:$0xff]  }
 0x505   : > { %v930_v5 = vpop.f32.mrf.mxu0 }
 0x506   : > { %v7429_v5 = vld [vmem:[#allocation2 + $0xd0] ss:$8 sps:$4 sm:$0xff]  }
 0x507   : > { %v6895_v6 = vpop.f32.mrf.mxu0 }
 0x508   : > { %v7430_v6 = vld [vmem:[#allocation2 + $0x140] ss:$8 sps:$4 sm:$0xff]  }
 0x52a   : > { %v1037_v8 = vpop.f32.mrf.mxu0 }
 0x52b   : > { %1052 = vrot.lane.b32.xlu0 %v1037_v8, %s7869_s18  ;;  %v6342_v8 = vld [vmem:[%s8924_s6 + $0x4] ss:$8 sm:$0x3] }
 0x52c   : > { %v6906_v9 = vpop.f32.mrf.mxu0 }
 0x52d   : > { %v1150_v9 = vrot.slane %v6342_v8, %v8011_v23 }
 0x52e   : > { %v1040_v10 = vpop.f32.mrf.mxu0 }
 0x52f   : > { %v1154_v10 = vrot.slane %v6342_v8, %v8025_v34 }
 0x530   : > { %v6907_v11 = vpop.f32.mrf.mxu0 }
 0x56c   : > { %v1045_v12 = vpop.permute.xlu0 %1044 }
 0x56d   : > { %v1055_v15 = vsel %vm606_vm4, %v705_v55, %v1045_v12  ;;  %v7426_v55 = vld [vmem:[#allocation2 + $0x160] ss:$8 sps:$4 sm:$0xff]  }
 0x574   : > { %v1049_v14 = vpop.permute.xlu1 %1048 }
 0x575   : > { %v1057_v17 = vsel %vm1056_vm5, %v1055_v15, %v1049_v14 }
 0x59d   : > { %v1053_v18 = vpop.permute.xlu0 %1052 }
 0x59e   : > { %v1059_v19 = vsel %vm1058_vm6, %v1057_v17, %v1053_v18 }
 0x59f   : > { %v1060_v20 = vpack.c.bf16 %v1059_v19, %v1059_v19 }
 0x5a1   : > { %6917 = vmatmul.mubr.msk.bf16.vlgmr.msra.gmra.mxu1 %vm554_vm3, %v1060_v20 }
 0x5a2   : > { %6635 = vmatpush3.bf16.msra.mxu1 %v7417_v46  ;;  %v7443_v46 = vld [vmem:[#allocation2 + $0x1c4] ss:$8 sps:$4 sm:$0xff]  }
 0x5a3   : > { %6636 = vmatprep.subr.bf16.mxu1 %v7418_v47  ;;  %v7441_v47 = vld [vmem:[#allocation2 + $0x1c0] ss:$8 sps:$4 sm:$0xff]  }
 0x5a6   : > { %6637 = vmatpush3.bf16.msra.mxu1 %v7419_v48 }
 0x5a7   : > { %6638 = vmatprep.subr.bf16.mxu1 %v7420_v49 }
 0x5aa   : > { %6639 = vmatpush3.bf16.msra.mxu1 %v7421_v50 }
 0x5ab   : > { %6640 = vmatprep.subr.bf16.mxu1 %v7422_v51 }
 0x5ae   : > { %6641 = vmatpush3.bf16.msra.mxu1 %v7423_v52  ;;  %v500_v52 = vld [vmem:[%s8924_s6 + $0x6] ss:$0 sm:$0xff] }
 0x5af   : > { %6642 = vmatprep.subr.bf16.mxu1 %v7424_v53 }
 0x5b2   : > { %6643 = vmatpush3.bf16.msra.mxu1 %v7425_v54  ;;  %v501_v54 = vld [vmem:[%s8924_s6 + $0x7] ss:$0 sm:$0xff] }
 0x5b3   : > { %6644 = vmatprep.subr.bf16.mxu1 %v7426_v55 }
 0x5b6   : > { %6645 = vmatpush3.bf16.msra.mxu1 %v7427_v56 }
 0x5b7   : > { %6646 = vmatprep.subr.bf16.mxu1 %v7428_v4 }
 0x5ba   : > { %6647 = vmatpush3.bf16.msra.mxu1 %v7429_v5 }
 0x5bb   : > { %6648 = vmatprep.subr.bf16.mxu1 %v7430_v6 }
 0x5be   : > { %6649 = vmatpush3.bf16.msra.mxu1 %v7431_v7 }
 0x5bf   : > { %6932 = vmatprep.subr.bf16.mxu1 %v7864_v0 }
 0x661   : > { %v1122_v25 = vpop.f32.mrf.mxu1 }
 0x662   : > { %v1123_v26 = vadd.f32 %v1122_v25, %v494_v24 }
 0x663   : > { %v6918_v27 = vpop.f32.mrf.mxu1 }
 0x664   : > { %v1128_v28 = vadd.f32 %v1123_v26, %v8000_v16  ;;  %v7412_v16 = vld [vmem:[#allocation2 + $0x94] ss:$8 sps:$4 sm:$0xff]   ;;  %v499_v27 = vld [vmem:[%s8924_s6 + $0x5] ss:$0 sm:$0xff] }
 0x665   : > { %v1125_v29 = vpop.f32.mrf.mxu1  ;;  %1212 = vmatprep.subr.bf16.mxu0 %v7412_v16  ;;  %v7432_v16 = vld [vmem:[#allocation2 + $0x1f0] ss:$8 sps:$4 sm:$0xff]  }
 0x666   : > { %v1129_v30 = vsel %vm554_vm3, %v1128_v28, 0.0  ;;  %1213 = vmatpush1.bf16.msra.mxu0 %v7410_v41  ;;  %v7437_v41 = vld [vmem:[#allocation2 + $0x1e4] ss:$8 sps:$4 sm:$0xff]  }
 0x667   : > { %1130 = vadd.xlane.f32.xlu1 %v1129_v30  ;;  %v6919_v31 = vpop.f32.mrf.mxu1  ;;  %1214 = vmatprep.subr.bf16.mxu0 %v7415_v43  ;;  %v7435_v43 = vld [vmem:[#allocation2 + $0x1e0] ss:$8 sps:$4 sm:$0xff]  }
 0x66a   : > { %1215 = vmatpush1.bf16.msra.mxu0 %v7413_v44  ;;  %v7440_v44 = vld [vmem:[#allocation2 + $0x1d4] ss:$8 sps:$4 sm:$0xff]  }
 0x66b   : > { %1527 = vmatprep.subr.bf16.mxu0 %v7434_v42 }
 0x6f0   : > { %v1131_v32 = vpop.xlane.xlu1 %1130 }
 0x6f1   : > { %v1133_v33 = vmul.f32 0.015625, %v1131_v32 }
 0x6f3   : > { %v1134_v35 = vsub.f32 %v1128_v28, %v1133_v33 }
 0x6f5   : > { %v1135_v36 = vmul.f32 %v1134_v35, %v1134_v35 }
 0x6f7   : > { %v1136_v37 = vsel %vm554_vm3, %v1135_v36, 0.0 }
 0x6f8   : > { %1137 = vadd.xlane.f32.xlu0 %v1136_v37 }
 0x781   : > { %v1138_v57 = vpop.xlane.xlu0 %1137 }
 0x782   : > { %v1139_v58 = vmul.f32 0.015625, %v1138_v57 }
 0x784   : > { %v1140_v59 = vadd.f32 1e-05, %v1139_v58  ;;  %v6390_v58 = vld [vmem:[%s8924_s6 + $0x10] ss:$8 sm:$0x3] }
 0x785   : > { %v1473_v5 = vrot.slane %v6390_v58, %v8025_v34 }
 0x786   : > { %7608 = vrsqrt.f32 %v1140_v59  ;;  %v1469_v59 = vrot.slane %v6390_v58, %v8011_v23 }
 0x793   : > { %v7609_v60 = vpop.eup %7608 }
 0x794   : > { %v1142_v62 = vmul.f32 %v7609_v60, %v1134_v35 }
 0x796   : > { %v1143_v1 = vmul.f32 %v1142_v62, %v495_v61 }
 0x798   : > { %v1144_v2 = vadd.f32 %v1143_v1, %v496_v63 }
 0x79a   : > { %v1145_v3 = vpack.c.bf16 %v1144_v2, %v1144_v2 }
 0x79c   : > { %6373 = vmatmul.mubr.msk.bf16.vlgmr.msra.gmra.mxu0 %vm554_vm3, %v1145_v3 }
 0x79d   : > { %1551 = vmatprep.mubr.bf16.mxu0 %v7866_v13  ;;  %1528 = vmatpush1.bf16.msra.mxu0 %v7432_v16 }
 0x79e   : > { %1529 = vmatprep.subr.bf16.mxu0 %v7437_v41 }
 0x7a1   : > { %1530 = vmatpush1.bf16.msra.mxu0 %v7435_v43 }
 0x7a2   : > { %1531 = vmatprep.subr.bf16.mxu0 %v7440_v44 }
 0x7a5   : > { %1532 = vmatpush1.bf16.msra.mxu0 %v7438_v45 }
 0x7a6   : > { %1533 = vmatprep.subr.bf16.mxu0 %v7443_v46 }
 0x7a9   : > { %1534 = vmatpush1.bf16.msra.mxu0 %v7441_v47 }
 0x7aa   : > { %6920 = vmatprep.subr.bf16.mxu0 %v7864_v0 }
 0x85c   : > { %v1234_v11 = vpop.f32.mrf.mxu0 }
 0x85d   : > { %v1235_v12 = vadd.f32 %v1234_v11, %v1150_v9 }
 0x85e   : > { %v1236_v14 = vpop.f32.mrf.mxu0 }
 0x85f   : > { %v1237_v15 = vadd.f32 %v1236_v14, %v1154_v10  ;;  %v1241_v17 = vmax.f32 %v1235_v12, 0.0 }
 0x860   : > { %v1238_v18 = vpop.f32.mrf.mxu0 }
 0x861   : > { %v1242_v19 = vmax.f32 %v1237_v15, 0.0  ;;  %v1243_v25 = vpack.c.bf16 %v1241_v17, %v1241_v17 }
 0x862   : > { %v1239_v20 = vpop.f32.mrf.mxu0 }
 0x863   : > { %v1244_v24 = vpack.c.bf16 %v1242_v19, %v1242_v19 }
 0x865   : > { %1373 = vmatprep.mubr.bf16.mxu1 %v1244_v24 }
 0x866   : > { %1374 = vmatmul.mubr.bf16.vlgmr.msra.gmra.mxu1 %v1243_v25 }
 0x867   : > { %6934 = vmatprep.mubr.msk.bf16.mxu1 %vm7865_vm0, %v7864_v0 }
 0x926   : > { %v6650_v26 = vpop.f32.mrf.mxu1 }
 0x928   : > { %v6651_v28 = vpop.f32.mrf.mxu1 }
 0x929   : > { %v6652_v29 = vadd.f32 %v6651_v28, %v6650_v26 }
 0x92a   : > { %v6653_v30 = vpop.f32.mrf.mxu1 }
 0x92b   : > { %v1376_v31 = vadd.f32 %v6652_v29, %v499_v27 }
 0x92c   : > { %v6654_v32 = vpop.f32.mrf.mxu1 }
 0x92d   : > { %v1381_v33 = vadd.f32 %v1376_v31, %v1144_v2 }
 0x92f   : > { %v1382_v35 = vsel %vm554_vm3, %v1381_v33, 0.0 }
 0x930   : > { %1383 = vadd.xlane.f32.xlu0 %v1382_v35 }
 0x9b9   : > { %v1384_v36 = vpop.xlane.xlu0 %1383 }
 0x9ba   : > { %v1385_v37 = vmul.f32 0.015625, %v1384_v36 }
 0x9bc   : > { %v1386_v38 = vsub.f32 %v1381_v33, %v1385_v37 }
 0x9be   : > { %v1387_v39 = vmul.f32 %v1386_v38, %v1386_v38 }
 0x9c0   : > { %v1388_v40 = vsel %vm554_vm3, %v1387_v39, 0.0 }
 0x9c1   : > { %1389 = vadd.xlane.f32.xlu1 %v1388_v40 }
 0xa4a   : > { %v1390_v48 = vpop.xlane.xlu1 %1389 }
 0xa4b   : > { %v1391_v49 = vmul.f32 0.015625, %v1390_v48 }
 0xa4d   : > { %v1392_v50 = vadd.f32 1e-05, %v1391_v49 }
 0xa4f   : > { %7610 = vrsqrt.f32 %v1392_v50 }
 0xa5c   : > { %v7611_v51 = vpop.eup %7610 }
 0xa5d   : > { %v1394_v53 = vmul.f32 %v7611_v51, %v1386_v38 }
 0xa5f   : > { %v1395_v55 = vmul.f32 %v1394_v53, %v500_v52 }
 0xa61   : > { %v8127_v56 = vadd.f32 %v1395_v55, %v501_v54 }
 0xa63   : > { %v1464_v57 = vpack.c.bf16 %v8127_v56, %v8127_v56 }
 0xa65   : > { %6406 = vmatmul.mubr.msk.bf16.vlgmr.msra.gmra.mxu0 %vm554_vm3, %v1464_v57 }
 0xa66   : > { %6922 = vmatprep.mubr.msk.bf16.mxu0 %vm7865_vm0, %v7864_v0 }
 0xb25   : > { %v1553_v60 = vpop.f32.mrf.mxu0 }
 0xb26   : > { %v1554_v61 = vadd.f32 %v1553_v60, %v1469_v59 }
 0xb27   : > { %v1555_v62 = vpop.f32.mrf.mxu0 }
 0xb28   : > { %v1560_v63 = vmul.f32 0.25, %v1554_v61  ;;  %v1562_v1 = vpack.c.bf16 %v1554_v61, %v1554_v61  ;;  %v1556_v8 = vadd.f32 %v1555_v62, %v1473_v5 }
 0xb29   : > { %v1557_v2 = vpop.f32.mrf.mxu0 }
 0xb2a   : > { %1674 = vrot.lane.b32.xlu1 %v1562_v1, %s7869_s18  ;;  %1565 = vrot.lane.b32.xlu0 %v1562_v1, %s7867_s16  ;;  %v1561_v4 = vpack.c.bf16 %v1560_v63, %v1560_v63  ;;  %v8150_v11 = vpack.c.bf16 %v1556_v8, %v1556_v8 }
 0xb2b   : > { %v1558_v3 = vpop.f32.mrf.mxu0 }
 0xb2c   : > { %v1629_v17 = vsel %vm393_vm1, %v8150_v11, 0 }
 0xb2e   : > { %1785 = vrot.lane.b32.xlu0 %v1562_v1, %s7870_s19  ;;  %1672 = vrot.lane.b32.xlu1 %v1561_v4, %s7868_s17 }
 0xb32   : > { %1895 = vrot.lane.b32.xlu0 %v1562_v1, %s7872_s21  ;;  %1783 = vrot.lane.b32.xlu1 %v1561_v4, %s7871_s20 }
 0xb36   : > { %1893 = vrot.lane.b32.xlu1 %v1561_v4, %s7873_s22 }
 0xb9c   : > { %v1675_v6 = vpop.permute.xlu1 %1674  ;;  %v1566_v7 = vpop.permute.xlu0 %1565 }
 0xb9d   : > { %v1680_v9 = vsel %vm606_vm4, %v1675_v6, 0  ;;  %v1571_v10 = vsel %vm606_vm4, %v1566_v7, 0 }
 0xb9e   : > { %6921 = vmatpush3.bf16.xpose.msra.mxu0 %v1571_v10  ;;  %6933 = vmatpush3.bf16.xpose.msra.mxu1 %v1680_v9 }
 0xb9f   : > { %6926 = vmatprep.subr.bf16.mxu0 %v7864_v0  ;;  %6944 = vmatprep.subr.bf16.mxu1 %v7864_v0 }
 0xba0   : > { %v1786_v12 = vpop.permute.xlu0 %1785  ;;  %v1673_v14 = vpop.permute.xlu1 %1672 }
 0xba1   : > { %v1791_v15 = vsel %vm606_vm4, %v1786_v12, 0 }
 0xba4   : > { %v1896_v18 = vpop.permute.xlu0 %1895  ;;  %v1784_v19 = vpop.permute.xlu1 %1783 }
 0xba5   : > { %6923 = vmatmul.mubr.msk.bf16.vlgmr.msra.gmra.mxu0 %vm606_vm4, %v1561_v4  ;;  %6935 = vmatmul.mubr.msk.bf16.vlgmr.msra.gmra.mxu1 %vm606_vm4, %v1673_v14  ;;  %v1901_v20 = vsel %vm606_vm4, %v1896_v18, 0 }
 0xba6   : > { %6927 = vmatpush3.bf16.msra.mxu0 %v1629_v17  ;;  %6945 = vmatpush3.bf16.xpose.msra.mxu1 %v1791_v15 }
 0xba7   : > { %6946 = vmatprep.mubr.msk.bf16.mxu1 %vm7865_vm0, %v7864_v0  ;;  %6956 = vmatprep.subr.bf16.mxu1 %v7864_v0 }
 0xba8   : > { %6928 = vmatprep.mubr.msk.bf16.mxu0 %vm7865_vm0, %v7864_v0  ;;  %6938 = vmatprep.subr.bf16.mxu0 %v7864_v0  ;;  %v1894_v24 = vpop.permute.xlu1 %1893 }
 0xbad   : > { %6947 = vmatmul.mubr.msk.bf16.vlgmr.msra.gmra.mxu1 %vm606_vm4, %v1784_v19 }
 0xbae   : > { %6957 = vmatpush3.bf16.xpose.msra.mxu1 %v1901_v20  ;;  %6958 = vmatprep.mubr.msk.bf16.mxu1 %vm7865_vm0, %v7864_v0 }
 0xbaf   : > { %6968 = vmatprep.subr.bf16.mxu1 %v7864_v0 }
 0xbb5   : > { %6959 = vmatmul.mubr.msk.bf16.vlgmr.msra.gmra.mxu1 %vm606_vm4, %v1894_v24 }
 0xbb6   : > { %6976 = vmatprep.mubr.msk.bf16.mxu1 %vm7865_vm0, %v7864_v0 }
 0xc65   : > { %v1607_v25 = vpop.f32.mrf.mxu0  ;;  %v1716_v26 = vpop.f32.mrf.mxu1 }
 0xc66   : > { %v1722_v27 = vsel %vm389_vm2, %v1716_v26, -inf  ;;  %v1613_v28 = vsel %vm389_vm2, %v1607_v25, -inf }
 0xc67   : > { %1723 = vmax.xlane.f32.xlu1 %v1722_v27  ;;  %v6936_v29 = vpop.f32.mrf.mxu1  ;;  %1614 = vmax.xlane.f32.xlu0 %v1613_v28  ;;  %v6924_v30 = vpop.f32.mrf.mxu0 }
 0xc68   : > { %v7444_v30 = vld [vmem:[#allocation2 + $0x230] ss:$8 sps:$4 sm:$0xff]  }
 0xc69   : > { %v1610_v31 = vpop.f32.mrf.mxu0  ;;  %v1719_v32 = vpop.f32.mrf.mxu1  ;;  %6969 = vmatpush3.bf16.msra.mxu1 %v7444_v30  ;;  %v7470_v30 = vld [vmem:[#allocation2 + $0x320] ss:$8 sps:$4 sm:$0xff]  }
 0xc6a   : > { %6970 = vmatprep.subr.bf16.mxu1 %v7864_v0 }
 0xc6b   : > { %v6925_v33 = vpop.f32.mrf.mxu0  ;;  %v6937_v35 = vpop.f32.mrf.mxu1 }
 0xc6d   : > { %v1827_v36 = vpop.f32.mrf.mxu1 }
 0xc6e   : > { %v1833_v37 = vsel %vm389_vm2, %v1827_v36, -inf }
 0xc6f   : > { %v6948_v38 = vpop.f32.mrf.mxu1  ;;  %1834 = vmax.xlane.f32.xlu0 %v1833_v37 }
 0xc71   : > { %v1830_v39 = vpop.f32.mrf.mxu1 }
 0xc73   : > { %v6949_v40 = vpop.f32.mrf.mxu1 }
 0xc74   : > { %v7445_v40 = vld [vmem:[#allocation2 + $0x220] ss:$8 sps:$4 sm:$0xff]  }
 0xc75   : > { %v1937_v42 = vpop.f32.mrf.mxu1  ;;  %6971 = vmatpush3.bf16.msra.mxu1 %v7445_v40 }
 0xc76   : > { %v1943_v16 = vsel %vm389_vm2, %v1937_v42, -inf  ;;  %6972 = vmatprep.subr.bf16.mxu1 %v7864_v0 }
 0xc77   : > { %v6960_v41 = vpop.f32.mrf.mxu1  ;;  %1944 = vmax.xlane.f32.xlu0 %v1943_v16  ;;  %v7447_v16 = vld [vmem:[#allocation2 + $0x200] ss:$8 sps:$4 sm:$0xff]  }
 0xc79   : > { %v1940_v43 = vpop.f32.mrf.mxu1 }
 0xc7b   : > { %v6961_v44 = vpop.f32.mrf.mxu1 }
 0xcf0   : > { %v1724_v45 = vpop.xlane.xlu1 %1723  ;;  %v1615_v46 = vpop.xlane.xlu0 %1614 }
 0xcf1   : > { %v1725_v47 = vsub.f32 %v1716_v26, %v1724_v45  ;;  %v1616_v48 = vsub.f32 %v1607_v25, %v1615_v46 }
 0xcf3   : > { %v1726_v49 = vmul.f32 1.442695, %v1725_v47  ;;  %v1617_v50 = vmul.f32 1.442695, %v1616_v48 }
 0xcf5   : > { %7612 = vpow2.f32 %v1726_v49 }
 0xcf6   : > { %7614 = vpow2.f32 %v1617_v50 }
 0xcf8   : > { %v1835_v51 = vpop.xlane.xlu0 %1834 }
 0xcf9   : > { %v1836_v62 = vsub.f32 %v1827_v36, %v1835_v51 }
 0xcfb   : > { %v1837_v63 = vmul.f32 1.442695, %v1836_v62 }
 0xd00   : > { %v1945_v52 = vpop.xlane.xlu0 %1944 }
 0xd01   : > { %v1946_v53 = vsub.f32 %v1937_v42, %v1945_v52  ;;  %v7446_v42 = vld [vmem:[#allocation2 + $0x210] ss:$8 sps:$4 sm:$0xff]  }
 0xd02   : > { %v7613_v54 = vpop.eup %7612  ;;  %6973 = vmatpush3.bf16.msra.mxu1 %v7446_v42  ;;  %v2357_v42 = vld [vmem:[%s8921_s3 + $0x8] sm:$0xf] }
 0xd03   : > { %v7615_v55 = vpop.eup %7614  ;;  %v1947_v57 = vmul.f32 1.442695, %v1946_v53  ;;  %v1728_v58 = vsel %vm389_vm2, %v7613_v54, 0.0  ;;  %6974 = vmatprep.subr.bf16.mxu1 %v7864_v0 }
 0xd04   : > { %1729 = vadd.xlane.f32.xlu0 %v1728_v58  ;;  %v1619_v59 = vsel %vm389_vm2, %v7615_v55, 0.0  ;;  %v6391_v58 = vld [vmem:[%s8924_s6 + $0x11] ss:$0 sm:$0xff] }
 0xd05   : > { %7616 = vpow2.f32 %v1947_v57  ;;  %1620 = vadd.xlane.f32.xlu1 %v1619_v59 }
 0xd06   : > { %7618 = vpow2.f32 %v1837_v63  ;;  %6975 = vmatpush3.bf16.msra.mxu1 %v7447_v16 }
 0xd12   : > { %v7617_v60 = vpop.eup %7616 }
 0xd13   : > { %v1949_v61 = vsel %vm389_vm2, %v7617_v60, 0.0  ;;  %v7619_v1 = vpop.eup %7618 }
 0xd14   : > { %1950 = vadd.xlane.f32.xlu0 %v1949_v61  ;;  %v1839_v2 = vsel %vm389_vm2, %v7619_v1, 0.0 }
 0xd16   : > { %1735 = vrot.lane.b32.xlu1 %v8150_v11, %s7868_s17 }
 0xd2a   : > { %1845 = vrot.lane.b32.xlu0 %v8150_v11, %s7871_s20 }
 0xd3a   : > { %1840 = vadd.xlane.f32.xlu1 %v1839_v2 }
 0xd4b   : > { %1955 = vrot.lane.b32.xlu1 %v8150_v11, %s7873_s22 }
 0xd8d   : > { %v1730_v4 = vpop.xlane.xlu0 %1729 }
 0xd8e   : > { %v1621_v3 = vpop.xlane.xlu1 %1620 }
 0xd8f   : > { %7620 = vrcp.f32 %v1621_v3 }
 0xd90   : > { %7622 = vrcp.f32 %v1730_v4 }
 0xd92   : > { %v1736_v7 = vpop.permute.xlu1 %1735 }
 0xd93   : > { %v1741_v12 = vsel %vm393_vm1, %v1736_v7, 0 }
 0xd9c   : > { %v7621_v5 = vpop.eup %7620 }
 0xd9d   : > { %v1623_v6 = vmul.f32 %v7621_v5, %v7615_v55  ;;  %v7623_v9 = vpop.eup %7622  ;;  %v1951_v10 = vpop.xlane.xlu0 %1950 }
 0xd9e   : > { %v1732_v11 = vmul.f32 %v7623_v9, %v7613_v54  ;;  %v7448_v9 = vld [vmem:[#allocation2 + $0x270] ss:$8 sps:$4 sm:$0xff]  }
 0xd9f   : > { %v1624_v8 = vpack.c.bf16 %v1623_v6, %v1623_v6 }
 0xda0   : > { %v1733_v15 = vpack.c.bf16 %v1732_v11, %v1732_v11  ;;  %v7454_v11 = vld [vmem:[#allocation2 + $0x250] ss:$8 sps:$4 sm:$0xff]  }
 0xda1   : > { %6929 = vmatmul.mubr.msk.bf16.vlgmr.msra.gmra.mxu0 %vm389_vm2, %v1624_v8  ;;  %v1846_v14 = vpop.permute.xlu0 %1845  ;;  %v7450_v8 = vld [vmem:[#allocation2 + $0x274] ss:$8 sps:$4 sm:$0xff]  }
 0xda2   : > { %6939 = vmatpush3.bf16.msra.mxu0 %v1741_v12  ;;  %6940 = vmatprep.mubr.msk.bf16.mxu0 %vm7865_vm0, %v7864_v0  ;;  %v1851_v17 = vsel %vm393_vm1, %v1846_v14, 0  ;;  %v7451_v12 = vld [vmem:[#allocation2 + $0x260] ss:$8 sps:$4 sm:$0xff]   ;;  %v7459_v14 = vld [vmem:[#allocation2 + $0x244] ss:$8 sps:$4 sm:$0xff]  }
 0xda3   : > { %6950 = vmatprep.subr.bf16.mxu0 %v7864_v0 }
 0xda9   : > { %6941 = vmatmul.mubr.msk.bf16.vlgmr.msra.gmra.mxu0 %vm389_vm2, %v1733_v15  ;;  %v7457_v15 = vld [vmem:[#allocation2 + $0x240] ss:$8 sps:$4 sm:$0xff]  }
 0xdaa   : > { %6951 = vmatpush3.bf16.msra.mxu0 %v1851_v17  ;;  %6952 = vmatprep.mubr.msk.bf16.mxu0 %vm7865_vm0, %v7864_v0  ;;  %v7460_v17 = vld [vmem:[#allocation2 + $0x370] ss:$8 sps:$4 sm:$0xff]  }
 0xdab   : > { %6962 = vmatprep.subr.bf16.mxu0 %v7864_v0  ;;  %6677 = vmatprep.subr.bf16.mxu1 %v7460_v17  ;;  %v2411_v17 = vld [vmem:[%s8920_s2 + $0x8] sm:$0x1] }
 0xdc3   : > { %v1841_v18 = vpop.xlane.xlu1 %1840 }
 0xdc4   : > { %7624 = vrcp.f32 %v1841_v18  ;;  %v7461_v18 = vld [vmem:[#allocation2 + $0x2f0] ss:$8 sps:$4 sm:$0xff]  }
 0xdc5   : > { %7626 = vrcp.f32 %v1951_v10  ;;  %v7453_v10 = vld [vmem:[#allocation2 + $0x264] ss:$8 sps:$4 sm:$0xff]  }
 0xdc7   : > { %v1956_v24 = vpop.permute.xlu1 %1955 }
 0xdc8   : > { %v1961_v27 = vsel %vm393_vm1, %v1956_v24, 0  ;;  %v7464_v24 = vld [vmem:[#allocation2 + $0x350] ss:$8 sps:$4 sm:$0xff]  }
 0xdd1   : > { %v7625_v19 = vpop.eup %7624 }
 0xdd2   : > { %v1843_v20 = vmul.f32 %v7625_v19, %v7619_v1  ;;  %v7627_v26 = vpop.eup %7626  ;;  %v7462_v19 = vld [vmem:[#allocation2 + $0x360] ss:$8 sps:$4 sm:$0xff]  }
 0xdd3   : > { %v1953_v28 = vmul.f32 %v7627_v26, %v7617_v60  ;;  %v7466_v26 = vld [vmem:[#allocation2 + $0x340] ss:$8 sps:$4 sm:$0xff]  }
 0xdd4   : > { %v1844_v25 = vpack.c.bf16 %v1843_v20, %v1843_v20  ;;  %v7463_v20 = vld [vmem:[#allocation2 + $0x2e0] ss:$8 sps:$4 sm:$0xff]  }
 0xdd5   : > { %v1954_v29 = vpack.c.bf16 %v1953_v28, %v1953_v28  ;;  %v7468_v28 = vld [vmem:[#allocation2 + $0x330] ss:$8 sps:$4 sm:$0xff]  }
 0xdd6   : > { %6953 = vmatmul.mubr.msk.bf16.vlgmr.msra.gmra.mxu0 %vm389_vm2, %v1844_v25  ;;  %v7465_v25 = vld [vmem:[#allocation2 + $0x2d0] ss:$8 sps:$4 sm:$0xff]  }
 0xdd7   : > { %6963 = vmatpush3.bf16.msra.mxu0 %v1961_v27  ;;  %6964 = vmatprep.mubr.msk.bf16.mxu0 %vm7865_vm0, %v7864_v0  ;;  %v7467_v27 = vld [vmem:[#allocation2 + $0x2c0] ss:$8 sps:$4 sm:$0xff]  }
 0xdd8   : > { %2165 = vmatprep.subr.bf16.mxu0 %v7450_v8 }
 0xdde   : > { %6965 = vmatmul.mubr.msk.bf16.vlgmr.msra.gmra.mxu0 %vm389_vm2, %v1954_v29  ;;  %v7469_v29 = vld [vmem:[#allocation2 + $0x2b0] ss:$8 sps:$4 sm:$0xff]  }
 0xddf   : > { %2189 = vmatprep.mubr.bf16.mxu0 %v7866_v13  ;;  %2166 = vmatpush1.bf16.msra.mxu0 %v7448_v9 }
 0xde0   : > { %2167 = vmatprep.subr.bf16.mxu0 %v7453_v10  ;;  %v6445_v10 = vld [vmem:[%s8922_s4 + $0x1] ss:$0 sm:$0xff] }
 0xde3   : > { %2168 = vmatpush1.bf16.msra.mxu0 %v7451_v12 }
 0xe61   : > { %v1665_v31 = vpop.f32.mrf.mxu0 }
 0xe63   : > { %v6930_v32 = vpop.f32.mrf.mxu0 }
 0xe65   : > { %v1668_v33 = vpop.f32.mrf.mxu0 }
 0xe67   : > { %v6931_v35 = vpop.f32.mrf.mxu0 }
 0xe69   : > { %v1777_v36 = vpop.f32.mrf.mxu0 }
 0xe6a   : > { %2004 = vrot.lane.b32.xlu1 %v1777_v36, %s7872_s21 }
 0xe6b   : > { %v6942_v37 = vpop.f32.mrf.mxu0 }
 0xe6c   : > { %v6392_v37 = vld [vmem:[%s8924_s6 + $0x12] ss:$0 sm:$0xff] }
 0xe6d   : > { %v1780_v38 = vpop.f32.mrf.mxu0 }
 0xe6f   : > { %v6943_v39 = vpop.f32.mrf.mxu0 }
 0xe70   : > { %v6393_v39 = vld [vmem:[%s8924_s6 + $0x13] ss:$0 sm:$0xff] }
 0xe96   : > { %v1887_v41 = vpop.f32.mrf.mxu0 }
 0xe97   : > { %2008 = vrot.lane.b32.xlu0 %v1887_v41, %s7870_s19 }
 0xe98   : > { %v6954_v43 = vpop.f32.mrf.mxu0 }
 0xe99   : > { %v2367_v43 = vsel %vm393_vm1, %v2357_v42, 0 }
 0xe9a   : > { %v1890_v44 = vpop.f32.mrf.mxu0 }
 0xe9b   : > { %v2354_v44 = vld [vmem:[%s374_s26] sm:$0xff] }
 0xe9c   : > { %v6955_v45 = vpop.f32.mrf.mxu0 }
 0xe9d   : > { %v2355_v45 = vld [vmem:[%s374_s26 + $0x8] sm:$0x1] }
 0xe9e   : > { %v1997_v46 = vpop.f32.mrf.mxu0 }
 0xe9f   : > { %2012 = vrot.lane.b32.xlu1 %v1997_v46, %s7869_s18  ;;  %v2356_v46 = vpack.c.bf16 %v2355_v45, %v2354_v44 }
 0xea0   : > { %v6966_v47 = vpop.f32.mrf.mxu0 }
 0xea1   : > { %v7472_v47 = vld [vmem:[#allocation2 + $0x310] ss:$8 sps:$4 sm:$0xff]  }
 0xea2   : > { %v2000_v48 = vpop.f32.mrf.mxu0 }
 0xea3   : > { %v7473_v48 = vld [vmem:[#allocation2 + $0x290] ss:$8 sps:$4 sm:$0xff]  }
 0xea4   : > { %v6967_v49 = vpop.f32.mrf.mxu0 }
 0xea5   : > { %v7476_v49 = vld [vmem:[#allocation4 + $0x34] ss:$8 sps:$4 sm:$0xff]  }
 0xedc   : > { %v2005_v50 = vpop.permute.xlu1 %2004 }
 0xedd   : > { %v2015_v52 = vsel %vm606_vm4, %v1665_v31, %v2005_v50  ;;  %v7471_v31 = vld [vmem:[#allocation2 + $0x2a0] ss:$8 sps:$4 sm:$0xff]   ;;  %v7474_v50 = vld [vmem:[#allocation4 + $0x30] ss:$8 sps:$4 sm:$0xff]  }
 0xf09   : > { %v2009_v51 = vpop.permute.xlu0 %2008 }
 0xf0a   : > { %v2016_v53 = vsel %vm1056_vm5, %v2015_v52, %v2009_v51  ;;  %v7477_v51 = vld [vmem:[#allocation2 + $0x300] ss:$8 sps:$4 sm:$0xff]  }
 0xf0b   : > { %v7478_v52 = vld [vmem:[#allocation2 + $0x280] ss:$8 sps:$4 sm:$0xff]  }
 0xf11   : > { %v2013_v54 = vpop.permute.xlu1 %2012 }
 0xf12   : > { %v2017_v55 = vsel %vm1058_vm6, %v2016_v53, %v2013_v54  ;;  %v7481_v53 = vld [vmem:[#allocation4 + $0x24] ss:$8 sps:$4 sm:$0xff]   ;;  %v7479_v54 = vld [vmem:[#allocation4 + $0x20] ss:$8 sps:$4 sm:$0xff]  }
 0xf13   : > { %v2018_v57 = vpack.c.bf16 %v2017_v55, %v2017_v55  ;;  %v7484_v55 = vld [vmem:[#allocation4 + $0x14] ss:$8 sps:$4 sm:$0xff]  }
 0xf15   : > { %6977 = vmatmul.mubr.msk.bf16.vlgmr.msra.gmra.mxu1 %vm554_vm3, %v2018_v57  ;;  %v7482_v57 = vld [vmem:[#allocation4 + $0x10] ss:$8 sps:$4 sm:$0xff]  }
 0xf16   : > { %6678 = vmatpush3.bf16.msra.mxu1 %v7461_v18 }
 0xf17   : > { %6679 = vmatprep.subr.bf16.mxu1 %v7462_v19 }
 0xf1a   : > { %6680 = vmatpush3.bf16.msra.mxu1 %v7463_v20 }
 0xf1b   : > { %6681 = vmatprep.subr.bf16.mxu1 %v7464_v24 }
 0xf1e   : > { %6682 = vmatpush3.bf16.msra.mxu1 %v7465_v25 }
 0xf1f   : > { %6683 = vmatprep.subr.bf16.mxu1 %v7466_v26 }
 0xf22   : > { %6684 = vmatpush3.bf16.msra.mxu1 %v7467_v27 }
 0xf23   : > { %6685 = vmatprep.subr.bf16.mxu1 %v7468_v28 }
 0xf26   : > { %6686 = vmatpush3.bf16.msra.mxu1 %v7469_v29 }
 0xf27   : > { %6687 = vmatprep.subr.bf16.mxu1 %v7470_v30 }
 0xf2a   : > { %6688 = vmatpush3.bf16.msra.mxu1 %v7471_v31  ;;  %v2503_v31 = vld [vmem:[%s8926_s8] ss:$8 sm:$0x3] }
 0xf2b   : > { %6689 = vmatprep.subr.bf16.mxu1 %v7472_v47 }
 0xf2e   : > { %6690 = vmatpush3.bf16.msra.mxu1 %v7473_v48 }
 0xf2f   : > { %6691 = vmatprep.subr.bf16.mxu1 %v7477_v51 }
 0xf32   : > { %6692 = vmatpush3.bf16.msra.mxu1 %v7478_v52 }
 0xf33   : > { %6992 = vmatprep.subr.bf16.mxu1 %v7864_v0 }
 0xfd5   : > { %v2080_v59 = vpop.f32.mrf.mxu1 }
 0xfd6   : > { %v2081_v60 = vadd.f32 %v6391_v58, %v2080_v59  ;;  %v7487_v58 = vld [vmem:[#allocation4 + $0x4] ss:$8 sps:$4 sm:$0xff]   ;;  %v7485_v59 = vld [vmem:[#allocation4] ss:$8 sps:$4 sm:$0xff]  }
 0xfd7   : > { %v6978_v61 = vpop.f32.mrf.mxu1 }
 0xfd8   : > { %v2086_v62 = vadd.f32 %v2081_v60, %v8127_v56  ;;  %v7456_v56 = vld [vmem:[#allocation2 + $0x254] ss:$8 sps:$4 sm:$0xff]  }
 0xfd9   : > { %v2083_v63 = vpop.f32.mrf.mxu1  ;;  %2169 = vmatprep.subr.bf16.mxu0 %v7456_v56  ;;  %v6394_v60 = vld [vmem:[%s8924_s6 + $0x14] ss:$8 sm:$0x3] }
 0xfda   : > { %v2087_v1 = vsel %vm554_vm3, %v2086_v62, 0.0  ;;  %2170 = vmatpush1.bf16.msra.mxu0 %v7454_v11  ;;  %v2107_v61 = vrot.slane %v6394_v60, %v8011_v23 }
 0xfdb   : > { %2088 = vadd.xlane.f32.xlu0 %v2087_v1  ;;  %v6979_v2 = vpop.f32.mrf.mxu1  ;;  %2171 = vmatprep.subr.bf16.mxu0 %v7459_v14  ;;  %v2410_v14 = vld [vmem:[%s8920_s2] sm:$0xff] }
 0xfde   : > { %2172 = vmatpush1.bf16.msra.mxu0 %v7457_v15 }
 0xfdf   : > { %6980 = vmatprep.subr.bf16.mxu0 %v7864_v0 }
0x1064   : > { %v2089_v3 = vpop.xlane.xlu0 %2088 }
0x1065   : > { %v2090_v4 = vmul.f32 0.015625, %v2089_v3 }
0x1067   : > { %v2091_v5 = vsub.f32 %v2086_v62, %v2090_v4  ;;  %v2111_v62 = vrot.slane %v6394_v60, %v8025_v34 }
0x1069   : > { %v2092_v6 = vmul.f32 %v2091_v5, %v2091_v5 }
0x106b   : > { %v2093_v7 = vsel %vm554_vm3, %v2092_v6, 0.0 }
0x106c   : > { %2094 = vadd.xlane.f32.xlu1 %v2093_v7 }
0x10f5   : > { %v2095_v32 = vpop.xlane.xlu1 %2094 }
0x10f6   : > { %v2096_v33 = vmul.f32 0.015625, %v2095_v32 }
0x10f8   : > { %v2097_v35 = vadd.f32 1e-05, %v2096_v33  ;;  %v2522_v33 = vrot.slane %v2503_v31, %v8011_v23 }
0x10fa   : > { %7628 = vrsqrt.f32 %v2097_v35 }
0x1107   : > { %v7629_v36 = vpop.eup %7628 }
0x1108   : > { %v2099_v38 = vmul.f32 %v7629_v36, %v2091_v5  ;;  %v2526_v36 = vrot.slane %v2503_v31, %v8025_v34 }
0x110a   : > { %v2100_v40 = vmul.f32 %v6392_v37, %v2099_v38 }
0x110c   : > { %v8228_v16 = vadd.f32 %v6393_v39, %v2100_v40  ;;  %v7874_v40 = vmov 65535  }
0x110d   : > { %v2699_v42 = vsel %vm393_vm1, 4294967295, %v7874_v40 }
0x110e   : > { %v2102_v41 = vpack.c.bf16 %v8228_v16, %v8228_v16  ;;  %v8278_v47 = vsel %vm2698_vm7, %v2699_v42, 0 }
0x1110   : > { %6428 = vmatmul.mubr.msk.bf16.vlgmr.msra.gmra.mxu0 %vm554_vm3, %v2102_v41 }
0x1111   : > { %6981 = vmatpush3.bf16.msra.mxu0 %v2367_v43  ;;  %6982 = vmatprep.mubr.msk.bf16.mxu0 %vm7865_vm0, %v7864_v0 }
0x1112   : > { %2580 = vmatprep.subr.bf16.mxu0 %v7476_v49 }
0x1118   : > { %6983 = vmatmul.mubr.msk.bf16.vlgmr.msra.gmra.mxu0 %vm389_vm2, %v2356_v46 }
0x1119   : > { %2604 = vmatprep.mubr.bf16.mxu0 %v7866_v13  ;;  %2581 = vmatpush1.bf16.msra.mxu0 %v7474_v50 }
0x111a   : > { %2582 = vmatprep.subr.bf16.mxu0 %v7481_v53 }
0x111d   : > { %2583 = vmatpush1.bf16.msra.mxu0 %v7479_v54 }
0x111e   : > { %2584 = vmatprep.subr.bf16.mxu0 %v7484_v55 }
0x1121   : > { %2585 = vmatpush1.bf16.msra.mxu0 %v7482_v57 }
0x1122   : > { %2586 = vmatprep.subr.bf16.mxu0 %v7487_v58 }
0x1125   : > { %2587 = vmatpush1.bf16.msra.mxu0 %v7485_v59 }
0x1126   : > { %6986 = vmatprep.subr.bf16.mxu0 %v7864_v0 }
0x11d0   : > { %v2191_v63 = vpop.f32.mrf.mxu0 }
0x11d1   : > { %v2192_v1 = vadd.f32 %v2191_v63, %v2107_v61 }
0x11d2   : > { %v2193_v2 = vpop.f32.mrf.mxu0 }
0x11d3   : > { %v2194_v3 = vadd.f32 %v2193_v2, %v2111_v62  ;;  %v2198_v4 = vmax.f32 %v2192_v1, 0.0  ;;  %v8313_v1 = vand.u32 127, %v504_v21  ;;  %v2416_v2 = vadd.s32 8, %v8008_v22 }
0x11d4   : > { %v2195_v5 = vpop.f32.mrf.mxu0 }
0x11d5   : > { %v2199_v6 = vmax.f32 %v2194_v3, 0.0  ;;  %v2200_v9 = vpack.c.bf16 %v2198_v4, %v2198_v4  ;;  %vm2419_vm8 = vcmp.gt.s32.totalorder %v8313_v1, %v8008_v22  ;;  %vm2420_vm9 = vcmp.gt.s32.totalorder %v8313_v1, %v2416_v2 }
0x11d6   : > { %v2196_v7 = vpop.f32.mrf.mxu0  ;;  %v8319_v3 = vsel %vm2419_vm8, -1e+09, %v7864_v0  ;;  %vm6230_vm14 = vcmp.eq.s32.totalorder %v8313_v1, 6 }
0x11d7   : > { %v2201_v8 = vpack.c.bf16 %v2199_v6, %v2199_v6  ;;  %v8324_v7 = vsel %vm2420_vm9, -1e+09, %v7864_v0 }
0x11d8   : > { %v2403_v12 = vpop.f32.mrf.mxu0 }
0x11d9   : > { %2330 = vmatprep.mubr.bf16.mxu1 %v2201_v8  ;;  %v2404_v11 = vadd.f32 %v6445_v10, %v2403_v12 }
0x11da   : > { %2331 = vmatmul.mubr.bf16.vlgmr.msra.gmra.mxu1 %v2200_v9  ;;  %v6984_v56 = vpop.f32.mrf.mxu0 }
0x11db   : > { %6994 = vmatprep.mubr.msk.bf16.mxu1 %vm7865_vm0, %v7864_v0  ;;  %v8261_v20 = vadd.f32 %v2410_v14, %v2404_v11 }
0x11dc   : > { %v2406_v15 = vpop.f32.mrf.mxu0 }
0x11dd   : > { %v2407_v18 = vadd.f32 %v6445_v10, %v2406_v15 }
0x11de   : > { %v6985_v19 = vpop.f32.mrf.mxu0 }
0x11df   : > { %v8263_v24 = vadd.f32 %v2411_v17, %v2407_v18 }
0x11e1   : > { %v2517_v25 = vpack.c.bf16 %v8263_v24, %v8261_v20 }
0x11e3   : > { %6456 = vmatmul.mubr.msk.bf16.vlgmr.msra.gmra.mxu0 %vm554_vm3, %v2517_v25 }
0x11e4   : > { %6988 = vmatprep.mubr.msk.bf16.mxu0 %vm7865_vm0, %v7864_v0 }
0x129a   : > { %v6693_v26 = vpop.f32.mrf.mxu1 }
0x129c   : > { %v6694_v27 = vpop.f32.mrf.mxu1 }
0x129d   : > { %v8270_v28 = vadd.f32 %v6694_v27, %v6693_v26 }
0x129e   : > { %v6696_v29 = vpop.f32.mrf.mxu1 }
0x12a0   : > { %v6697_v30 = vpop.f32.mrf.mxu1 }
0x12a3   : > { %v2606_v32 = vpop.f32.mrf.mxu0 }
0x12a4   : > { %v2607_v38 = vadd.f32 %v2606_v32, %v2522_v33 }
0x12a5   : > { %v2608_v35 = vpop.f32.mrf.mxu0 }
0x12a6   : > { %v2609_v43 = vadd.f32 %v2608_v35, %v2526_v36  ;;  %v2615_v48 = vmul.f32 0.25, %v2607_v38 }
0x12a7   : > { %v2610_v37 = vpop.f32.mrf.mxu0 }
0x12a8   : > { %v2611_v39 = vadd.f32 %v2610_v37, %v2522_v33 }
0x12a9   : > { %v2612_v41 = vpop.f32.mrf.mxu0 }
0x12aa   : > { %v2616_v44 = vmul.f32 0.25, %v2611_v39  ;;  %v2618_v45 = vpack.c.bf16 %v2611_v39, %v2607_v38  ;;  %v2613_v46 = vadd.f32 %v2612_v41, %v2526_v36 }
0x12ac   : > { %v8280_v49 = vpack.c.bf16 %v2613_v46, %v2609_v43  ;;  %2748 = vrot.lane.b32.xlu1 %v2618_v45, %s7869_s18  ;;  %2621 = vrot.lane.b32.xlu0 %v2618_v45, %s7867_s16  ;;  %v2617_v50 = vpack.c.bf16 %v2616_v44, %v2615_v48 }
0x12ae   : > { %v2702_v51 = vand.u32 %v8278_v47, %v8280_v49 }
0x12b0   : > { %2872 = vrot.lane.b32.xlu1 %v2618_v45, %s7870_s19  ;;  %2746 = vrot.lane.b32.xlu0 %v2617_v50, %s7868_s17 }
0x12b1   : > { %6993 = vmatpush3.bf16.msra.mxu1 %v2702_v51 }
0x12b2   : > { %7004 = vmatprep.subr.bf16.mxu1 %v7864_v0 }
0x12b4   : > { %2995 = vrot.lane.b32.xlu1 %v2618_v45, %s7872_s21  ;;  %2870 = vrot.lane.b32.xlu0 %v2617_v50, %s7871_s20 }
0x12b8   : > { %2993 = vrot.lane.b32.xlu0 %v2617_v50, %s7873_s22 }
0x131e   : > { %v2622_v52 = vpop.permute.xlu0 %2621  ;;  %v2749_v54 = vpop.permute.xlu1 %2748 }
0x131f   : > { %v2627_v53 = vsel %vm606_vm4, %v2622_v52, 0  ;;  %v2754_v55 = vsel %vm606_vm4, %v2749_v54, 0 }
0x1320   : > { %6987 = vmatpush3.bf16.xpose.msra.mxu0 %v2627_v53 }
0x1321   : > { %6998 = vmatprep.subr.bf16.mxu0 %v7864_v0 }
0x1322   : > { %v2873_v57 = vpop.permute.xlu1 %2872  ;;  %v2747_v58 = vpop.permute.xlu0 %2746 }
0x1323   : > { %v2878_v59 = vsel %vm606_vm4, %v2873_v57, 0 }
0x1326   : > { %v2996_v60 = vpop.permute.xlu1 %2995  ;;  %v2871_v61 = vpop.permute.xlu0 %2870 }
0x1327   : > { %6989 = vmatmul.mubr.msk.bf16.vlgmr.msra.gmra.mxu0 %vm606_vm4, %v2617_v50  ;;  %v3001_v62 = vsel %vm606_vm4, %v2996_v60, 0 }
0x1328   : > { %6999 = vmatpush3.bf16.xpose.msra.mxu0 %v2754_v55  ;;  %7000 = vmatprep.mubr.msk.bf16.mxu0 %vm7865_vm0, %v7864_v0 }
0x1329   : > { %7010 = vmatprep.subr.bf16.mxu0 %v7864_v0 }
0x132a   : > { %v2994_v63 = vpop.permute.xlu0 %2993 }
0x132f   : > { %7001 = vmatmul.mubr.msk.bf16.vlgmr.msra.gmra.mxu0 %vm606_vm4, %v2747_v58 }
0x1330   : > { %7011 = vmatpush3.bf16.xpose.msra.mxu0 %v2878_v59  ;;  %7012 = vmatprep.mubr.msk.bf16.mxu0 %vm7865_vm0, %v7864_v0 }
0x1331   : > { %7022 = vmatprep.subr.bf16.mxu0 %v7864_v0 }
0x1337   : > { %7013 = vmatmul.mubr.msk.bf16.vlgmr.msra.gmra.mxu0 %vm606_vm4, %v2871_v61 }
0x1338   : > { %7023 = vmatpush3.bf16.xpose.msra.mxu0 %v3001_v62  ;;  %7024 = vmatprep.mubr.msk.bf16.mxu0 %vm7865_vm0, %v7864_v0 }
0x1339   : > { %7034 = vmatprep.subr.bf16.mxu0 %v7864_v0 }
0x133f   : > { %7025 = vmatmul.mubr.msk.bf16.vlgmr.msra.gmra.mxu0 %vm606_vm4, %v2994_v63 }
0x1340   : > { %7042 = vmatprep.mubr.msk.bf16.mxu0 %vm7865_vm0, %v7864_v0 }
0x13e7   : > { %v2663_v4 = vpop.f32.mrf.mxu0 }
0x13e8   : > { %v2664_v5 = vadd.f32 %v2663_v4, %v8319_v3 }
0x13e9   : > { %v6990_v6 = vpop.f32.mrf.mxu0 }
0x13ea   : > { %v2671_v21 = vsel %vm2670_vm10, %v2664_v5, -inf }
0x13eb   : > { %2672 = vmax.xlane.f32.xlu1 %v2671_v21  ;;  %v2666_v8 = vpop.f32.mrf.mxu0 }
0x13ec   : > { %v2667_v22 = vadd.f32 %v2666_v8, %v8324_v7 }
0x13ed   : > { %v6991_v9 = vpop.f32.mrf.mxu0 }
0x13ee   : > { %v2675_v10 = vsel %vm2674_vm11, %v2667_v22, -inf }
0x13ef   : > { %2676 = vmax.xlane.f32.xlu0 %v2675_v10  ;;  %v2790_v12 = vpop.f32.mrf.mxu0 }
0x13f0   : > { %v2791_v56 = vadd.f32 %v2790_v12, %v8319_v3 }
0x13f1   : > { %v7002_v11 = vpop.f32.mrf.mxu0 }
0x13f2   : > { %v2797_v14 = vsel %vm2670_vm10, %v2791_v56, -inf }
0x13f3   : > { %2798 = vmax.xlane.f32.xlu0 %v2797_v14  ;;  %v2793_v15 = vpop.f32.mrf.mxu0 }
0x13f4   : > { %v2794_v17 = vadd.f32 %v2793_v15, %v8324_v7 }
0x13f5   : > { %v7003_v18 = vpop.f32.mrf.mxu0 }
0x13f6   : > { %v2800_v19 = vsel %vm2674_vm11, %v2794_v17, -inf }
0x13f7   : > { %2801 = vmax.xlane.f32.xlu1 %v2800_v19  ;;  %v2914_v25 = vpop.f32.mrf.mxu0 }
0x13f8   : > { %v2915_v26 = vadd.f32 %v2914_v25, %v8319_v3 }
0x13f9   : > { %v7014_v27 = vpop.f32.mrf.mxu0 }
0x13fa   : > { %v2921_v29 = vsel %vm2670_vm10, %v2915_v26, -inf }
0x13fb   : > { %2922 = vmax.xlane.f32.xlu0 %v2921_v29  ;;  %v2917_v30 = vpop.f32.mrf.mxu0 }
0x13fc   : > { %v2918_v31 = vadd.f32 %v2917_v30, %v8324_v7 }
0x13fd   : > { %v7015_v32 = vpop.f32.mrf.mxu0 }
0x13fe   : > { %v2924_v33 = vsel %vm2674_vm11, %v2918_v31, -inf }
0x13ff   : > { %2925 = vmax.xlane.f32.xlu1 %v2924_v33  ;;  %v3037_v35 = vpop.f32.mrf.mxu0 }
0x1400   : > { %v3038_v36 = vadd.f32 %v3037_v35, %v8319_v3 }
0x1401   : > { %v7026_v37 = vpop.f32.mrf.mxu0 }
0x1402   : > { %v3044_v38 = vsel %vm2670_vm10, %v3038_v36, -inf }
0x1403   : > { %3045 = vmax.xlane.f32.xlu0 %v3044_v38  ;;  %v3040_v39 = vpop.f32.mrf.mxu0 }
0x1404   : > { %v3041_v40 = vadd.f32 %v3040_v39, %v8324_v7 }
0x1405   : > { %v7027_v42 = vpop.f32.mrf.mxu0 }
0x1406   : > { %v3047_v41 = vsel %vm2674_vm11, %v3041_v40, -inf }
0x1407   : > { %3048 = vmax.xlane.f32.xlu1 %v3047_v41 }
0x1474   : > { %v2673_v43 = vpop.xlane.xlu1 %2672 }
0x1475   : > { %v2678_v44 = vsub.f32 %v2664_v5, %v2673_v43 }
0x1477   : > { %v2680_v45 = vmul.f32 1.442695, %v2678_v44 }
0x1478   : > { %v2677_v46 = vpop.xlane.xlu0 %2676 }
0x1479   : > { %7630 = vpow2.f32 %v2680_v45  ;;  %v2679_v48 = vsub.f32 %v2667_v22, %v2677_v46 }
0x147b   : > { %v2682_v50 = vmul.f32 1.442695, %v2679_v48 }
0x147c   : > { %v2799_v51 = vpop.xlane.xlu0 %2798 }
0x147d   : > { %7632 = vpow2.f32 %v2682_v50  ;;  %v2803_v52 = vsub.f32 %v2791_v56, %v2799_v51 }
0x147f   : > { %v2805_v53 = vmul.f32 1.442695, %v2803_v52 }
0x1480   : > { %v2802_v54 = vpop.xlane.xlu1 %2801 }
0x1481   : > { %7634 = vpow2.f32 %v2805_v53  ;;  %v2804_v55 = vsub.f32 %v2794_v17, %v2802_v54 }
0x1483   : > { %v2807_v57 = vmul.f32 1.442695, %v2804_v55 }
0x1484   : > { %v2923_v58 = vpop.xlane.xlu0 %2922 }
0x1485   : > { %7636 = vpow2.f32 %v2807_v57  ;;  %v2927_v59 = vsub.f32 %v2915_v26, %v2923_v58 }
0x1486   : > { %v7631_v60 = vpop.eup %7630 }
0x1487   : > { %v2929_v61 = vmul.f32 1.442695, %v2927_v59  ;;  %v2684_v62 = vsel %vm2670_vm10, %v7631_v60, 0.0 }
0x1488   : > { %v2926_v63 = vpop.xlane.xlu1 %2925  ;;  %2685 = vadd.xlane.f32.xlu0 %v2684_v62 }
0x1489   : > { %7638 = vpow2.f32 %v2929_v61  ;;  %v2928_v2 = vsub.f32 %v2918_v31, %v2926_v63 }
0x148a   : > { %v7633_v4 = vpop.eup %7632 }
0x148b   : > { %v2931_v5 = vmul.f32 1.442695, %v2928_v2  ;;  %v2687_v6 = vsel %vm2674_vm11, %v7633_v4, 0.0 }
0x148c   : > { %v3046_v21 = vpop.xlane.xlu0 %3045  ;;  %2688 = vadd.xlane.f32.xlu1 %v2687_v6 }
0x148d   : > { %7640 = vpow2.f32 %v2931_v5  ;;  %v3050_v8 = vsub.f32 %v3038_v36, %v3046_v21 }
0x148e   : > { %v7635_v22 = vpop.eup %7634 }
0x148f   : > { %v3052_v9 = vmul.f32 1.442695, %v3050_v8  ;;  %v2809_v10 = vsel %vm2670_vm10, %v7635_v22, 0.0 }
0x1490   : > { %2810 = vadd.xlane.f32.xlu0 %v2809_v10  ;;  %v3049_v25 = vpop.xlane.xlu1 %3048 }
0x1491   : > { %7642 = vpow2.f32 %v3052_v9  ;;  %v3051_v26 = vsub.f32 %v3041_v40, %v3049_v25  ;;  %v7490_v25 = vld [vmem:[#allocation4 + $0x50] ss:$8 sps:$4 sm:$0xff]  }
0x1492   : > { %v7637_v12 = vpop.eup %7636 }
0x1493   : > { %v2812_v56 = vsel %vm2674_vm11, %v7637_v12, 0.0  ;;  %v3054_v27 = vmul.f32 1.442695, %v3051_v26 }
0x1494   : > { %2813 = vadd.xlane.f32.xlu1 %v2812_v56 }
0x1495   : > { %7644 = vpow2.f32 %v3054_v27 }
0x1496   : > { %v7639_v11 = vpop.eup %7638 }
0x1497   : > { %v2933_v14 = vsel %vm2670_vm10, %v7639_v11, 0.0 }
0x1498   : > { %2934 = vadd.xlane.f32.xlu0 %v2933_v14 }
0x149a   : > { %v7641_v15 = vpop.eup %7640 }
0x149b   : > { %v2936_v17 = vsel %vm2674_vm11, %v7641_v15, 0.0 }
0x149c   : > { %2937 = vadd.xlane.f32.xlu1 %v2936_v17  ;;  %v7489_v17 = vld [vmem:[#allocation4 + $0x60] ss:$8 sps:$4 sm:$0xff]  }
0x149e   : > { %v8347_v18 = vpop.eup %7642 }
0x149f   : > { %v3056_v19 = vsel %vm2670_vm10, %v8347_v18, 0.0 }
0x14a0   : > { %3057 = vadd.xlane.f32.xlu0 %v3056_v19 }
0x14a2   : > { %v7645_v29 = vpop.eup %7644 }
0x14a3   : > { %v3059_v30 = vsel %vm2674_vm11, %v7645_v29, 0.0 }
0x14ad   : > { %2944 = vrot.lane.b32.xlu1 %v8280_v49, %s7871_s20 }
0x14b6   : > { %2821 = vrot.lane.b32.xlu0 %v8280_v49, %s7868_s17 }
0x14d1   : > { %3060 = vadd.xlane.f32.xlu1 %v3059_v30  ;;  %v6395_v30 = vld [vmem:[%s8924_s6 + $0x15] ss:$0 sm:$0xff] }
0x14e2   : > { %3067 = vrot.lane.b32.xlu1 %v8280_v49, %s7873_s22 }
0x1511   : > { %v2686_v31 = vpop.xlane.xlu0 %2685 }
0x1512   : > { %7646 = vrcp.f32 %v2686_v31  ;;  %v2333_v31 = vadd.f32 %v8270_v28, %v6395_v30 }
0x1515   : > { %v2689_v32 = vpop.xlane.xlu1 %2688 }
0x1516   : > { %7648 = vrcp.f32 %v2689_v32  ;;  %v2338_v32 = vadd.f32 %v2333_v31, %v8228_v16 }
0x1519   : > { %v2811_v33 = vpop.xlane.xlu0 %2810 }
0x151d   : > { %v2814_v35 = vpop.xlane.xlu1 %2813 }
0x151e   : > { %7650 = vrcp.f32 %v2814_v35  ;;  %v7491_v35 = vld [vmem:[#allocation4 + $0x40] ss:$8 sps:$4 sm:$0xff]  }
0x151f   : > { %7652 = vrcp.f32 %v2811_v33  ;;  %v7647_v36 = vpop.eup %7646  ;;  %v2339_v33 = vsel %vm554_vm3, %v2338_v32, 0.0 }
0x1520   : > { %v2692_v39 = vmul.f32 %v7647_v36, %v7631_v60 }
0x1521   : > { %v2935_v38 = vpop.xlane.xlu0 %2934 }
0x1523   : > { %v7649_v37 = vpop.eup %7648 }
0x1524   : > { %v2693_v40 = vmul.f32 %v7649_v37, %v7633_v4 }
0x1525   : > { %v2938_v42 = vpop.xlane.xlu1 %2937 }
0x1526   : > { %7654 = vrcp.f32 %v2938_v42  ;;  %v2694_v41 = vpack.c.bf16 %v2693_v40, %v2692_v39 }
0x1527   : > { %7656 = vrcp.f32 %v2935_v38 }
0x1528   : > { %6995 = vmatmul.mubr.msk.bf16.vlgmr.msra.gmra.mxu1 %vm2670_vm10, %v2694_v41 }
0x1529   : > { %v3058_v49 = vpop.xlane.xlu0 %3057  ;;  %7006 = vmatprep.mubr.msk.bf16.mxu1 %vm7865_vm0, %v7864_v0  ;;  %v2945_v50 = vpop.permute.xlu1 %2944 }
0x152a   : > { %v2950_v53 = vand.u32 %v2945_v50, %v8278_v47  ;;  %7658 = vrcp.f32 %v3058_v49 }
0x152b   : > { %v7651_v43 = vpop.eup %7650 }
0x152c   : > { %v7653_v44 = vpop.eup %7652  ;;  %v2818_v46 = vmul.f32 %v7651_v43, %v7637_v12 }
0x152d   : > { %v2822_v45 = vpop.permute.xlu0 %2821  ;;  %v2817_v51 = vmul.f32 %v7653_v44, %v7635_v22 }
0x152e   : > { %v2827_v48 = vand.u32 %v2822_v45, %v8278_v47 }
0x152f   : > { %v2819_v52 = vpack.c.bf16 %v2818_v46, %v2817_v51 }
0x1530   : > { %7005 = vmatpush3.bf16.msra.mxu1 %v2827_v48 }
0x1531   : > { %7016 = vmatprep.subr.bf16.mxu1 %v7864_v0 }
0x1533   : > { %v7655_v54 = vpop.eup %7654  ;;  %7007 = vmatmul.mubr.msk.bf16.vlgmr.msra.gmra.mxu1 %vm2670_vm10, %v2819_v52 }
0x1534   : > { %v7657_v55 = vpop.eup %7656  ;;  %7017 = vmatpush3.bf16.msra.mxu1 %v2950_v53  ;;  %7018 = vmatprep.mubr.msk.bf16.mxu1 %vm7865_vm0, %v7864_v0  ;;  %v2942_v57 = vmul.f32 %v7655_v54, %v7641_v15 }
0x1535   : > { %7028 = vmatprep.subr.bf16.mxu1 %v7864_v0  ;;  %v2941_v58 = vmul.f32 %v7657_v55, %v7639_v11  ;;  %v7488_v11 = vld [vmem:[#allocation4 + $0x70] ss:$8 sps:$4 sm:$0xff]  }
0x1536   : > { %7035 = vmatpush3.bf16.msra.mxu0 %v7488_v11 }
0x1537   : > { %v2943_v59 = vpack.c.bf16 %v2942_v57, %v2941_v58  ;;  %v7659_v63 = vpop.eup %7658  ;;  %7036 = vmatprep.subr.bf16.mxu0 %v7864_v0 }
0x1538   : > { %v3064_v4 = vmul.f32 %v7659_v63, %v8347_v18  ;;  %v7493_v63 = vld [vmem:[#allocation4 + $0xe0] ss:$8 sps:$4 sm:$0xff]  }
0x153a   : > { %7037 = vmatpush3.bf16.msra.mxu0 %v7489_v17 }
0x153b   : > { %7019 = vmatmul.mubr.msk.bf16.vlgmr.msra.gmra.mxu1 %vm2670_vm10, %v2943_v59  ;;  %7038 = vmatprep.subr.bf16.mxu0 %v7864_v0 }
0x153c   : > { %7030 = vmatprep.mubr.msk.bf16.mxu1 %vm7865_vm0, %v7864_v0 }
0x153e   : > { %7039 = vmatpush3.bf16.msra.mxu0 %v7490_v25 }
0x153f   : > { %7040 = vmatprep.subr.bf16.mxu0 %v7864_v0 }
0x1542   : > { %7041 = vmatpush3.bf16.msra.mxu0 %v7491_v35 }
0x1543   : > { %7058 = vmatprep.subr.bf16.mxu0 %v7864_v0 }
0x155a   : > { %v3061_v60 = vpop.xlane.xlu1 %3060 }
0x155b   : > { %7660 = vrcp.f32 %v3061_v60 }
0x155e   : > { %v3068_v61 = vpop.permute.xlu1 %3067 }
0x155f   : > { %v3073_v62 = vand.u32 %v3068_v61, %v8278_v47 }
0x1561   : > { %7029 = vmatpush3.bf16.msra.mxu1 %v3073_v62  ;;  %v7492_v62 = vld [vmem:[#allocation4 + $0xf0] ss:$8 sps:$4 sm:$0xff]  }
0x1562   : > { %7046 = vmatprep.subr.bf16.mxu1 %v7864_v0 }
0x1568   : > { %v7661_v2 = vpop.eup %7660 }
0x1569   : > { %v3065_v5 = vmul.f32 %v7661_v2, %v7645_v29  ;;  %v7494_v2 = vld [vmem:[#allocation4 + $0xd0] ss:$8 sps:$4 sm:$0xff]  }
0x156b   : > { %v3066_v6 = vpack.c.bf16 %v3065_v5, %v3064_v4  ;;  %v7495_v4 = vld [vmem:[#allocation4 + $0xc0] ss:$8 sps:$4 sm:$0xff]  }
0x156d   : > { %7031 = vmatmul.mubr.msk.bf16.vlgmr.msra.gmra.mxu1 %vm2670_vm10, %v3066_v6 }
0x156e   : > { %7054 = vmatprep.mubr.msk.bf16.mxu1 %vm7865_vm0, %v7864_v0 }
0x15e8   : > { %v2738_v21 = vpop.f32.mrf.mxu1 }
0x15ea   : > { %v6996_v8 = vpop.f32.mrf.mxu1 }
0x15ec   : > { %v2741_v22 = vpop.f32.mrf.mxu1 }
0x15ee   : > { %v6997_v9 = vpop.f32.mrf.mxu1 }
0x15f3   : > { %v2863_v10 = vpop.f32.mrf.mxu1 }
0x15f5   : > { %v7008_v12 = vpop.f32.mrf.mxu1 }
0x15f7   : > { %v2866_v56 = vpop.f32.mrf.mxu1 }
0x15f8   : > { %v7328_v14 = vpack.i.bf16 %v2866_v56, %v2863_v10  ;;  %v6397_v10 = vld [vmem:[%s8924_s6 + $0x17] ss:$0 sm:$0xff] }
0x15f9   : > { %v7009_v15 = vpop.f32.mrf.mxu1 }
0x15fa   : > { %7329 = vrot.lane.b32.xlu0 %v7328_v14, %s7872_s21  ;;  %v2504_v14 = vld [vmem:[%s8926_s8 + $0x1] ss:$0 sm:$0xff] }
0x15fb   : > { %v2986_v18 = vpop.f32.mrf.mxu1 }
0x15fd   : > { %v7020_v19 = vpop.f32.mrf.mxu1 }
0x15ff   : > { %v2989_v26 = vpop.f32.mrf.mxu1 }
0x1600   : > { %v7333_v27 = vpack.i.bf16 %v2989_v26, %v2986_v18 }
0x1601   : > { %v7021_v29 = vpop.f32.mrf.mxu1 }
0x1602   : > { %7334 = vrot.lane.b32.xlu1 %v7333_v27, %s7870_s19 }
0x1626   : > { %2340 = vadd.xlane.f32.xlu1 %v2339_v33 }
0x162d   : > { %v3109_v36 = vpop.f32.mrf.mxu1 }
0x162f   : > { %v7032_v37 = vpop.f32.mrf.mxu1 }
0x1631   : > { %v3112_v38 = vpop.f32.mrf.mxu1 }
0x1632   : > { %v7338_v39 = vpack.i.bf16 %v3112_v38, %v3109_v36 }
0x1633   : > { %v7033_v40 = vpop.f32.mrf.mxu1 }
0x1634   : > { %7339 = vrot.lane.b32.xlu0 %v7338_v39, %s7869_s18 }
0x166c   : > { %v7330_v42 = vpop.permute.xlu0 %7329 }
0x166d   : > { %v7332_v49 = vunpack.i.h.bf16 %v7330_v42  ;;  %v7331_v28 = vunpack.i.l.bf16 %v7330_v42 }
0x166f   : > { %v3141_v45 = vsel %vm606_vm4, %v2741_v22, %v7332_v49  ;;  %v3140_v46 = vsel %vm606_vm4, %v2738_v21, %v7331_v28  ;;  %v6396_v22 = vld [vmem:[%s8924_s6 + $0x16] ss:$0 sm:$0xff] }
0x1674   : > { %v7335_v41 = vpop.permute.xlu1 %7334 }
0x1675   : > { %v7337_v43 = vunpack.i.h.bf16 %v7335_v41  ;;  %v7336_v16 = vunpack.i.l.bf16 %v7335_v41  ;;  %v7496_v41 = vld [vmem:[#allocation4 + $0xb0] ss:$8 sps:$4 sm:$0xff]  }
0x1676   : > { %7047 = vmatpush3.bf16.msra.mxu1 %v7496_v41 }
0x1677   : > { %v3143_v51 = vsel %vm1056_vm5, %v3141_v45, %v7337_v43  ;;  %v3142_v52 = vsel %vm1056_vm5, %v3140_v46, %v7336_v16  ;;  %7048 = vmatprep.subr.bf16.mxu1 %v7864_v0 }
0x16a6   : > { %v7340_v44 = vpop.permute.xlu0 %7339 }
0x16a7   : > { %v7342_v48 = vunpack.i.h.bf16 %v7340_v44  ;;  %v7341_v50 = vunpack.i.l.bf16 %v7340_v44  ;;  %v7497_v44 = vld [vmem:[#allocation4 + $0xa0] ss:$8 sps:$4 sm:$0xff]  }
0x16a8   : > { %7049 = vmatpush3.bf16.msra.mxu1 %v7497_v44 }
0x16a9   : > { %v3145_v53 = vsel %vm1058_vm6, %v3143_v51, %v7342_v48  ;;  %v3144_v54 = vsel %vm1058_vm6, %v3142_v52, %v7341_v50  ;;  %7050 = vmatprep.subr.bf16.mxu1 %v7864_v0  ;;  %v7498_v48 = vld [vmem:[#allocation4 + $0x90] ss:$8 sps:$4 sm:$0xff]   ;;  %v7499_v50 = vld [vmem:[#allocation4 + $0x80] ss:$8 sps:$4 sm:$0xff]  }
0x16aa   : > { %v3146_v55 = vpack.c.bf16 %v3145_v53, %v3144_v54 }
0x16ac   : > { %7043 = vmatmul.mubr.msk.bf16.vlgmr.msra.gmra.mxu0 %vm554_vm3, %v3146_v55  ;;  %7051 = vmatpush3.bf16.msra.mxu1 %v7498_v48 }
0x16ad   : > { %7066 = vmatprep.mubr.msk.bf16.mxu0 %vm7865_vm0, %v7864_v0  ;;  %7059 = vmatpush3.bf16.msra.mxu0 %v7492_v62  ;;  %v2505_v62 = vld [vmem:[%s8926_s8 + $0x2] ss:$0 sm:$0xff] }
0x16ae   : > { %7060 = vmatprep.subr.bf16.mxu0 %v7864_v0  ;;  %7052 = vmatprep.subr.bf16.mxu1 %v7864_v0 }
0x16af   : > { %v2341_v57 = vpop.xlane.xlu1 %2340 }
0x16b0   : > { %v2342_v58 = vmul.f32 0.015625, %v2341_v57  ;;  %7053 = vmatpush3.bf16.msra.mxu1 %v7499_v50 }
0x16b1   : > { %7061 = vmatpush3.bf16.msra.mxu0 %v7493_v63  ;;  %7070 = vmatprep.subr.bf16.mxu1 %v7864_v0 }
0x16b2   : > { %v2343_v59 = vsub.f32 %v2338_v32, %v2342_v58  ;;  %7062 = vmatprep.subr.bf16.mxu0 %v7864_v0 }
0x16b4   : > { %v2344_v60 = vmul.f32 %v2343_v59, %v2343_v59 }
0x16b5   : > { %7063 = vmatpush3.bf16.msra.mxu0 %v7494_v2 }
0x16b6   : > { %v2345_v61 = vsel %vm554_vm3, %v2344_v60, 0.0  ;;  %7064 = vmatprep.subr.bf16.mxu0 %v7864_v0 }
0x16b7   : > { %2346 = vadd.xlane.f32.xlu1 %v2345_v61 }
0x16b9   : > { %7065 = vmatpush3.bf16.msra.mxu0 %v7495_v4 }
0x16ba   : > { %7082 = vmatprep.subr.bf16.mxu0 %v7864_v0 }
0x1740   : > { %v2347_v5 = vpop.xlane.xlu1 %2346 }
0x1741   : > { %v2348_v6 = vmul.f32 0.015625, %v2347_v5  ;;  %v2506_v5 = vld [vmem:[%s8926_s8 + $0x3] ss:$0 sm:$0xff] }
0x1743   : > { %v2349_v21 = vadd.f32 1e-05, %v2348_v6 }
0x1745   : > { %7662 = vrsqrt.f32 %v2349_v21 }
0x1752   : > { %v7663_v8 = vpop.eup %7662 }
0x1753   : > { %v2351_v9 = vmul.f32 %v7663_v8, %v2343_v59 }
0x1755   : > { %v2352_v12 = vmul.f32 %v6396_v22, %v2351_v9 }
0x1757   : > { %v2353_v56 = vadd.f32 %v6397_v10, %v2352_v12  ;;  %v2507_v10 = vld [vmem:[%s8926_s8 + $0x4] ss:$0 sm:$0xff] }
0x1759   : > { %v8410_v11 = vpack.c.bf16 %v2353_v56, %v2353_v56 }
0x175b   : > { %7067 = vmatmul.mubr.msk.bf16.vlgmr.msra.gmra.mxu0 %vm554_vm3, %v8410_v11 }
0x175c   : > { %7084 = vmatprep.mubr.msk.bf16.mxu0 %vm7865_vm0, %v7864_v0 }
0x176c   : > { %v3208_v15 = vpop.f32.mrf.mxu0 }
0x176d   : > { %v3209_v17 = vadd.f32 %v3208_v15, %v2504_v14 }
0x176e   : > { %v7044_v18 = vpop.f32.mrf.mxu0 }
0x176f   : > { %v3215_v19 = vadd.f32 %v3209_v17, %v8261_v20 }
0x1770   : > { %v3211_v25 = vpop.f32.mrf.mxu0 }
0x1771   : > { %v3212_v26 = vadd.f32 %v3211_v25, %v2504_v14  ;;  %v3217_v27 = vsel %vm554_vm3, %v3215_v19, 0.0 }
0x1772   : > { %3218 = vadd.xlane.f32.xlu0 %v3217_v27  ;;  %v7045_v29 = vpop.f32.mrf.mxu0 }
0x1773   : > { %v3216_v30 = vadd.f32 %v3212_v26, %v8263_v24  ;;  %v2508_v24 = vld [vmem:[%s8926_s8 + $0x5] ss:$0 sm:$0xff] }
0x1775   : > { %v3221_v31 = vsel %vm3220_vm12, %v3216_v30, 0.0 }
0x1776   : > { %3222 = vadd.xlane.f32.xlu0 %v3221_v31 }
0x17fb   : > { %v3219_v32 = vpop.xlane.xlu0 %3218 }
0x17fc   : > { %v3224_v33 = vmul.f32 0.015625, %v3219_v32 }
0x17fe   : > { %v3226_v35 = vsub.f32 %v3215_v19, %v3224_v33 }
0x17ff   : > { %v3223_v36 = vpop.xlane.xlu0 %3222 }
0x1800   : > { %v3225_v37 = vmul.f32 0.015625, %v3223_v36  ;;  %v3228_v38 = vmul.f32 %v3226_v35, %v3226_v35 }
0x1802   : > { %v3227_v39 = vsub.f32 %v3216_v30, %v3225_v37  ;;  %v3230_v20 = vsel %vm554_vm3, %v3228_v38, 0.0 }
0x1803   : > { %3231 = vadd.xlane.f32.xlu0 %v3230_v20 }
0x1804   : > { %v3229_v40 = vmul.f32 %v3227_v39, %v3227_v39 }
0x1806   : > { %v3233_v42 = vsel %vm3220_vm12, %v3229_v40, 0.0 }
0x1807   : > { %3234 = vadd.xlane.f32.xlu1 %v3233_v42 }
0x181b   : > { %v3379_v49 = vpop.f32.mrf.mxu0 }
0x181c   : > { %v3380_v28 = vadd.f32 %v3379_v49, %v2508_v24 }
0x181d   : > { %v7068_v43 = vpop.f32.mrf.mxu0 }
0x181e   : > { %v8429_v16 = vpack.c.bf16 %v3380_v28, %v3380_v28 }
0x181f   : > { %v3382_v45 = vpop.f32.mrf.mxu0 }
0x1820   : > { %3513 = vrot.lane.b32.xlu0 %v8429_v16, %s7868_s17  ;;  %v3393_v9 = vsel %vm606_vm4, %v8429_v16, 0 }
0x1821   : > { %v7069_v46 = vpop.f32.mrf.mxu0 }
0x188c   : > { %v3232_v51 = vpop.xlane.xlu0 %3231 }
0x188d   : > { %v3236_v52 = vmul.f32 0.015625, %v3232_v51 }
0x188f   : > { %v3238_v53 = vadd.f32 1e-05, %v3236_v52 }
0x1890   : > { %v3235_v54 = vpop.xlane.xlu1 %3234 }
0x1891   : > { %7664 = vrsqrt.f32 %v3238_v53  ;;  %v3237_v55 = vmul.f32 0.015625, %v3235_v54 }
0x1892   : > { %v3514_v57 = vpop.permute.xlu0 %3513 }
0x1893   : > { %v3239_v58 = vadd.f32 1e-05, %v3237_v55  ;;  %v3519_v59 = vsel %vm606_vm4, %v3514_v57, 0 }
0x1894   : > { %7083 = vmatpush3.bf16.xpose.msra.mxu0 %v3519_v59 }
0x1895   : > { %7666 = vrsqrt.f32 %v3239_v58  ;;  %7094 = vmatprep.subr.bf16.mxu0 %v7864_v0 }
0x189e   : > { %v7665_v60 = vpop.eup %7664 }
0x189f   : > { %v3242_v61 = vmul.f32 %v7665_v60, %v3226_v35 }
0x18a1   : > { %v3244_v4 = vmul.f32 %v3242_v61, %v2505_v62 }
0x18a2   : > { %v7667_v63 = vpop.eup %7666 }
0x18a3   : > { %v3243_v2 = vmul.f32 %v7667_v63, %v3227_v39  ;;  %v8444_v21 = vadd.f32 %v3244_v4, %v2506_v5 }
0x18a5   : > { %v3245_v6 = vmul.f32 %v3243_v2, %v2505_v62 }
0x18a7   : > { %v8446_v8 = vadd.f32 %v3245_v6, %v2506_v5 }
0x18a9   : > { %v3248_v22 = vpack.c.bf16 %v8446_v8, %v8444_v21 }
0x18ab   : > { %7055 = vmatmul.mubr.msk.bf16.vlgmr.msra.gmra.mxu1 %vm554_vm3, %v3248_v22 }
0x18ac   : > { %7071 = vmatpush3.bf16.xpose.msra.mxu1 %v3393_v9  ;;  %7072 = vmatprep.mubr.msk.bf16.mxu1 %vm7865_vm0, %v7864_v0 }
0x18ad   : > { %7076 = vmatprep.subr.bf16.mxu1 %v7864_v0 }
0x196b   : > { %v3310_v12 = vpop.f32.mrf.mxu1 }
0x196c   : > { %v3311_v14 = vadd.f32 %v3310_v12, %v2507_v10 }
0x196d   : > { %v7056_v56 = vpop.f32.mrf.mxu1 }
0x196e   : > { %v3385_v19 = vmul.f32 0.25, %v3311_v14 }
0x196f   : > { %v3313_v15 = vpop.f32.mrf.mxu1 }
0x1970   : > { %v3314_v17 = vadd.f32 %v3313_v15, %v2507_v10 }
0x1971   : > { %v7057_v18 = vpop.f32.mrf.mxu1 }
0x1972   : > { %v3386_v25 = vmul.f32 0.25, %v3314_v17 }
0x1974   : > { %v3387_v26 = vpack.c.bf16 %v3386_v25, %v3385_v19 }
0x1976   : > { %3634 = vrot.lane.b32.xlu0 %v3387_v26, %s7871_s20  ;;  %3511 = vrot.lane.b32.xlu1 %v3387_v26, %s7868_s17 }
0x1977   : > { %7073 = vmatmul.mubr.msk.bf16.vlgmr.msra.gmra.mxu1 %vm606_vm4, %v3387_v26 }
0x1978   : > { %7078 = vmatprep.mubr.msk.bf16.mxu1 %vm7865_vm0, %v7864_v0 }
0x197a   : > { %3757 = vrot.lane.b32.xlu0 %v3387_v26, %s7873_s22  ;;  %3636 = vrot.lane.b32.xlu1 %v8429_v16, %s7871_s20 }
0x197e   : > { %3759 = vrot.lane.b32.xlu1 %v8429_v16, %s7873_s22 }
0x19e8   : > { %v3512_v27 = vpop.permute.xlu1 %3511  ;;  %v3635_v32 = vpop.permute.xlu0 %3634 }
0x19e9   : > { %7085 = vmatmul.mubr.msk.bf16.vlgmr.msra.gmra.mxu0 %vm606_vm4, %v3512_v27 }
0x19ea   : > { %7096 = vmatprep.mubr.msk.bf16.mxu0 %vm7865_vm0, %v7864_v0 }
0x19ec   : > { %v3637_v29 = vpop.permute.xlu1 %3636  ;;  %v3758_v35 = vpop.permute.xlu0 %3757 }
0x19ed   : > { %v3642_v30 = vsel %vm606_vm4, %v3637_v29, 0 }
0x19ee   : > { %7095 = vmatpush3.bf16.xpose.msra.mxu0 %v3642_v30 }
0x19ef   : > { %7106 = vmatprep.subr.bf16.mxu0 %v7864_v0 }
0x19f0   : > { %v3760_v31 = vpop.permute.xlu1 %3759 }
0x19f1   : > { %v3765_v33 = vsel %vm606_vm4, %v3760_v31, 0 }
0x19f5   : > { %7097 = vmatmul.mubr.msk.bf16.vlgmr.msra.gmra.mxu0 %vm606_vm4, %v3635_v32 }
0x19f6   : > { %7107 = vmatpush3.bf16.xpose.msra.mxu0 %v3765_v33  ;;  %7108 = vmatprep.mubr.msk.bf16.mxu0 %vm7865_vm0, %v7864_v0 }
0x19f7   : > { %7118 = vmatprep.subr.bf16.mxu0 %v7864_v0 }
0x19fd   : > { %7109 = vmatmul.mubr.msk.bf16.vlgmr.msra.gmra.mxu0 %vm606_vm4, %v3758_v35 }
0x19fe   : > { %7126 = vmatprep.mubr.msk.bf16.mxu0 %vm7865_vm0, %v7864_v0 }
0x1a37   : > { %v3429_v36 = vpop.f32.mrf.mxu1 }
0x1a38   : > { %v3436_v37 = vsel %vm389_vm2, %v3429_v36, -inf }
0x1a39   : > { %3437 = vmax.xlane.f32.xlu1 %v3436_v37  ;;  %v7074_v38 = vpop.f32.mrf.mxu1 }
0x1a3b   : > { %v3432_v39 = vpop.f32.mrf.mxu1 }
0x1a3c   : > { %v3440_v20 = vsel %vm3439_vm13, %v3432_v39, -inf }
0x1a3d   : > { %3441 = vmax.xlane.f32.xlu0 %v3440_v20  ;;  %v7075_v40 = vpop.f32.mrf.mxu1 }
0x1aa9   : > { %v3555_v42 = vpop.f32.mrf.mxu0 }
0x1aaa   : > { %v3562_v24 = vsel %vm389_vm2, %v3555_v42, -inf }
0x1aab   : > { %v7086_v41 = vpop.f32.mrf.mxu0  ;;  %3563 = vmax.xlane.f32.xlu0 %v3562_v24 }
0x1aad   : > { %v3558_v49 = vpop.f32.mrf.mxu0 }
0x1aae   : > { %v3565_v28 = vsel %vm3439_vm13, %v3558_v49, -inf }
0x1aaf   : > { %v7087_v43 = vpop.f32.mrf.mxu0  ;;  %3566 = vmax.xlane.f32.xlu1 %v3565_v28 }
0x1ab5   : > { %v8486_v44 = vpop.f32.mrf.mxu0 }
0x1ab6   : > { %v3685_v45 = vsel %vm389_vm2, %v8486_v44, -inf }
0x1ab7   : > { %v7098_v46 = vpop.f32.mrf.mxu0  ;;  %3686 = vmax.xlane.f32.xlu0 %v3685_v45 }
0x1ab9   : > { %v3681_v48 = vpop.f32.mrf.mxu0 }
0x1aba   : > { %v3688_v50 = vsel %vm3439_vm13, %v3681_v48, -inf }
0x1abb   : > { %v7099_v51 = vpop.f32.mrf.mxu0  ;;  %3689 = vmax.xlane.f32.xlu1 %v3688_v50 }
0x1abd   : > { %v3801_v52 = vpop.f32.mrf.mxu0 }
0x1abe   : > { %v3808_v53 = vsel %vm389_vm2, %v3801_v52, -inf }
0x1abf   : > { %v7110_v54 = vpop.f32.mrf.mxu0  ;;  %3809 = vmax.xlane.f32.xlu0 %v3808_v53 }
0x1ac1   : > { %v3804_v55 = vpop.f32.mrf.mxu0 }
0x1ac2   : > { %v3438_v57 = vpop.xlane.xlu1 %3437  ;;  %v3811_v58 = vsel %vm3439_vm13, %v3804_v55, -inf }
0x1ac3   : > { %v3443_v59 = vsub.f32 %v3429_v36, %v3438_v57  ;;  %v7111_v60 = vpop.f32.mrf.mxu0  ;;  %3812 = vmax.xlane.f32.xlu1 %v3811_v58 }
0x1ac5   : > { %v3445_v61 = vmul.f32 1.442695, %v3443_v59 }
0x1ac6   : > { %v3442_v62 = vpop.xlane.xlu0 %3441 }
0x1ac7   : > { %7668 = vpow2.f32 %v3445_v61  ;;  %v3444_v63 = vsub.f32 %v3432_v39, %v3442_v62 }
0x1ac9   : > { %v3447_v2 = vmul.f32 1.442695, %v3444_v63 }
0x1acb   : > { %7670 = vpow2.f32 %v3447_v2 }
0x1ad4   : > { %v8493_v4 = vpop.eup %7668 }
0x1ad5   : > { %v3449_v5 = vsel %vm389_vm2, %v8493_v4, 0.0 }
0x1ad6   : > { %3450 = vadd.xlane.f32.xlu0 %v3449_v5 }
0x1ad8   : > { %v7671_v6 = vpop.eup %7670 }
0x1ad9   : > { %v3452_v22 = vsel %vm3439_vm13, %v7671_v6, 0.0 }
0x1ada   : > { %3453 = vadd.xlane.f32.xlu1 %v3452_v22 }
0x1aeb   : > { %3585 = vrot.lane.b32.xlu1 %v8429_v16, %s7869_s18 }
0x1b34   : > { %v3564_v9 = vpop.xlane.xlu0 %3563 }
0x1b35   : > { %v3568_v10 = vsub.f32 %v3555_v42, %v3564_v9 }
0x1b37   : > { %v3570_v12 = vmul.f32 1.442695, %v3568_v10 }
0x1b38   : > { %v3567_v56 = vpop.xlane.xlu1 %3566 }
0x1b39   : > { %7672 = vpow2.f32 %v3570_v12  ;;  %v3569_v14 = vsub.f32 %v3558_v49, %v3567_v56 }
0x1b3b   : > { %v3572_v15 = vmul.f32 1.442695, %v3569_v14 }
0x1b3d   : > { %7674 = vpow2.f32 %v3572_v15 }
0x1b40   : > { %v3687_v38 = vpop.xlane.xlu0 %3686 }
0x1b41   : > { %v3691_v39 = vsub.f32 %v8486_v44, %v3687_v38 }
0x1b43   : > { %v3693_v40 = vmul.f32 1.442695, %v3691_v39 }
0x1b44   : > { %v3690_v17 = vpop.xlane.xlu1 %3689 }
0x1b45   : > { %v3692_v18 = vsub.f32 %v3681_v48, %v3690_v17 }
0x1b46   : > { %v7673_v19 = vpop.eup %7672 }
0x1b47   : > { %v3695_v25 = vmul.f32 1.442695, %v3692_v18  ;;  %v3574_v26 = vsel %vm389_vm2, %v7673_v19, 0.0 }
0x1b48   : > { %3575 = vadd.xlane.f32.xlu0 %v3574_v26  ;;  %v3810_v20 = vpop.xlane.xlu0 %3809 }
0x1b49   : > { %7676 = vpow2.f32 %v3695_v25  ;;  %v3814_v42 = vsub.f32 %v3801_v52, %v3810_v20 }
0x1b4a   : > { %v7675_v27 = vpop.eup %7674 }
0x1b4b   : > { %v3577_v29 = vsel %vm3439_vm13, %v7675_v27, 0.0  ;;  %v3816_v24 = vmul.f32 1.442695, %v3814_v42  ;;  %v7502_v42 = vld [vmem:[#allocation4 + $0x110] ss:$8 sps:$4 sm:$0xff]  }
0x1b4c   : > { %v3813_v30 = vpop.xlane.xlu1 %3812  ;;  %3578 = vadd.xlane.f32.xlu1 %v3577_v29 }
0x1b4d   : > { %v3815_v31 = vsub.f32 %v3804_v55, %v3813_v30 }
0x1b4f   : > { %v3818_v32 = vmul.f32 1.442695, %v3815_v31 }
0x1b51   : > { %7678 = vpow2.f32 %v3818_v32 }
0x1b52   : > { %7680 = vpow2.f32 %v3693_v40 }
0x1b53   : > { %7682 = vpow2.f32 %v3816_v24 }
0x1b56   : > { %v8502_v33 = vpop.eup %7676 }
0x1b57   : > { %v3700_v35 = vsel %vm3439_vm13, %v8502_v33, 0.0 }
0x1b58   : > { %3701 = vadd.xlane.f32.xlu1 %v3700_v35  ;;  %v7500_v35 = vld [vmem:[#allocation4 + $0x130] ss:$8 sps:$4 sm:$0xff]  }
0x1b59   : > { %7119 = vmatpush3.bf16.msra.mxu0 %v7500_v35 }
0x1b5a   : > { %7120 = vmatprep.subr.bf16.mxu0 %v7864_v0 }
0x1b5e   : > { %v8506_v36 = vpop.eup %7678  ;;  %3461 = vrot.lane.b32.xlu0 %v8429_v16, %s7867_s16 }
0x1b5f   : > { %v3823_v37 = vsel %vm3439_vm13, %v8506_v36, 0.0  ;;  %v7681_v41 = vpop.eup %7680  ;;  %v3451_v45 = vpop.xlane.xlu0 %3450 }
0x1b60   : > { %3824 = vadd.xlane.f32.xlu1 %v3823_v37  ;;  %v3697_v49 = vsel %vm389_vm2, %v7681_v41, 0.0  ;;  %v7683_v28 = vpop.eup %7682 }
0x1b61   : > { %v3820_v43 = vsel %vm389_vm2, %v7683_v28, 0.0 }
0x1b63   : > { %v3454_v44 = vpop.xlane.xlu1 %3453 }
0x1b64   : > { %7684 = vrcp.f32 %v3454_v44 }
0x1b65   : > { %7686 = vrcp.f32 %v3451_v45 }
0x1b67   : > { %v3586_v48 = vpop.permute.xlu1 %3585 }
0x1b71   : > { %3708 = vrot.lane.b32.xlu1 %v8429_v16, %s7870_s19  ;;  %v7685_v46 = vpop.eup %7684 }
0x1b72   : > { %v7687_v51 = vpop.eup %7686  ;;  %v3458_v52 = vmul.f32 %v7685_v46, %v7671_v6 }
0x1b73   : > { %v3457_v57 = vmul.f32 %v7687_v51, %v8493_v4 }
0x1b75   : > { %v3459_v58 = vpack.c.bf16 %v3458_v52, %v3457_v57 }
0x1b7d   : > { %3698 = vadd.xlane.f32.xlu0 %v3697_v49  ;;  %v7503_v49 = vld [vmem:[#allocation4 + $0x100] ss:$8 sps:$4 sm:$0xff]  }
0x1b81   : > { %3821 = vadd.xlane.f32.xlu0 %v3820_v43 }
0x1b97   : > { %3831 = vrot.lane.b32.xlu0 %v8429_v16, %s7872_s21  ;;  %v3591_v16 = vsel %vm393_vm1, %v3586_v48, 0 }
0x1bd1   : > { %v3576_v50 = vpop.xlane.xlu0 %3575 }
0x1bd2   : > { %7688 = vrcp.f32 %v3576_v50 }
0x1bd5   : > { %v3579_v53 = vpop.xlane.xlu1 %3578  ;;  %v3462_v54 = vpop.permute.xlu0 %3461 }
0x1bd6   : > { %7690 = vrcp.f32 %v3579_v53  ;;  %v3467_v55 = vsel %vm393_vm1, %v3462_v54, 0 }
0x1bd7   : > { %7077 = vmatpush3.bf16.msra.mxu1 %v3467_v55 }
0x1bd8   : > { %7088 = vmatprep.subr.bf16.mxu1 %v7864_v0 }
0x1bda   : > { %7079 = vmatmul.mubr.msk.bf16.vlgmr.msra.gmra.mxu1 %vm389_vm2, %v3459_v58 }
0x1bdb   : > { %7089 = vmatpush3.bf16.msra.mxu1 %v3591_v16  ;;  %7090 = vmatprep.mubr.msk.bf16.mxu1 %vm7865_vm0, %v7864_v0 }
0x1bdc   : > { %7100 = vmatprep.subr.bf16.mxu1 %v7864_v0 }
0x1bdf   : > { %v7689_v59 = vpop.eup %7688 }
0x1be0   : > { %v3582_v61 = vmul.f32 %v7689_v59, %v7673_v19 }
0x1be1   : > { %v3702_v63 = vpop.xlane.xlu1 %3701 }
0x1be2   : > { %7692 = vrcp.f32 %v3702_v63 }
0x1be3   : > { %v7691_v60 = vpop.eup %7690 }
0x1be4   : > { %v3583_v62 = vmul.f32 %v7691_v60, %v7675_v27 }
0x1be6   : > { %v3584_v2 = vpack.c.bf16 %v3583_v62, %v3582_v61 }
0x1be8   : > { %7091 = vmatmul.mubr.msk.bf16.vlgmr.msra.gmra.mxu1 %vm389_vm2, %v3584_v2 }
0x1be9   : > { %v3825_v4 = vpop.xlane.xlu1 %3824  ;;  %7102 = vmatprep.mubr.msk.bf16.mxu1 %vm7865_vm0, %v7864_v0 }
0x1bed   : > { %v3709_v5 = vpop.permute.xlu1 %3708 }
0x1bee   : > { %v3714_v6 = vsel %vm393_vm1, %v3709_v5, 0 }
0x1bef   : > { %7101 = vmatpush3.bf16.msra.mxu1 %v3714_v6  ;;  %v7693_v10 = vpop.eup %7692 }
0x1bf0   : > { %7112 = vmatprep.subr.bf16.mxu1 %v7864_v0  ;;  %v3706_v14 = vmul.f32 %v7693_v10, %v8502_v33 }
0x1c06   : > { %v3699_v22 = vpop.xlane.xlu0 %3698 }
0x1c07   : > { %7694 = vrcp.f32 %v3699_v22  ;;  %v2509_v22 = vld [vmem:[%s8926_s8 + $0x6] ss:$0 sm:$0xff] }
0x1c0a   : > { %v3822_v9 = vpop.xlane.xlu0 %3821 }
0x1c0b   : > { %7696 = vrcp.f32 %v3822_v9 }
0x1c0c   : > { %7698 = vrcp.f32 %v3825_v4 }
0x1c0e   : > { %v3832_v15 = vpop.permute.xlu0 %3831 }
0x1c0f   : > { %v3837_v19 = vsel %vm393_vm1, %v3832_v15, 0 }
0x1c14   : > { %v7695_v12 = vpop.eup %7694 }
0x1c15   : > { %v3705_v56 = vmul.f32 %v7695_v12, %v7681_v41 }
0x1c17   : > { %v3707_v17 = vpack.c.bf16 %v3706_v14, %v3705_v56 }
0x1c18   : > { %v7697_v18 = vpop.eup %7696 }
0x1c19   : > { %7103 = vmatmul.mubr.msk.bf16.vlgmr.msra.gmra.mxu1 %vm389_vm2, %v3707_v17  ;;  %v7699_v25 = vpop.eup %7698  ;;  %v3828_v26 = vmul.f32 %v7697_v18, %v7683_v28 }
0x1c1a   : > { %7113 = vmatpush3.bf16.msra.mxu1 %v3837_v19  ;;  %7114 = vmatprep.mubr.msk.bf16.mxu1 %vm7865_vm0, %v7864_v0  ;;  %v3829_v27 = vmul.f32 %v7699_v25, %v8506_v36  ;;  %v7501_v36 = vld [vmem:[#allocation4 + $0x120] ss:$8 sps:$4 sm:$0xff]  }
0x1c1b   : > { %7121 = vmatpush3.bf16.msra.mxu0 %v7501_v36  ;;  %v7510_v36 = vld [vmem:[#allocation4 + $0x150] ss:$8 sps:$4 sm:$0xff]  }
0x1c1c   : > { %v3830_v29 = vpack.c.bf16 %v3829_v27, %v3828_v26  ;;  %7122 = vmatprep.subr.bf16.mxu0 %v7864_v0 }
0x1c1f   : > { %7123 = vmatpush3.bf16.msra.mxu0 %v7502_v42  ;;  %v7515_v42 = vld [vmem:[#allocation4 + $0x144] ss:$8 sps:$4 sm:$0xff]  }
0x1c20   : > { %7124 = vmatprep.subr.bf16.mxu0 %v7864_v0 }
0x1c21   : > { %7115 = vmatmul.mubr.msk.bf16.vlgmr.msra.gmra.mxu1 %vm389_vm2, %v3830_v29 }
0x1c22   : > { %4098 = vmatprep.mubr.bf16.mxu1 %v7866_v13 }
0x1c23   : > { %7125 = vmatpush3.bf16.msra.mxu0 %v7503_v49  ;;  %v7517_v49 = vld [vmem:[#allocation4 + $0x1f0] ss:$8 sps:$4 sm:$0xff]  }
0x1c9a   : > { %v3503_v30 = vpop.f32.mrf.mxu1 }
0x1c9c   : > { %v7080_v31 = vpop.f32.mrf.mxu1 }
0x1c9e   : > { %v3506_v32 = vpop.f32.mrf.mxu1 }
0x1ca0   : > { %v7081_v33 = vpop.f32.mrf.mxu1 }
0x1ca8   : > { %v3627_v37 = vpop.f32.mrf.mxu1 }
0x1caa   : > { %v7092_v38 = vpop.f32.mrf.mxu1 }
0x1cab   : > { %v7506_v38 = vld [vmem:[#allocation4 + $0x174] ss:$8 sps:$4 sm:$0xff]  }
0x1cac   : > { %v3630_v39 = vpop.f32.mrf.mxu1  ;;  %4074 = vmatprep.subr.bf16.mxu1 %v7506_v38 }
0x1cad   : > { %v7343_v20 = vpack.i.bf16 %v3630_v39, %v3627_v37  ;;  %v7504_v39 = vld [vmem:[#allocation4 + $0x170] ss:$8 sps:$4 sm:$0xff]  }
0x1cae   : > { %v7093_v40 = vpop.f32.mrf.mxu1  ;;  %4075 = vmatpush1.bf16.msra.mxu1 %v7504_v39 }
0x1caf   : > { %7344 = vrot.lane.b32.xlu1 %v7343_v20, %s7872_s21  ;;  %v7507_v20 = vld [vmem:[#allocation4 + $0x160] ss:$8 sps:$4 sm:$0xff]   ;;  %v7512_v40 = vld [vmem:[#allocation4 + $0x154] ss:$8 sps:$4 sm:$0xff]  }
0x1cd9   : > { %v3750_v24 = vpop.f32.mrf.mxu1 }
0x1cdb   : > { %v7104_v41 = vpop.f32.mrf.mxu1 }
0x1cdc   : > { %v7516_v41 = vld [vmem:[#allocation4 + $0x270] ss:$8 sps:$4 sm:$0xff]  }
0x1cdd   : > { %v3753_v28 = vpop.f32.mrf.mxu1  ;;  %6753 = vmatprep.subr.bf16.mxu0 %v7516_v41 }
0x1cde   : > { %v7348_v43 = vpack.i.bf16 %v3753_v28, %v3750_v24  ;;  %v7513_v24 = vld [vmem:[#allocation4 + $0x140] ss:$8 sps:$4 sm:$0xff]  }
0x1cdf   : > { %v7105_v44 = vpop.f32.mrf.mxu1  ;;  %v7518_v28 = vld [vmem:[#allocation4 + $0x260] ss:$8 sps:$4 sm:$0xff]  }
0x1ce0   : > { %7349 = vrot.lane.b32.xlu0 %v7348_v43, %s7870_s19  ;;  %v7519_v43 = vld [vmem:[#allocation4 + $0x1e0] ss:$8 sps:$4 sm:$0xff]   ;;  %v7520_v44 = vld [vmem:[#allocation4 + $0x250] ss:$8 sps:$4 sm:$0xff]  }
0x1ce1   : > { %v3873_v45 = vpop.f32.mrf.mxu1 }
0x1ce3   : > { %v7116_v46 = vpop.f32.mrf.mxu1 }
0x1ce4   : > { %v7522_v46 = vld [vmem:[#allocation4 + $0x240] ss:$8 sps:$4 sm:$0xff]  }
0x1ce5   : > { %v3876_v48 = vpop.f32.mrf.mxu1 }
0x1ce6   : > { %v7353_v50 = vpack.i.bf16 %v3876_v48, %v3873_v45  ;;  %v7521_v45 = vld [vmem:[#allocation4 + $0x1d0] ss:$8 sps:$4 sm:$0xff]   ;;  %v7523_v48 = vld [vmem:[#allocation4 + $0x1c0] ss:$8 sps:$4 sm:$0xff]  }
0x1ce7   : > { %v7117_v51 = vpop.f32.mrf.mxu1 }
0x1ce8   : > { %7354 = vrot.lane.b32.xlu1 %v7353_v50, %s7869_s18  ;;  %v7524_v50 = vld [vmem:[#allocation4 + $0x230] ss:$8 sps:$4 sm:$0xff]  }
0x1ce9   : > { %v7525_v51 = vld [vmem:[#allocation4 + $0x1b0] ss:$8 sps:$4 sm:$0xff]  }
0x1d21   : > { %v7345_v52 = vpop.permute.xlu1 %7344 }
0x1d22   : > { %v7347_v54 = vunpack.i.h.bf16 %v7345_v52  ;;  %v7346_v55 = vunpack.i.l.bf16 %v7345_v52 }
0x1d24   : > { %v3905_v59 = vsel %vm606_vm4, %v3506_v32, %v7347_v54  ;;  %v3904_v60 = vsel %vm606_vm4, %v3503_v30, %v7346_v55 }
0x1d52   : > { %v7350_v53 = vpop.permute.xlu0 %7349 }
0x1d53   : > { %v7352_v57 = vunpack.i.h.bf16 %v7350_v53  ;;  %v7351_v58 = vunpack.i.l.bf16 %v7350_v53 }
0x1d55   : > { %v3907_v63 = vsel %vm1056_vm5, %v3905_v59, %v7352_v57  ;;  %v3906_v2 = vsel %vm1056_vm5, %v3904_v60, %v7351_v58  ;;  %v2510_v60 = vld [vmem:[%s8926_s8 + $0x7] ss:$0 sm:$0xff] }
0x1d5a   : > { %v7355_v16 = vpop.permute.xlu1 %7354 }
0x1d5b   : > { %v7357_v61 = vunpack.i.h.bf16 %v7355_v16  ;;  %v7356_v62 = vunpack.i.l.bf16 %v7355_v16 }
0x1d5d   : > { %v3909_v4 = vsel %vm1058_vm6, %v3907_v63, %v7357_v61  ;;  %v3908_v5 = vsel %vm1058_vm6, %v3906_v2, %v7356_v62  ;;  %v2511_v2 = vld [vmem:[%s8926_s8 + $0x10] ss:$0 sm:$0xff] }
0x1d5e   : > { %v3910_v6 = vpack.c.bf16 %v3909_v4, %v3908_v5 }
0x1d60   : > { %7127 = vmatmul.mubr.msk.bf16.vlgmr.msra.gmra.mxu0 %vm554_vm3, %v3910_v6 }
0x1d61   : > { %6754 = vmatpush3.bf16.msra.mxu0 %v7517_v49 }
0x1d62   : > { %6755 = vmatprep.subr.bf16.mxu0 %v7518_v28 }
0x1d65   : > { %6756 = vmatpush3.bf16.msra.mxu0 %v7519_v43 }
0x1d66   : > { %6757 = vmatprep.subr.bf16.mxu0 %v7520_v44 }
0x1d69   : > { %6758 = vmatpush3.bf16.msra.mxu0 %v7521_v45 }
0x1d6a   : > { %6759 = vmatprep.subr.bf16.mxu0 %v7522_v46 }
0x1d6d   : > { %6760 = vmatpush3.bf16.msra.mxu0 %v7523_v48 }
0x1d6e   : > { %6761 = vmatprep.subr.bf16.mxu0 %v7524_v50 }
0x1d71   : > { %6762 = vmatpush3.bf16.msra.mxu0 %v7525_v51 }
0x1e20   : > { %v3972_v9 = vpop.f32.mrf.mxu0 }
0x1e21   : > { %v3973_v10 = vadd.f32 %v3972_v9, %v2509_v22  ;;  %v7526_v9 = vld [vmem:[#allocation4 + $0x220] ss:$8 sps:$4 sm:$0xff]  }
0x1e22   : > { %v7128_v12 = vpop.f32.mrf.mxu0  ;;  %6763 = vmatprep.subr.bf16.mxu0 %v7526_v9 }
0x1e23   : > { %v3979_v56 = vadd.f32 %v3973_v10, %v8444_v21  ;;  %v7527_v10 = vld [vmem:[#allocation4 + $0x1a0] ss:$8 sps:$4 sm:$0xff]   ;;  %v7528_v12 = vld [vmem:[#allocation4 + $0x210] ss:$8 sps:$4 sm:$0xff]  }
0x1e24   : > { %v3975_v14 = vpop.f32.mrf.mxu0  ;;  %6764 = vmatpush3.bf16.msra.mxu0 %v7527_v10 }
0x1e25   : > { %v3976_v15 = vadd.f32 %v3975_v14, %v2509_v22  ;;  %v3981_v17 = vsel %vm554_vm3, %v3979_v56, 0.0  ;;  %6765 = vmatprep.subr.bf16.mxu0 %v7528_v12  ;;  %v7530_v14 = vld [vmem:[#allocation4 + $0x200] ss:$8 sps:$4 sm:$0xff]  }
0x1e26   : > { %3982 = vadd.xlane.f32.xlu0 %v3981_v17  ;;  %v7129_v18 = vpop.f32.mrf.mxu0  ;;  %v6447_v17 = vld [vmem:[%s8926_s8 + $0x11] ss:$8 sm:$0x3] }
0x1e27   : > { %v3980_v19 = vadd.f32 %v3976_v15, %v8446_v8  ;;  %v7509_v8 = vld [vmem:[#allocation4 + $0x164] ss:$8 sps:$4 sm:$0xff]   ;;  %v7531_v15 = vld [vmem:[#allocation4 + $0x180] ss:$8 sps:$4 sm:$0xff]  }
0x1e28   : > { %4076 = vmatprep.subr.bf16.mxu1 %v7509_v8 }
0x1e29   : > { %v3984_v25 = vsel %vm3220_vm12, %v3980_v19, 0.0  ;;  %4077 = vmatpush1.bf16.msra.mxu1 %v7507_v20 }
0x1e2a   : > { %3985 = vadd.xlane.f32.xlu1 %v3984_v25  ;;  %4078 = vmatprep.subr.bf16.mxu1 %v7512_v40  ;;  %v4016_v25 = vrot.slane %v6447_v17, %v8011_v23  ;;  %v2514_v40 = vld [vmem:[%s8926_s8 + $0x12] ss:$0 sm:$0xff] }
0x1e2d   : > { %4079 = vmatpush1.bf16.msra.mxu1 %v7510_v36 }
0x1e2e   : > { %4080 = vmatprep.subr.bf16.mxu1 %v7515_v42 }
0x1e31   : > { %4081 = vmatpush1.bf16.msra.mxu1 %v7513_v24 }
0x1eaf   : > { %v3983_v26 = vpop.xlane.xlu0 %3982 }
0x1eb0   : > { %v3987_v27 = vmul.f32 0.015625, %v3983_v26 }
0x1eb2   : > { %v3989_v29 = vsub.f32 %v3979_v56, %v3987_v27  ;;  %v7529_v56 = vld [vmem:[#allocation4 + $0x190] ss:$8 sps:$4 sm:$0xff]  }
0x1eb3   : > { %v3986_v30 = vpop.xlane.xlu1 %3985  ;;  %6766 = vmatpush3.bf16.msra.mxu0 %v7529_v56 }
0x1eb4   : > { %v3988_v31 = vmul.f32 0.015625, %v3986_v30  ;;  %v3991_v32 = vmul.f32 %v3989_v29, %v3989_v29  ;;  %6767 = vmatprep.subr.bf16.mxu0 %v7530_v14 }
0x1eb6   : > { %v3990_v33 = vsub.f32 %v3980_v19, %v3988_v31  ;;  %v3993_v21 = vsel %vm554_vm3, %v3991_v32, 0.0  ;;  %v4020_v19 = vrot.slane %v6447_v17, %v8025_v34 }
0x1eb7   : > { %3994 = vadd.xlane.f32.xlu0 %v3993_v21  ;;  %6768 = vmatpush3.bf16.msra.mxu0 %v7531_v15 }
0x1eb8   : > { %v3992_v35 = vmul.f32 %v3990_v33, %v3990_v33  ;;  %7142 = vmatprep.subr.bf16.mxu0 %v7864_v0 }
0x1eba   : > { %v3996_v37 = vsel %vm3220_vm12, %v3992_v35, 0.0 }
0x1ebb   : > { %3997 = vadd.xlane.f32.xlu0 %v3996_v37 }
0x1f40   : > { %v3995_v52 = vpop.xlane.xlu0 %3994 }
0x1f41   : > { %v3999_v53 = vmul.f32 0.015625, %v3995_v52 }
0x1f43   : > { %v4001_v54 = vadd.f32 1e-05, %v3999_v53 }
0x1f44   : > { %v3998_v55 = vpop.xlane.xlu0 %3997 }
0x1f45   : > { %7700 = vrsqrt.f32 %v4001_v54  ;;  %v4000_v57 = vmul.f32 0.015625, %v3998_v55 }
0x1f47   : > { %v4002_v58 = vadd.f32 1e-05, %v4000_v57 }
0x1f49   : > { %7702 = vrsqrt.f32 %v4002_v58 }
0x1f52   : > { %v7701_v16 = vpop.eup %7700 }
0x1f53   : > { %v4005_v59 = vmul.f32 %v7701_v16, %v3989_v29 }
0x1f55   : > { %v4007_v63 = vmul.f32 %v4005_v59, %v2510_v60 }
0x1f56   : > { %v7703_v61 = vpop.eup %7702 }
0x1f57   : > { %v4006_v62 = vmul.f32 %v7703_v61, %v3990_v33  ;;  %v4009_v5 = vadd.f32 %v4007_v63, %v2511_v2  ;;  %v7532_v61 = vld [vmem:[#allocation4 + $0x2b0] ss:$8 sps:$4 sm:$0xff]   ;;  %v7535_v63 = vld [vmem:[#allocation4 + $0x2a0] ss:$8 sps:$4 sm:$0xff]  }
0x1f59   : > { %v4008_v4 = vmul.f32 %v4006_v62, %v2510_v60  ;;  %v7534_v60 = vld [vmem:[#allocation4 + $0x2b4] ss:$8 sps:$4 sm:$0xff]   ;;  %v7537_v62 = vld [vmem:[#allocation4 + $0x2a4] ss:$8 sps:$4 sm:$0xff]  }
0x1f5a   : > { %4443 = vmatprep.subr.bf16.mxu1 %v7534_v60 }
0x1f5b   : > { %v4010_v6 = vadd.f32 %v4008_v4, %v2511_v2  ;;  %v7540_v2 = vld [vmem:[#allocation4 + $0x294] ss:$8 sps:$4 sm:$0xff]   ;;  %v7538_v4 = vld [vmem:[#allocation4 + $0x290] ss:$8 sps:$4 sm:$0xff]  }
0x1f5d   : > { %v4011_v22 = vpack.c.bf16 %v4010_v6, %v4009_v5 }
0x1f5f   : > { %6501 = vmatmul.mubr.msk.bf16.vlgmr.msra.gmra.mxu1 %vm554_vm3, %v4011_v22 }
0x1f60   : > { %4467 = vmatprep.mubr.bf16.mxu1 %v7866_v13  ;;  %4444 = vmatpush1.bf16.msra.mxu1 %v7532_v61 }
0x1f61   : > { %4445 = vmatprep.subr.bf16.mxu1 %v7537_v62 }
0x1f64   : > { %4446 = vmatpush1.bf16.msra.mxu1 %v7535_v63 }
0x1f65   : > { %4447 = vmatprep.subr.bf16.mxu1 %v7540_v2 }
0x1f68   : > { %4448 = vmatpush1.bf16.msra.mxu1 %v7538_v4 }
0x201f   : > { %v4100_v18 = vpop.f32.mrf.mxu1 }
0x2020   : > { %v4101_v31 = vadd.f32 %v4100_v18, %v4016_v25  ;;  %v2515_v18 = vld [vmem:[%s8926_s8 + $0x13] ss:$0 sm:$0xff] }
0x2021   : > { %v4102_v26 = vpop.f32.mrf.mxu1 }
0x2022   : > { %v4103_v29 = vadd.f32 %v4102_v26, %v4020_v19  ;;  %v4109_v38 = vmax.f32 %v4101_v31, 0.0 }
0x2023   : > { %v4104_v27 = vpop.f32.mrf.mxu1 }
0x2024   : > { %v4105_v30 = vadd.f32 %v4104_v27, %v4016_v25  ;;  %v4110_v35 = vmax.f32 %v4103_v29, 0.0  ;;  %v2516_v27 = vld [vmem:[%s8926_s8 + $0x14] ss:$0 sm:$0xff] }
0x2025   : > { %v4106_v32 = vpop.f32.mrf.mxu1 }
0x2026   : > { %v4107_v33 = vadd.f32 %v4106_v32, %v4020_v19  ;;  %v4111_v21 = vmax.f32 %v4105_v30, 0.0 }
0x2028   : > { %v4112_v37 = vmax.f32 %v4107_v33, 0.0  ;;  %v4113_v8 = vpack.c.bf16 %v4111_v21, %v4109_v38  ;;  %v6518_v33 = vld [vmem:[%s8926_s8 + $0x20] ss:$8 sm:$0x3] }
0x202a   : > { %v4114_v39 = vpack.c.bf16 %v4112_v37, %v4110_v35  ;;  %v4385_v35 = vrot.slane %v6518_v33, %v8011_v23 }
0x202c   : > { %4243 = vmatprep.mubr.bf16.mxu0 %v4114_v39 }
0x202d   : > { %4244 = vmatmul.mubr.bf16.vlgmr.msra.gmra.mxu0 %v4113_v8 }
0x202e   : > { %7144 = vmatprep.mubr.msk.bf16.mxu0 %vm7865_vm0, %v7864_v0 }
0x20ed   : > { %v6769_v20 = vpop.f32.mrf.mxu0 }
0x20ef   : > { %v6770_v36 = vpop.f32.mrf.mxu0 }
0x20f0   : > { %v6771_v42 = vadd.f32 %v6770_v36, %v6769_v20 }
0x20f1   : > { %v6772_v24 = vpop.f32.mrf.mxu0 }
0x20f2   : > { %v4246_v41 = vadd.f32 %v6771_v42, %v2514_v40 }
0x20f3   : > { %v6773_v49 = vpop.f32.mrf.mxu0 }
0x20f4   : > { %v6774_v28 = vadd.f32 %v6773_v49, %v6772_v24  ;;  %v4252_v43 = vadd.f32 %v4246_v41, %v4009_v5  ;;  %v7543_v5 = vld [vmem:[#allocation4 + $0x284] ss:$8 sps:$4 sm:$0xff]   ;;  %v4389_v41 = vrot.slane %v6518_v33, %v8025_v34 }
0x20f5   : > { %4449 = vmatprep.subr.bf16.mxu1 %v7543_v5 }
0x20f6   : > { %v4249_v44 = vadd.f32 %v6774_v28, %v2514_v40  ;;  %v4254_v45 = vsel %vm554_vm3, %v4252_v43, 0.0 }
0x20f7   : > { %4255 = vadd.xlane.f32.xlu1 %v4254_v45 }
0x20f8   : > { %v4253_v46 = vadd.f32 %v4249_v44, %v4010_v6  ;;  %v7541_v6 = vld [vmem:[#allocation4 + $0x280] ss:$8 sps:$4 sm:$0xff]  }
0x20f9   : > { %4450 = vmatpush1.bf16.msra.mxu1 %v7541_v6 }
0x20fa   : > { %v4257_v48 = vsel %vm3220_vm12, %v4253_v46, 0.0  ;;  %7130 = vmatprep.subr.bf16.mxu1 %v7864_v0 }
0x20fb   : > { %4258 = vadd.xlane.f32.xlu0 %v4257_v48 }
0x2180   : > { %v4256_v50 = vpop.xlane.xlu1 %4255 }
0x2181   : > { %v4260_v51 = vmul.f32 0.015625, %v4256_v50 }
0x2183   : > { %v4262_v52 = vsub.f32 %v4252_v43, %v4260_v51 }
0x2184   : > { %v4259_v53 = vpop.xlane.xlu0 %4258 }
0x2185   : > { %v4261_v54 = vmul.f32 0.015625, %v4259_v53  ;;  %v4264_v55 = vmul.f32 %v4262_v52, %v4262_v52 }
0x2187   : > { %v4263_v57 = vsub.f32 %v4253_v46, %v4261_v54  ;;  %v4266_v58 = vsel %vm554_vm3, %v4264_v55, 0.0 }
0x2188   : > { %4267 = vadd.xlane.f32.xlu1 %v4266_v58 }
0x2189   : > { %v4265_v16 = vmul.f32 %v4263_v57, %v4263_v57 }
0x218b   : > { %v4269_v59 = vsel %vm3220_vm12, %v4265_v16, 0.0 }
0x218c   : > { %4270 = vadd.xlane.f32.xlu0 %v4269_v59 }
0x2211   : > { %v4268_v22 = vpop.xlane.xlu1 %4267 }
0x2212   : > { %v4272_v9 = vmul.f32 0.015625, %v4268_v22 }
0x2214   : > { %v4274_v10 = vadd.f32 1e-05, %v4272_v9 }
0x2215   : > { %v4271_v12 = vpop.xlane.xlu0 %4270 }
0x2216   : > { %7704 = vrsqrt.f32 %v4274_v10  ;;  %v4273_v56 = vmul.f32 0.015625, %v4271_v12 }
0x2218   : > { %v4275_v14 = vadd.f32 1e-05, %v4273_v56 }
0x221a   : > { %7706 = vrsqrt.f32 %v4275_v14 }
0x2223   : > { %v7705_v15 = vpop.eup %7704 }
0x2224   : > { %v4278_v17 = vmul.f32 %v7705_v15, %v4262_v52 }
0x2226   : > { %v4280_v26 = vmul.f32 %v4278_v17, %v2515_v18 }
0x2227   : > { %v7707_v19 = vpop.eup %7706 }
0x2228   : > { %v4279_v25 = vmul.f32 %v7707_v19, %v4263_v57  ;;  %v8592_v30 = vadd.f32 %v4280_v26, %v2516_v27 }
0x222a   : > { %v4281_v29 = vmul.f32 %v4279_v25, %v2515_v18 }
0x222c   : > { %v8594_v31 = vadd.f32 %v4281_v29, %v2516_v27 }
0x222e   : > { %v4380_v32 = vpack.c.bf16 %v8594_v31, %v8592_v30 }
0x2230   : > { %6539 = vmatmul.mubr.msk.bf16.vlgmr.msra.gmra.mxu1 %vm554_vm3, %v4380_v32 }
0x2231   : > { %7132 = vmatprep.mubr.msk.bf16.mxu1 %vm7865_vm0, %v7864_v0 }
0x22f0   : > { %v4469_v21 = vpop.f32.mrf.mxu1 }
0x22f1   : > { %v4470_v39 = vadd.f32 %v4469_v21, %v4385_v35 }
0x22f2   : > { %v4471_v37 = vpop.f32.mrf.mxu1 }
0x22f3   : > { %v4478_v36 = vmul.f32 0.25, %v4470_v39  ;;  %v4472_v46 = vadd.f32 %v4471_v37, %v4389_v41 }
0x22f4   : > { %v4473_v38 = vpop.f32.mrf.mxu1 }
0x22f5   : > { %v4474_v8 = vadd.f32 %v4473_v38, %v4385_v35 }
0x22f6   : > { %v4475_v24 = vpop.f32.mrf.mxu1 }
0x22f7   : > { %v4479_v20 = vmul.f32 0.25, %v4474_v8  ;;  %v4481_v40 = vpack.c.bf16 %v4474_v8, %v4470_v39  ;;  %v4476_v49 = vadd.f32 %v4475_v24, %v4389_v41 }
0x22f9   : > { %4606 = vrot.lane.b32.xlu0 %v4481_v40, %s7869_s18  ;;  %4484 = vrot.lane.b32.xlu1 %v4481_v40, %s7867_s16  ;;  %v4480_v42 = vpack.c.bf16 %v4479_v20, %v4478_v36  ;;  %v8617_v48 = vpack.c.bf16 %v4476_v49, %v4472_v46 }
0x22fb   : > { %v4560_v52 = vand.u32 %v8617_v48, %v8278_v47 }
0x22fd   : > { %4728 = vrot.lane.b32.xlu0 %v4480_v42, %s7871_s20  ;;  %4604 = vrot.lane.b32.xlu1 %v4480_v42, %s7868_s17 }
0x2301   : > { %4851 = vrot.lane.b32.xlu0 %v4480_v42, %s7873_s22  ;;  %4730 = vrot.lane.b32.xlu1 %v4481_v40, %s7870_s19 }
0x2305   : > { %4853 = vrot.lane.b32.xlu1 %v4481_v40, %s7872_s21 }
0x236b   : > { %v4607_v28 = vpop.permute.xlu0 %4606  ;;  %v4485_v43 = vpop.permute.xlu1 %4484 }
0x236c   : > { %v4612_v44 = vsel %vm606_vm4, %v4607_v28, 0  ;;  %v4490_v45 = vsel %vm606_vm4, %v4485_v43, 0 }
0x236d   : > { %7131 = vmatpush3.bf16.xpose.msra.mxu1 %v4490_v45  ;;  %7143 = vmatpush3.bf16.xpose.msra.mxu0 %v4612_v44 }
0x236e   : > { %7136 = vmatprep.subr.bf16.mxu1 %v7864_v0  ;;  %7154 = vmatprep.subr.bf16.mxu0 %v7864_v0 }
0x236f   : > { %v4605_v50 = vpop.permute.xlu1 %4604  ;;  %v4729_v55 = vpop.permute.xlu0 %4728 }
0x2373   : > { %v4731_v51 = vpop.permute.xlu1 %4730  ;;  %v4852_v58 = vpop.permute.xlu0 %4851 }
0x2374   : > { %v4736_v53 = vsel %vm606_vm4, %v4731_v51, 0  ;;  %7133 = vmatmul.mubr.msk.bf16.vlgmr.msra.gmra.mxu1 %vm606_vm4, %v4480_v42  ;;  %7145 = vmatmul.mubr.msk.bf16.vlgmr.msra.gmra.mxu0 %vm606_vm4, %v4605_v50 }
0x2375   : > { %7137 = vmatpush3.bf16.msra.mxu1 %v4560_v52  ;;  %7155 = vmatpush3.bf16.xpose.msra.mxu0 %v4736_v53 }
0x2376   : > { %7156 = vmatprep.mubr.msk.bf16.mxu0 %vm7865_vm0, %v7864_v0  ;;  %7166 = vmatprep.subr.bf16.mxu0 %v7864_v0 }
0x2377   : > { %7138 = vmatprep.mubr.msk.bf16.mxu1 %vm7865_vm0, %v7864_v0  ;;  %7148 = vmatprep.subr.bf16.mxu1 %v7864_v0  ;;  %v4854_v54 = vpop.permute.xlu1 %4853 }
0x2378   : > { %v4859_v57 = vsel %vm606_vm4, %v4854_v54, 0 }
0x237c   : > { %7157 = vmatmul.mubr.msk.bf16.vlgmr.msra.gmra.mxu0 %vm606_vm4, %v4729_v55 }
0x237d   : > { %7167 = vmatpush3.bf16.xpose.msra.mxu0 %v4859_v57  ;;  %7168 = vmatprep.mubr.msk.bf16.mxu0 %vm7865_vm0, %v7864_v0 }
0x237e   : > { %7178 = vmatprep.subr.bf16.mxu0 %v7864_v0 }
0x2384   : > { %7169 = vmatmul.mubr.msk.bf16.vlgmr.msra.gmra.mxu0 %vm606_vm4, %v4852_v58 }
0x2385   : > { %7186 = vmatprep.mubr.msk.bf16.mxu0 %vm7865_vm0, %v7864_v0 }
0x2434   : > { %v4526_v16 = vpop.f32.mrf.mxu1  ;;  %v4648_v59 = vpop.f32.mrf.mxu0 }
0x2435   : > { %v4527_v60 = vadd.f32 %v4526_v16, %v8319_v3  ;;  %v4649_v10 = vadd.f32 %v4648_v59, %v8319_v3 }
0x2436   : > { %v7134_v61 = vpop.f32.mrf.mxu1  ;;  %v7146_v62 = vpop.f32.mrf.mxu0 }
0x2437   : > { %v4533_v63 = vsel %vm2670_vm10, %v4527_v60, -inf  ;;  %v4655_v18 = vsel %vm2670_vm10, %v4649_v10, -inf }
0x2438   : > { %v4651_v2 = vpop.f32.mrf.mxu0  ;;  %4534 = vmax.xlane.f32.xlu1 %v4533_v63  ;;  %v4529_v4 = vpop.f32.mrf.mxu1 }
0x2439   : > { %v4652_v5 = vadd.f32 %v4651_v2, %v8324_v7  ;;  %v4530_v6 = vadd.f32 %v4529_v4, %v8324_v7 }
0x243a   : > { %v7135_v22 = vpop.f32.mrf.mxu1  ;;  %v7147_v9 = vpop.f32.mrf.mxu0 }
0x243b   : > { %v4658_v12 = vsel %vm2674_vm11, %v4652_v5, -inf  ;;  %v4536_v56 = vsel %vm2674_vm11, %v4530_v6, -inf }
0x243c   : > { %v4772_v14 = vpop.f32.mrf.mxu0  ;;  %4659 = vmax.xlane.f32.xlu1 %v4658_v12  ;;  %4537 = vmax.xlane.f32.xlu0 %v4536_v56 }
0x243d   : > { %v4773_v17 = vadd.f32 %v4772_v14, %v8319_v3 }
0x243e   : > { %v7158_v15 = vpop.f32.mrf.mxu0 }
0x243f   : > { %v4779_v29 = vsel %vm2670_vm10, %v4773_v17, -inf }
0x2440   : > { %v4775_v19 = vpop.f32.mrf.mxu0  ;;  %4656 = vmax.xlane.f32.xlu0 %v4655_v18 }
0x2441   : > { %v4776_v25 = vadd.f32 %v4775_v19, %v8324_v7 }
0x2442   : > { %v7159_v26 = vpop.f32.mrf.mxu0 }
0x2443   : > { %v4782_v27 = vsel %vm2674_vm11, %v4776_v25, -inf }
0x2444   : > { %v4895_v32 = vpop.f32.mrf.mxu0  ;;  %4783 = vmax.xlane.f32.xlu1 %v4782_v27  ;;  %4780 = vmax.xlane.f32.xlu0 %v4779_v29 }
0x2445   : > { %v4896_v33 = vadd.f32 %v4895_v32, %v8319_v3 }
0x2446   : > { %v7170_v21 = vpop.f32.mrf.mxu0 }
0x2447   : > { %v4902_v35 = vsel %vm2670_vm10, %v4896_v33, -inf }
0x2448   : > { %v4898_v37 = vpop.f32.mrf.mxu0  ;;  %4903 = vmax.xlane.f32.xlu0 %v4902_v35 }
0x2449   : > { %v4899_v38 = vadd.f32 %v4898_v37, %v8324_v7 }
0x244a   : > { %v7171_v39 = vpop.f32.mrf.mxu0 }
0x244b   : > { %v4905_v8 = vsel %vm2674_vm11, %v4899_v38, -inf }
0x244c   : > { %4906 = vmax.xlane.f32.xlu1 %v4905_v8 }
0x24c1   : > { %v4535_v20 = vpop.xlane.xlu1 %4534 }
0x24c2   : > { %v4539_v40 = vsub.f32 %v4527_v60, %v4535_v20 }
0x24c4   : > { %v4541_v36 = vmul.f32 1.442695, %v4539_v40 }
0x24c5   : > { %v4660_v42 = vpop.xlane.xlu1 %4659  ;;  %v4538_v24 = vpop.xlane.xlu0 %4537 }
0x24c6   : > { %7708 = vpow2.f32 %v4541_v36  ;;  %v4662_v41 = vsub.f32 %v4652_v5, %v4660_v42  ;;  %v4540_v49 = vsub.f32 %v4530_v6, %v4538_v24 }
0x24c8   : > { %v4543_v3 = vmul.f32 1.442695, %v4540_v49  ;;  %v4665_v28 = vmul.f32 1.442695, %v4662_v41 }
0x24c9   : > { %v4657_v43 = vpop.xlane.xlu0 %4656 }
0x24ca   : > { %v4661_v44 = vsub.f32 %v4649_v10, %v4657_v43  ;;  %7710 = vpow2.f32 %v4543_v3 }
0x24cb   : > { %7712 = vpow2.f32 %v4665_v28 }
0x24cc   : > { %v4663_v45 = vmul.f32 1.442695, %v4661_v44 }
0x24cd   : > { %v4784_v7 = vpop.xlane.xlu1 %4783  ;;  %v4781_v46 = vpop.xlane.xlu0 %4780 }
0x24ce   : > { %7714 = vpow2.f32 %v4663_v45  ;;  %v4786_v50 = vsub.f32 %v4776_v25, %v4784_v7  ;;  %v4785_v51 = vsub.f32 %v4773_v17, %v4781_v46 }
0x24d0   : > { %v4789_v52 = vmul.f32 1.442695, %v4786_v50  ;;  %v4787_v53 = vmul.f32 1.442695, %v4785_v51 }
0x24d1   : > { %v4904_v54 = vpop.xlane.xlu0 %4903 }
0x24d2   : > { %7716 = vpow2.f32 %v4789_v52  ;;  %v4908_v55 = vsub.f32 %v4896_v33, %v4904_v54 }
0x24d3   : > { %v7709_v57 = vpop.eup %7708  ;;  %7718 = vpow2.f32 %v4787_v53 }
0x24d4   : > { %v4910_v58 = vmul.f32 1.442695, %v4908_v55  ;;  %v4545_v16 = vsel %vm2670_vm10, %v7709_v57, 0.0 }
0x24d5   : > { %4546 = vadd.xlane.f32.xlu0 %v4545_v16  ;;  %v4907_v12 = vpop.xlane.xlu1 %4906 }
0x24d6   : > { %7720 = vpow2.f32 %v4910_v58  ;;  %v4909_v56 = vsub.f32 %v4899_v38, %v4907_v12  ;;  %v7547_v12 = vld [vmem:[#allocation4 + $0x2c0] ss:$8 sps:$4 sm:$0xff]  }
0x24d7   : > { %v7711_v59 = vpop.eup %7710 }
0x24d8   : > { %v4548_v60 = vsel %vm2674_vm11, %v7711_v59, 0.0  ;;  %v7713_v61 = vpop.eup %7712  ;;  %v4912_v14 = vmul.f32 1.442695, %v4909_v56 }
0x24d9   : > { %4549 = vadd.xlane.f32.xlu1 %v4548_v60  ;;  %v4670_v2 = vsel %vm2674_vm11, %v7713_v61, 0.0 }
0x24da   : > { %7722 = vpow2.f32 %v4912_v14 }
0x24db   : > { %v7715_v62 = vpop.eup %7714 }
0x24dc   : > { %v4667_v63 = vsel %vm2670_vm10, %v7715_v62, 0.0 }
0x24dd   : > { %4668 = vadd.xlane.f32.xlu0 %v4667_v63  ;;  %4671 = vadd.xlane.f32.xlu1 %v4670_v2  ;;  %v7545_v2 = vld [vmem:[#allocation4 + $0x2e0] ss:$8 sps:$4 sm:$0xff]  }
0x24df   : > { %v7717_v4 = vpop.eup %7716 }
0x24e0   : > { %v7719_v5 = vpop.eup %7718  ;;  %v4794_v6 = vsel %vm2674_vm11, %v7717_v4, 0.0 }
0x24e1   : > { %v4791_v22 = vsel %vm2670_vm10, %v7719_v5, 0.0  ;;  %4795 = vadd.xlane.f32.xlu1 %v4794_v6  ;;  %v7546_v6 = vld [vmem:[#allocation4 + $0x2d0] ss:$8 sps:$4 sm:$0xff]  }
0x24e2   : > { %4792 = vadd.xlane.f32.xlu0 %v4791_v22 }
0x24e3   : > { %v8660_v9 = vpop.eup %7720 }
0x24e4   : > { %v4914_v10 = vsel %vm2670_vm10, %v8660_v9, 0.0 }
0x24e6   : > { %4915 = vadd.xlane.f32.xlu0 %v4914_v10 }
0x24e7   : > { %v7723_v15 = vpop.eup %7722 }
0x24e8   : > { %v4917_v17 = vsel %vm2674_vm11, %v7723_v15, 0.0 }
0x24f2   : > { %4802 = vrot.lane.b32.xlu1 %v8617_v48, %s7871_s20 }
0x24fc   : > { %4679 = vrot.lane.b32.xlu0 %v8617_v48, %s7868_s17 }
0x2516   : > { %4918 = vadd.xlane.f32.xlu1 %v4917_v17 }
0x2527   : > { %4925 = vrot.lane.b32.xlu1 %v8617_v48, %s7873_s22 }
0x255e   : > { %v4547_v18 = vpop.xlane.xlu0 %4546 }
0x255f   : > { %7724 = vrcp.f32 %v4547_v18 }
0x2562   : > { %v4550_v19 = vpop.xlane.xlu1 %4549 }
0x2563   : > { %7726 = vrcp.f32 %v4550_v19 }
0x2566   : > { %v4669_v25 = vpop.xlane.xlu0 %4668  ;;  %v4672_v26 = vpop.xlane.xlu1 %4671 }
0x2567   : > { %7728 = vrcp.f32 %v4669_v25 }
0x2568   : > { %7730 = vrcp.f32 %v4672_v26 }
0x256a   : > { %v4796_v29 = vpop.xlane.xlu1 %4795 }
0x256b   : > { %v4793_v27 = vpop.xlane.xlu0 %4792  ;;  %7732 = vrcp.f32 %v4796_v29 }
0x256c   : > { %v7725_v32 = vpop.eup %7724  ;;  %7734 = vrcp.f32 %v4793_v27 }
0x256d   : > { %v4553_v35 = vmul.f32 %v7725_v32, %v7709_v57 }
0x256e   : > { %v4803_v42 = vpop.permute.xlu1 %4802 }
0x256f   : > { %v4916_v33 = vpop.xlane.xlu0 %4915  ;;  %v4808_v3 = vand.u32 %v4803_v42, %v8278_v47  ;;  %v7549_v42 = vld [vmem:[#allocation4 + $0x360] ss:$8 sps:$4 sm:$0xff]  }
0x2570   : > { %v7727_v21 = vpop.eup %7726  ;;  %7736 = vrcp.f32 %v4916_v33 }
0x2571   : > { %v4554_v37 = vmul.f32 %v7727_v21, %v7711_v59 }
0x2573   : > { %v4680_v38 = vpop.permute.xlu0 %4679  ;;  %v4555_v8 = vpack.c.bf16 %v4554_v37, %v4553_v35 }
0x2574   : > { %v7729_v39 = vpop.eup %7728  ;;  %v4685_v48 = vand.u32 %v4680_v38, %v8278_v47 }
0x2575   : > { %v7731_v20 = vpop.eup %7730  ;;  %7139 = vmatmul.mubr.msk.bf16.vlgmr.msra.gmra.mxu1 %vm2670_vm10, %v4555_v8  ;;  %v4675_v40 = vmul.f32 %v7729_v39, %v7715_v62 }
0x2576   : > { %7149 = vmatpush3.bf16.msra.mxu1 %v4685_v48  ;;  %7150 = vmatprep.mubr.msk.bf16.mxu1 %vm7865_vm0, %v7864_v0  ;;  %v4676_v36 = vmul.f32 %v7731_v20, %v7713_v61  ;;  %v7544_v61 = vld [vmem:[#allocation4 + $0x2f0] ss:$8 sps:$4 sm:$0xff]  }
0x2577   : > { %7160 = vmatprep.subr.bf16.mxu1 %v7864_v0  ;;  %7179 = vmatpush3.bf16.msra.mxu0 %v7544_v61 }
0x2578   : > { %v7733_v24 = vpop.eup %7732  ;;  %v4677_v41 = vpack.c.bf16 %v4676_v36, %v4675_v40  ;;  %7180 = vmatprep.subr.bf16.mxu0 %v7864_v0  ;;  %v7548_v40 = vld [vmem:[#allocation4 + $0x370] ss:$8 sps:$4 sm:$0xff]  }
0x2579   : > { %v7735_v49 = vpop.eup %7734  ;;  %v4800_v43 = vmul.f32 %v7733_v24, %v7717_v4  ;;  %v7550_v24 = vld [vmem:[#allocation4 + $0x350] ss:$8 sps:$4 sm:$0xff]  }
0x257a   : > { %v4799_v28 = vmul.f32 %v7735_v49, %v7719_v5  ;;  %v6519_v49 = vld [vmem:[%s8926_s8 + $0x21] ss:$0 sm:$0xff] }
0x257b   : > { %7181 = vmatpush3.bf16.msra.mxu0 %v7545_v2 }
0x257c   : > { %v4801_v44 = vpack.c.bf16 %v4800_v43, %v4799_v28  ;;  %7182 = vmatprep.subr.bf16.mxu0 %v7864_v0 }
0x257d   : > { %7151 = vmatmul.mubr.msk.bf16.vlgmr.msra.gmra.mxu1 %vm2670_vm10, %v4677_v41  ;;  %v7737_v50 = vpop.eup %7736  ;;  %v7551_v41 = vld [vmem:[#allocation4 + $0x340] ss:$8 sps:$4 sm:$0xff]  }
0x257e   : > { %7161 = vmatpush3.bf16.msra.mxu1 %v4808_v3  ;;  %7162 = vmatprep.mubr.msk.bf16.mxu1 %vm7865_vm0, %v7864_v0  ;;  %v4922_v52 = vmul.f32 %v7737_v50, %v8660_v9 }
0x257f   : > { %7172 = vmatprep.subr.bf16.mxu1 %v7864_v0  ;;  %7183 = vmatpush3.bf16.msra.mxu0 %v7546_v6  ;;  %v7553_v6 = vld [vmem:[#allocation4 + $0x320] ss:$8 sps:$4 sm:$0xff]  }
0x2580   : > { %7184 = vmatprep.subr.bf16.mxu0 %v7864_v0 }
0x2583   : > { %7185 = vmatpush3.bf16.msra.mxu0 %v7547_v12 }
0x2584   : > { %7202 = vmatprep.subr.bf16.mxu0 %v7864_v0 }
0x2585   : > { %7163 = vmatmul.mubr.msk.bf16.vlgmr.msra.gmra.mxu1 %vm2670_vm10, %v4801_v44 }
0x2586   : > { %7174 = vmatprep.mubr.msk.bf16.mxu1 %vm7865_vm0, %v7864_v0 }
0x259f   : > { %v4919_v45 = vpop.xlane.xlu1 %4918 }
0x25a0   : > { %7738 = vrcp.f32 %v4919_v45 }
0x25a3   : > { %v4926_v7 = vpop.permute.xlu1 %4925 }
0x25a4   : > { %v4931_v46 = vand.u32 %v4926_v7, %v8278_v47 }
0x25a6   : > { %7173 = vmatpush3.bf16.msra.mxu1 %v4931_v46 }
0x25a7   : > { %7190 = vmatprep.subr.bf16.mxu1 %v7864_v0 }
0x25ad   : > { %v7739_v51 = vpop.eup %7738 }
0x25ae   : > { %v4923_v53 = vmul.f32 %v7739_v51, %v7723_v15 }
0x25b0   : > { %v4924_v54 = vpack.c.bf16 %v4923_v53, %v4922_v52 }
0x25b2   : > { %7175 = vmatmul.mubr.msk.bf16.vlgmr.msra.gmra.mxu1 %vm2670_vm10, %v4924_v54 }
0x25b3   : > { %7198 = vmatprep.mubr.msk.bf16.mxu1 %vm7865_vm0, %v7864_v0 }
0x2635   : > { %v4596_v55 = vpop.f32.mrf.mxu1 }
0x2637   : > { %v7140_v57 = vpop.f32.mrf.mxu1 }
0x2639   : > { %v4599_v58 = vpop.f32.mrf.mxu1 }
0x263b   : > { %v7141_v16 = vpop.f32.mrf.mxu1 }
0x263d   : > { %v4721_v59 = vpop.f32.mrf.mxu1 }
0x263f   : > { %v7152_v47 = vpop.f32.mrf.mxu1 }
0x2641   : > { %v4724_v60 = vpop.f32.mrf.mxu1 }
0x2642   : > { %v7358_v62 = vpack.i.bf16 %v4724_v60, %v4721_v59 }
0x2643   : > { %v7153_v63 = vpop.f32.mrf.mxu1 }
0x2644   : > { %7359 = vrot.lane.b32.xlu0 %v7358_v62, %s7872_s21  ;;  %v6523_v63 = vld [vmem:[%s8926_s8 + $0x25] ss:$0 sm:$0xff] }
0x2645   : > { %v4844_v4 = vpop.f32.mrf.mxu1 }
0x2647   : > { %v7164_v5 = vpop.f32.mrf.mxu1 }
0x2648   : > { %v7552_v5 = vld [vmem:[#allocation4 + $0x330] ss:$8 sps:$4 sm:$0xff]  }
0x2649   : > { %v4847_v22 = vpop.f32.mrf.mxu1  ;;  %7191 = vmatpush3.bf16.msra.mxu1 %v7552_v5 }
0x264a   : > { %v7363_v9 = vpack.i.bf16 %v4847_v22, %v4844_v4  ;;  %7192 = vmatprep.subr.bf16.mxu1 %v7864_v0  ;;  %v7554_v22 = vld [vmem:[#allocation4 + $0x310] ss:$8 sps:$4 sm:$0xff]  }
0x264b   : > { %v7165_v10 = vpop.f32.mrf.mxu1 }
0x264c   : > { %7364 = vrot.lane.b32.xlu1 %v7363_v9, %s7870_s19  ;;  %v7555_v9 = vld [vmem:[#allocation4 + $0x300] ss:$8 sps:$4 sm:$0xff]  }
0x264d   : > { %7193 = vmatpush3.bf16.msra.mxu1 %v7553_v6 }
0x264e   : > { %7194 = vmatprep.subr.bf16.mxu1 %v7864_v0 }
0x2651   : > { %7195 = vmatpush3.bf16.msra.mxu1 %v7554_v22 }
0x2652   : > { %7196 = vmatprep.subr.bf16.mxu1 %v7864_v0 }
0x2655   : > { %7197 = vmatpush3.bf16.msra.mxu1 %v7555_v9 }
0x2656   : > { %7214 = vmatprep.subr.bf16.mxu1 %v7864_v0 }
0x2672   : > { %v4967_v56 = vpop.f32.mrf.mxu1 }
0x2674   : > { %v7176_v14 = vpop.f32.mrf.mxu1 }
0x2676   : > { %v4970_v15 = vpop.f32.mrf.mxu1 }
0x2677   : > { %v7368_v17 = vpack.i.bf16 %v4970_v15, %v4967_v56 }
0x2678   : > { %v7177_v18 = vpop.f32.mrf.mxu1 }
0x2679   : > { %7369 = vrot.lane.b32.xlu0 %v7368_v17, %s7869_s18 }
0x26b6   : > { %v7360_v19 = vpop.permute.xlu0 %7359 }
0x26b7   : > { %v7362_v26 = vunpack.i.h.bf16 %v7360_v19  ;;  %v7361_v27 = vunpack.i.l.bf16 %v7360_v19 }
0x26b9   : > { %v4999_v21 = vsel %vm606_vm4, %v4599_v58, %v7362_v26  ;;  %v4998_v35 = vsel %vm606_vm4, %v4596_v55, %v7361_v27  ;;  %v6520_v27 = vld [vmem:[%s8926_s8 + $0x22] ss:$0 sm:$0xff] }
0x26be   : > { %v7365_v25 = vpop.permute.xlu1 %7364 }
0x26bf   : > { %v7367_v29 = vunpack.i.h.bf16 %v7365_v25  ;;  %v7366_v32 = vunpack.i.l.bf16 %v7365_v25 }
0x26c1   : > { %v5001_v39 = vsel %vm1056_vm5, %v4999_v21, %v7367_v29  ;;  %v5000_v48 = vsel %vm1056_vm5, %v4998_v35, %v7366_v32  ;;  %v6521_v21 = vld [vmem:[%s8926_s8 + $0x23] ss:$0 sm:$0xff] }
0x26eb   : > { %v7370_v33 = vpop.permute.xlu0 %7369 }
0x26ec   : > { %v7372_v37 = vunpack.i.h.bf16 %v7370_v33  ;;  %v7371_v38 = vunpack.i.l.bf16 %v7370_v33 }
0x26ee   : > { %v5003_v8 = vsel %vm1058_vm6, %v5001_v39, %v7372_v37  ;;  %v5002_v20 = vsel %vm1058_vm6, %v5000_v48, %v7371_v38 }
0x26ef   : > { %v5004_v36 = vpack.c.bf16 %v5003_v8, %v5002_v20  ;;  %v6522_v8 = vld [vmem:[%s8926_s8 + $0x24] ss:$0 sm:$0xff] }
0x26f1   : > { %7187 = vmatmul.mubr.msk.bf16.vlgmr.msra.gmra.mxu0 %vm554_vm3, %v5004_v36 }
0x26f2   : > { %7203 = vmatpush3.bf16.msra.mxu0 %v7548_v40  ;;  %7210 = vmatprep.mubr.msk.bf16.mxu0 %vm7865_vm0, %v7864_v0 }
0x26f3   : > { %7204 = vmatprep.subr.bf16.mxu0 %v7864_v0 }
0x26f6   : > { %7205 = vmatpush3.bf16.msra.mxu0 %v7549_v42 }
0x26f7   : > { %7206 = vmatprep.subr.bf16.mxu0 %v7864_v0 }
0x26fa   : > { %7207 = vmatpush3.bf16.msra.mxu0 %v7550_v24 }
0x26fb   : > { %7208 = vmatprep.subr.bf16.mxu0 %v7864_v0 }
0x26fe   : > { %7209 = vmatpush3.bf16.msra.mxu0 %v7551_v41 }
0x26ff   : > { %7226 = vmatprep.subr.bf16.mxu0 %v7864_v0 }
0x2701   : > { %7211 = vmatmul.mubr.msk.bf16.vlgmr.msra.gmra.mxu0 %vm554_vm3, %v8410_v11 }
0x2702   : > { %7228 = vmatprep.mubr.msk.bf16.mxu0 %vm7865_vm0, %v7864_v0 }
0x27b1   : > { %v5066_v3 = vpop.f32.mrf.mxu0 }
0x27b2   : > { %v5067_v28 = vadd.f32 %v6519_v49, %v5066_v3 }
0x27b3   : > { %v7188_v43 = vpop.f32.mrf.mxu0 }
0x27b4   : > { %v5073_v44 = vadd.f32 %v5067_v28, %v8592_v30 }
0x27b5   : > { %v5069_v45 = vpop.f32.mrf.mxu0 }
0x27b6   : > { %v5070_v7 = vadd.f32 %v6519_v49, %v5069_v45  ;;  %v5075_v46 = vsel %vm554_vm3, %v5073_v44, 0.0 }
0x27b7   : > { %5076 = vadd.xlane.f32.xlu1 %v5075_v46  ;;  %v7189_v50 = vpop.f32.mrf.mxu0 }
0x27b8   : > { %v5074_v11 = vadd.f32 %v5070_v7, %v8594_v31 }
0x27ba   : > { %v5078_v51 = vsel %vm3220_vm12, %v5074_v11, 0.0 }
0x27bb   : > { %5079 = vadd.xlane.f32.xlu0 %v5078_v51 }
0x27c1   : > { %v5232_v52 = vpop.f32.mrf.mxu0 }
0x27c2   : > { %v5233_v2 = vadd.f32 %v6523_v63, %v5232_v52 }
0x27c3   : > { %v7212_v53 = vpop.f32.mrf.mxu0 }
0x27c4   : > { %v8726_v4 = vpack.c.bf16 %v5233_v2, %v5233_v2 }
0x27c5   : > { %v5235_v54 = vpop.f32.mrf.mxu0 }
0x27c6   : > { %v5246_v48 = vsel %vm606_vm4, %v8726_v4, 0 }
0x27c7   : > { %v7213_v55 = vpop.f32.mrf.mxu0 }
0x2840   : > { %v5077_v57 = vpop.xlane.xlu1 %5076 }
0x2841   : > { %v5081_v58 = vmul.f32 0.015625, %v5077_v57 }
0x2843   : > { %v5083_v16 = vsub.f32 %v5073_v44, %v5081_v58 }
0x2844   : > { %v5080_v59 = vpop.xlane.xlu0 %5079 }
0x2845   : > { %v5082_v30 = vmul.f32 0.015625, %v5080_v59  ;;  %v5085_v47 = vmul.f32 %v5083_v16, %v5083_v16 }
0x2847   : > { %v5084_v60 = vsub.f32 %v5074_v11, %v5082_v30  ;;  %v5087_v61 = vsel %vm554_vm3, %v5085_v47, 0.0 }
0x2848   : > { %5088 = vadd.xlane.f32.xlu0 %v5087_v61 }
0x2849   : > { %v5086_v62 = vmul.f32 %v5084_v60, %v5084_v60 }
0x284b   : > { %v5090_v31 = vsel %vm3220_vm12, %v5086_v62, 0.0 }
0x284c   : > { %5091 = vadd.xlane.f32.xlu1 %v5090_v31 }
0x285e   : > { %5365 = vrot.lane.b32.xlu0 %v8726_v4, %s7868_s17 }
0x28d1   : > { %v5089_v10 = vpop.xlane.xlu0 %5088 }
0x28d2   : > { %v5093_v12 = vmul.f32 0.015625, %v5089_v10 }
0x28d4   : > { %v5095_v56 = vadd.f32 1e-05, %v5093_v12 }
0x28d5   : > { %v5092_v14 = vpop.xlane.xlu1 %5091  ;;  %v5366_v15 = vpop.permute.xlu0 %5365 }
0x28d6   : > { %7740 = vrsqrt.f32 %v5095_v56  ;;  %v5094_v17 = vmul.f32 0.015625, %v5092_v14  ;;  %v5371_v18 = vsel %vm606_vm4, %v5366_v15, 0 }
0x28d7   : > { %7227 = vmatpush3.bf16.xpose.msra.mxu0 %v5371_v18 }
0x28d8   : > { %v5096_v19 = vadd.f32 1e-05, %v5094_v17  ;;  %7238 = vmatprep.subr.bf16.mxu0 %v7864_v0 }
0x28da   : > { %7742 = vrsqrt.f32 %v5096_v19 }
0x28e3   : > { %v7741_v25 = vpop.eup %7740 }
0x28e4   : > { %v5099_v26 = vmul.f32 %v7741_v25, %v5083_v16 }
0x28e6   : > { %v5101_v32 = vmul.f32 %v6520_v27, %v5099_v26 }
0x28e7   : > { %v7743_v29 = vpop.eup %7742 }
0x28e8   : > { %v5100_v33 = vmul.f32 %v7743_v29, %v5084_v60  ;;  %v8742_v37 = vadd.f32 %v6521_v21, %v5101_v32 }
0x28ea   : > { %v5102_v35 = vmul.f32 %v6520_v27, %v5100_v33 }
0x28ec   : > { %v8744_v38 = vadd.f32 %v6521_v21, %v5102_v35 }
0x28ee   : > { %v5105_v39 = vpack.c.bf16 %v8744_v38, %v8742_v37 }
0x28f0   : > { %7199 = vmatmul.mubr.msk.bf16.vlgmr.msra.gmra.mxu1 %vm554_vm3, %v5105_v39 }
0x28f1   : > { %7215 = vmatpush3.bf16.xpose.msra.mxu1 %v5246_v48  ;;  %7216 = vmatprep.mubr.msk.bf16.mxu1 %vm7865_vm0, %v7864_v0 }
0x28f2   : > { %7220 = vmatprep.subr.bf16.mxu1 %v7864_v0 }
0x29b0   : > { %v5167_v20 = vpop.f32.mrf.mxu1 }
0x29b1   : > { %v5168_v36 = vadd.f32 %v6522_v8, %v5167_v20 }
0x29b2   : > { %v7200_v40 = vpop.f32.mrf.mxu1 }
0x29b3   : > { %v5238_v49 = vmul.f32 0.25, %v5168_v36 }
0x29b4   : > { %v5170_v42 = vpop.f32.mrf.mxu1 }
0x29b5   : > { %v5171_v24 = vadd.f32 %v6522_v8, %v5170_v42 }
0x29b6   : > { %v7201_v41 = vpop.f32.mrf.mxu1 }
0x29b7   : > { %v5239_v3 = vmul.f32 0.25, %v5171_v24 }
0x29b9   : > { %v5240_v28 = vpack.c.bf16 %v5239_v3, %v5238_v49 }
0x29bb   : > { %5486 = vrot.lane.b32.xlu0 %v5240_v28, %s7871_s20  ;;  %5363 = vrot.lane.b32.xlu1 %v5240_v28, %s7868_s17 }
0x29bc   : > { %7217 = vmatmul.mubr.msk.bf16.vlgmr.msra.gmra.mxu1 %vm606_vm4, %v5240_v28 }
0x29bd   : > { %7222 = vmatprep.mubr.msk.bf16.mxu1 %vm7865_vm0, %v7864_v0 }
0x29bf   : > { %5609 = vrot.lane.b32.xlu0 %v5240_v28, %s7873_s22  ;;  %5488 = vrot.lane.b32.xlu1 %v8726_v4, %s7871_s20 }
0x29c3   : > { %5611 = vrot.lane.b32.xlu1 %v8726_v4, %s7873_s22 }
0x2a2d   : > { %v5364_v43 = vpop.permute.xlu1 %5363  ;;  %v5487_v46 = vpop.permute.xlu0 %5486 }
0x2a2e   : > { %7229 = vmatmul.mubr.msk.bf16.vlgmr.msra.gmra.mxu0 %vm606_vm4, %v5364_v43 }
0x2a2f   : > { %7240 = vmatprep.mubr.msk.bf16.mxu0 %vm7865_vm0, %v7864_v0 }
0x2a31   : > { %v5489_v44 = vpop.permute.xlu1 %5488  ;;  %v5610_v11 = vpop.permute.xlu0 %5609 }
0x2a32   : > { %v5494_v45 = vsel %vm606_vm4, %v5489_v44, 0 }
0x2a33   : > { %7239 = vmatpush3.bf16.xpose.msra.mxu0 %v5494_v45 }
0x2a34   : > { %7250 = vmatprep.subr.bf16.mxu0 %v7864_v0 }
0x2a35   : > { %v5612_v7 = vpop.permute.xlu1 %5611 }
0x2a36   : > { %v5617_v50 = vsel %vm606_vm4, %v5612_v7, 0 }
0x2a3a   : > { %7241 = vmatmul.mubr.msk.bf16.vlgmr.msra.gmra.mxu0 %vm606_vm4, %v5487_v46 }
0x2a3b   : > { %7251 = vmatpush3.bf16.xpose.msra.mxu0 %v5617_v50  ;;  %7252 = vmatprep.mubr.msk.bf16.mxu0 %vm7865_vm0, %v7864_v0 }
0x2a3c   : > { %7262 = vmatprep.subr.bf16.mxu0 %v7864_v0 }
0x2a42   : > { %7253 = vmatmul.mubr.msk.bf16.vlgmr.msra.gmra.mxu0 %vm606_vm4, %v5610_v11 }
0x2a43   : > { %7270 = vmatprep.mubr.msk.bf16.mxu0 %vm7865_vm0, %v7864_v0 }
0x2a7c   : > { %v5282_v51 = vpop.f32.mrf.mxu1 }
0x2a7d   : > { %v5289_v52 = vsel %vm389_vm2, %v5282_v51, -inf }
0x2a7e   : > { %5290 = vmax.xlane.f32.xlu1 %v5289_v52  ;;  %v7218_v53 = vpop.f32.mrf.mxu1 }
0x2a80   : > { %v5285_v54 = vpop.f32.mrf.mxu1 }
0x2a81   : > { %v5292_v55 = vsel %vm3439_vm13, %v5285_v54, -inf }
0x2a82   : > { %5293 = vmax.xlane.f32.xlu0 %v5292_v55  ;;  %v7219_v57 = vpop.f32.mrf.mxu1 }
0x2aee   : > { %v5407_v58 = vpop.f32.mrf.mxu0 }
0x2aef   : > { %v5414_v16 = vsel %vm389_vm2, %v5407_v58, -inf }
0x2af0   : > { %v7230_v59 = vpop.f32.mrf.mxu0  ;;  %5415 = vmax.xlane.f32.xlu0 %v5414_v16 }
0x2af2   : > { %v5410_v30 = vpop.f32.mrf.mxu0 }
0x2af3   : > { %v5417_v47 = vsel %vm3439_vm13, %v5410_v30, -inf }
0x2af4   : > { %v7231_v60 = vpop.f32.mrf.mxu0  ;;  %5418 = vmax.xlane.f32.xlu1 %v5417_v47 }
0x2afa   : > { %v8784_v61 = vpop.f32.mrf.mxu0 }
0x2afb   : > { %v5537_v62 = vsel %vm389_vm2, %v8784_v61, -inf }
0x2afc   : > { %v7242_v31 = vpop.f32.mrf.mxu0  ;;  %5538 = vmax.xlane.f32.xlu0 %v5537_v62 }
0x2afe   : > { %v5533_v63 = vpop.f32.mrf.mxu0 }
0x2aff   : > { %v5540_v2 = vsel %vm3439_vm13, %v5533_v63, -inf }
0x2b00   : > { %v7243_v5 = vpop.f32.mrf.mxu0  ;;  %5541 = vmax.xlane.f32.xlu1 %v5540_v2 }
0x2b02   : > { %v5653_v6 = vpop.f32.mrf.mxu0 }
0x2b03   : > { %v5660_v22 = vsel %vm389_vm2, %v5653_v6, -inf }
0x2b04   : > { %v7254_v9 = vpop.f32.mrf.mxu0  ;;  %5661 = vmax.xlane.f32.xlu0 %v5660_v22 }
0x2b06   : > { %v5656_v10 = vpop.f32.mrf.mxu0 }
0x2b07   : > { %v5291_v12 = vpop.xlane.xlu1 %5290  ;;  %v5663_v56 = vsel %vm3439_vm13, %v5656_v10, -inf }
0x2b08   : > { %v5295_v14 = vsub.f32 %v5282_v51, %v5291_v12  ;;  %v7255_v15 = vpop.f32.mrf.mxu0  ;;  %5664 = vmax.xlane.f32.xlu1 %v5663_v56 }
0x2b0a   : > { %v5297_v17 = vmul.f32 1.442695, %v5295_v14 }
0x2b0b   : > { %v5294_v18 = vpop.xlane.xlu0 %5293 }
0x2b0c   : > { %7744 = vpow2.f32 %v5297_v17  ;;  %v5296_v19 = vsub.f32 %v5285_v54, %v5294_v18 }
0x2b0e   : > { %v5299_v25 = vmul.f32 1.442695, %v5296_v19 }
0x2b10   : > { %7746 = vpow2.f32 %v5299_v25 }
0x2b19   : > { %v8791_v26 = vpop.eup %7744 }
0x2b1a   : > { %v5301_v27 = vsel %vm389_vm2, %v8791_v26, 0.0 }
0x2b1b   : > { %5302 = vadd.xlane.f32.xlu0 %v5301_v27 }
0x2b1d   : > { %v7747_v29 = vpop.eup %7746 }
0x2b1e   : > { %v5304_v32 = vsel %vm3439_vm13, %v7747_v29, 0.0 }
0x2b1f   : > { %5305 = vadd.xlane.f32.xlu1 %v5304_v32 }
0x2b30   : > { %5437 = vrot.lane.b32.xlu1 %v8726_v4, %s7869_s18 }
0x2b79   : > { %v5416_v33 = vpop.xlane.xlu0 %5415 }
0x2b7a   : > { %v5420_v21 = vsub.f32 %v5407_v58, %v5416_v33 }
0x2b7c   : > { %v5422_v35 = vmul.f32 1.442695, %v5420_v21 }
0x2b7d   : > { %v5419_v39 = vpop.xlane.xlu1 %5418 }
0x2b7e   : > { %7748 = vpow2.f32 %v5422_v35  ;;  %v5421_v48 = vsub.f32 %v5410_v30, %v5419_v39 }
0x2b80   : > { %v5424_v8 = vmul.f32 1.442695, %v5421_v48 }
0x2b82   : > { %7750 = vpow2.f32 %v5424_v8 }
0x2b85   : > { %v5539_v50 = vpop.xlane.xlu0 %5538 }
0x2b86   : > { %v5543_v11 = vsub.f32 %v8784_v61, %v5539_v50  ;;  %v7558_v50 = vld [vmem:[#allocation4 + $0x390] ss:$8 sps:$4 sm:$0xff]  }
0x2b88   : > { %v5545_v52 = vmul.f32 1.442695, %v5543_v11 }
0x2b89   : > { %v5542_v20 = vpop.xlane.xlu1 %5541 }
0x2b8a   : > { %v5544_v40 = vsub.f32 %v5533_v63, %v5542_v20 }
0x2b8b   : > { %v7749_v36 = vpop.eup %7748 }
0x2b8c   : > { %v5547_v42 = vmul.f32 1.442695, %v5544_v40  ;;  %v5426_v24 = vsel %vm389_vm2, %v7749_v36, 0.0 }
0x2b8d   : > { %5427 = vadd.xlane.f32.xlu0 %v5426_v24  ;;  %v5662_v51 = vpop.xlane.xlu0 %5661 }
0x2b8e   : > { %7752 = vpow2.f32 %v5547_v42  ;;  %v5666_v53 = vsub.f32 %v5653_v6, %v5662_v51  ;;  %v7559_v51 = vld [vmem:[#allocation4 + $0x380] ss:$8 sps:$4 sm:$0xff]  }
0x2b8f   : > { %v7751_v41 = vpop.eup %7750 }
0x2b90   : > { %v5429_v49 = vsel %vm3439_vm13, %v7751_v41, 0.0  ;;  %v5668_v54 = vmul.f32 1.442695, %v5666_v53 }
0x2b91   : > { %v5665_v3 = vpop.xlane.xlu1 %5664  ;;  %5430 = vadd.xlane.f32.xlu1 %v5429_v49 }
0x2b92   : > { %v5667_v28 = vsub.f32 %v5656_v10, %v5665_v3  ;;  %v7556_v3 = vld [vmem:[#allocation4 + $0x3b0] ss:$8 sps:$4 sm:$0xff]  }
0x2b93   : > { %7263 = vmatpush3.bf16.msra.mxu0 %v7556_v3  ;;  %v7568_v3 = vld [vmem:[#allocation4 + $0x3d4] ss:$8 sps:$4 sm:$0xff]  }
0x2b94   : > { %v5670_v43 = vmul.f32 1.442695, %v5667_v28  ;;  %7264 = vmatprep.subr.bf16.mxu0 %v7864_v0 }
0x2b96   : > { %7754 = vpow2.f32 %v5670_v43 }
0x2b97   : > { %7756 = vpow2.f32 %v5545_v52 }
0x2b98   : > { %7758 = vpow2.f32 %v5668_v54 }
0x2b9b   : > { %v8800_v44 = vpop.eup %7752 }
0x2b9c   : > { %v5552_v45 = vsel %vm3439_vm13, %v8800_v44, 0.0 }
0x2b9d   : > { %5553 = vadd.xlane.f32.xlu1 %v5552_v45 }
0x2ba3   : > { %v8804_v7 = vpop.eup %7754  ;;  %5313 = vrot.lane.b32.xlu0 %v8726_v4, %s7867_s16 }
0x2ba4   : > { %v5675_v46 = vsel %vm3439_vm13, %v8804_v7, 0.0  ;;  %v7757_v55 = vpop.eup %7756  ;;  %v5303_v30 = vpop.xlane.xlu0 %5302 }
0x2ba5   : > { %5676 = vadd.xlane.f32.xlu1 %v5675_v46  ;;  %v5549_v57 = vsel %vm389_vm2, %v7757_v55, 0.0  ;;  %v7759_v58 = vpop.eup %7758 }
0x2ba6   : > { %v5672_v16 = vsel %vm389_vm2, %v7759_v58, 0.0 }
0x2ba8   : > { %v5306_v59 = vpop.xlane.xlu1 %5305 }
0x2ba9   : > { %7760 = vrcp.f32 %v5306_v59 }
0x2baa   : > { %7762 = vrcp.f32 %v5303_v30 }
0x2bac   : > { %v5438_v60 = vpop.permute.xlu1 %5437 }
0x2bb6   : > { %5560 = vrot.lane.b32.xlu1 %v8726_v4, %s7870_s19  ;;  %v7761_v47 = vpop.eup %7760 }
0x2bb7   : > { %v7763_v62 = vpop.eup %7762  ;;  %v5310_v31 = vmul.f32 %v7761_v47, %v7747_v29 }
0x2bb8   : > { %v5309_v5 = vmul.f32 %v7763_v62, %v8791_v26 }
0x2bba   : > { %v5311_v22 = vpack.c.bf16 %v5310_v31, %v5309_v5 }
0x2bc2   : > { %5550 = vadd.xlane.f32.xlu0 %v5549_v57 }
0x2bc6   : > { %5673 = vadd.xlane.f32.xlu0 %v5672_v16 }
0x2bdc   : > { %5683 = vrot.lane.b32.xlu0 %v8726_v4, %s7872_s21  ;;  %v5443_v4 = vsel %vm393_vm1, %v5438_v60, 0 }
0x2c16   : > { %v5428_v61 = vpop.xlane.xlu0 %5427 }
0x2c17   : > { %7764 = vrcp.f32 %v5428_v61 }
0x2c1a   : > { %v5431_v63 = vpop.xlane.xlu1 %5430  ;;  %v5314_v2 = vpop.permute.xlu0 %5313 }
0x2c1b   : > { %7766 = vrcp.f32 %v5431_v63  ;;  %v5319_v6 = vsel %vm393_vm1, %v5314_v2, 0 }
0x2c1c   : > { %7221 = vmatpush3.bf16.msra.mxu1 %v5319_v6 }
0x2c1d   : > { %7232 = vmatprep.subr.bf16.mxu1 %v7864_v0 }
0x2c1f   : > { %7223 = vmatmul.mubr.msk.bf16.vlgmr.msra.gmra.mxu1 %vm389_vm2, %v5311_v22 }
0x2c20   : > { %7233 = vmatpush3.bf16.msra.mxu1 %v5443_v4  ;;  %7234 = vmatprep.mubr.msk.bf16.mxu1 %vm7865_vm0, %v7864_v0 }
0x2c21   : > { %7244 = vmatprep.subr.bf16.mxu1 %v7864_v0 }
0x2c24   : > { %v7765_v9 = vpop.eup %7764 }
0x2c25   : > { %v5434_v12 = vmul.f32 %v7765_v9, %v7749_v36 }
0x2c26   : > { %v5554_v14 = vpop.xlane.xlu1 %5553 }
0x2c27   : > { %7768 = vrcp.f32 %v5554_v14  ;;  %v6524_v14 = vld [vmem:[%s8926_s8 + $0x26] ss:$0 sm:$0xff] }
0x2c28   : > { %v7767_v10 = vpop.eup %7766 }
0x2c29   : > { %v5435_v56 = vmul.f32 %v7767_v10, %v7751_v41 }
0x2c2b   : > { %v5436_v15 = vpack.c.bf16 %v5435_v56, %v5434_v12 }
0x2c2d   : > { %7235 = vmatmul.mubr.msk.bf16.vlgmr.msra.gmra.mxu1 %vm389_vm2, %v5436_v15 }
0x2c2e   : > { %v5677_v17 = vpop.xlane.xlu1 %5676  ;;  %7246 = vmatprep.mubr.msk.bf16.mxu1 %vm7865_vm0, %v7864_v0 }
0x2c32   : > { %v5561_v18 = vpop.permute.xlu1 %5560 }
0x2c33   : > { %v5566_v19 = vsel %vm393_vm1, %v5561_v18, 0 }
0x2c34   : > { %7245 = vmatpush3.bf16.msra.mxu1 %v5566_v19  ;;  %v7769_v27 = vpop.eup %7768 }
0x2c35   : > { %7256 = vmatprep.subr.bf16.mxu1 %v7864_v0  ;;  %v5558_v32 = vmul.f32 %v7769_v27, %v8800_v44 }
0x2c4b   : > { %v5551_v25 = vpop.xlane.xlu0 %5550 }
0x2c4c   : > { %7770 = vrcp.f32 %v5551_v25 }
0x2c4f   : > { %v5674_v26 = vpop.xlane.xlu0 %5673 }
0x2c50   : > { %7772 = vrcp.f32 %v5674_v26 }
0x2c51   : > { %7774 = vrcp.f32 %v5677_v17 }
0x2c53   : > { %v5684_v21 = vpop.permute.xlu0 %5683 }
0x2c54   : > { %v5689_v48 = vsel %vm393_vm1, %v5684_v21, 0 }
0x2c59   : > { %v7771_v29 = vpop.eup %7770 }
0x2c5a   : > { %v5557_v33 = vmul.f32 %v7771_v29, %v7757_v55 }
0x2c5c   : > { %v5559_v35 = vpack.c.bf16 %v5558_v32, %v5557_v33 }
0x2c5d   : > { %v7773_v39 = vpop.eup %7772 }
0x2c5e   : > { %7247 = vmatmul.mubr.msk.bf16.vlgmr.msra.gmra.mxu1 %vm389_vm2, %v5559_v35  ;;  %v7775_v8 = vpop.eup %7774  ;;  %v5680_v20 = vmul.f32 %v7773_v39, %v7759_v58 }
0x2c5f   : > { %7257 = vmatpush3.bf16.msra.mxu1 %v5689_v48  ;;  %7258 = vmatprep.mubr.msk.bf16.mxu1 %vm7865_vm0, %v7864_v0  ;;  %v5681_v40 = vmul.f32 %v7775_v8, %v8804_v7  ;;  %v7557_v7 = vld [vmem:[#allocation4 + $0x3a0] ss:$8 sps:$4 sm:$0xff]  }
0x2c60   : > { %7265 = vmatpush3.bf16.msra.mxu0 %v7557_v7  ;;  %v7574_v7 = vld [vmem:[#allocation4 + $0x4e0] ss:$8 sps:$4 sm:$0xff]  }
0x2c61   : > { %v5682_v36 = vpack.c.bf16 %v5681_v40, %v5680_v20  ;;  %7266 = vmatprep.subr.bf16.mxu0 %v7864_v0 }
0x2c64   : > { %7267 = vmatpush3.bf16.msra.mxu0 %v7558_v50  ;;  %v7575_v50 = vld [vmem:[#allocation4 + $0x460] ss:$8 sps:$4 sm:$0xff]  }
0x2c65   : > { %7268 = vmatprep.subr.bf16.mxu0 %v7864_v0 }
0x2c66   : > { %7259 = vmatmul.mubr.msk.bf16.vlgmr.msra.gmra.mxu1 %vm389_vm2, %v5682_v36 }
0x2c67   : > { %5950 = vmatprep.mubr.bf16.mxu1 %v7866_v13 }
0x2c68   : > { %7269 = vmatpush3.bf16.msra.mxu0 %v7559_v51  ;;  %v7578_v51 = vld [vmem:[#allocation4 + $0x4c0] ss:$8 sps:$4 sm:$0xff]  }
0x2cdf   : > { %v5355_v42 = vpop.f32.mrf.mxu1 }
0x2ce1   : > { %v7224_v24 = vpop.f32.mrf.mxu1 }
0x2ce2   : > { %v7562_v24 = vld [vmem:[#allocation4 + $0x3f4] ss:$8 sps:$4 sm:$0xff]  }
0x2ce3   : > { %v5358_v41 = vpop.f32.mrf.mxu1  ;;  %5926 = vmatprep.subr.bf16.mxu1 %v7562_v24 }
0x2ce5   : > { %v7225_v49 = vpop.f32.mrf.mxu1 }
0x2ce6   : > { %v7563_v49 = vld [vmem:[#allocation4 + $0x3e0] ss:$8 sps:$4 sm:$0xff]  }
0x2ced   : > { %v5479_v28 = vpop.f32.mrf.mxu1 }
0x2cef   : > { %v7236_v43 = vpop.f32.mrf.mxu1 }
0x2cf0   : > { %v7569_v43 = vld [vmem:[#allocation4 + $0x3c0] ss:$8 sps:$4 sm:$0xff]  }
0x2cf1   : > { %v5482_v44 = vpop.f32.mrf.mxu1 }
0x2cf2   : > { %v7373_v45 = vpack.i.bf16 %v5482_v44, %v5479_v28  ;;  %v7566_v28 = vld [vmem:[#allocation4 + $0x3d0] ss:$8 sps:$4 sm:$0xff]   ;;  %v7571_v44 = vld [vmem:[#allocation4 + $0x3c4] ss:$8 sps:$4 sm:$0xff]  }
0x2cf3   : > { %v7237_v46 = vpop.f32.mrf.mxu1 }
0x2cf4   : > { %7374 = vrot.lane.b32.xlu1 %v7373_v45, %s7872_s21  ;;  %v7572_v45 = vld [vmem:[#allocation4 + $0x4f0] ss:$8 sps:$4 sm:$0xff]  }
0x2cf5   : > { %v7573_v46 = vld [vmem:[#allocation4 + $0x470] ss:$8 sps:$4 sm:$0xff]   ;;  %6827 = vmatprep.subr.bf16.mxu0 %v7572_v45 }
0x2d1e   : > { %v5602_v13 = vpop.f32.mrf.mxu1 }
0x2d20   : > { %v7248_v11 = vpop.f32.mrf.mxu1 }
0x2d21   : > { %v7577_v11 = vld [vmem:[#allocation4 + $0x450] ss:$8 sps:$4 sm:$0xff]  }
0x2d22   : > { %v5605_v52 = vpop.f32.mrf.mxu1 }
0x2d23   : > { %v7378_v53 = vpack.i.bf16 %v5605_v52, %v5602_v13  ;;  %v7576_v13 = vld [vmem:[#allocation4 + $0x4d0] ss:$8 sps:$4 sm:$0xff]   ;;  %v7579_v52 = vld [vmem:[#allocation4 + $0x440] ss:$8 sps:$4 sm:$0xff]  }
0x2d24   : > { %v7249_v54 = vpop.f32.mrf.mxu1 }
0x2d25   : > { %7379 = vrot.lane.b32.xlu0 %v7378_v53, %s7870_s19  ;;  %v7580_v53 = vld [vmem:[#allocation4 + $0x4b0] ss:$8 sps:$4 sm:$0xff]  }
0x2d26   : > { %v5725_v55 = vpop.f32.mrf.mxu1  ;;  %v7581_v54 = vld [vmem:[#allocation4 + $0x430] ss:$8 sps:$4 sm:$0xff]  }
0x2d28   : > { %v7260_v57 = vpop.f32.mrf.mxu1 }
0x2d2a   : > { %v5728_v58 = vpop.f32.mrf.mxu1 }
0x2d2b   : > { %v7383_v16 = vpack.i.bf16 %v5728_v58, %v5725_v55 }
0x2d2c   : > { %v7261_v59 = vpop.f32.mrf.mxu1 }
0x2d2d   : > { %7384 = vrot.lane.b32.xlu1 %v7383_v16, %s7869_s18 }
0x2d66   : > { %v7375_v30 = vpop.permute.xlu1 %7374 }
0x2d67   : > { %v7377_v60 = vunpack.i.h.bf16 %v7375_v30  ;;  %v7376_v61 = vunpack.i.l.bf16 %v7375_v30 }
0x2d69   : > { %v5757_v2 = vsel %vm606_vm4, %v5358_v41, %v7377_v60  ;;  %v5756_v5 = vsel %vm606_vm4, %v5355_v42, %v7376_v61  ;;  %v7560_v41 = vld [vmem:[#allocation4 + $0x3f0] ss:$8 sps:$4 sm:$0xff]   ;;  %v6525_v61 = vld [vmem:[%s8926_s8 + $0x27] ss:$0 sm:$0xff] }
0x2d6a   : > { %5927 = vmatpush1.bf16.msra.mxu1 %v7560_v41 }
0x2d97   : > { %v7380_v47 = vpop.permute.xlu0 %7379 }
0x2d98   : > { %v7382_v62 = vunpack.i.h.bf16 %v7380_v47  ;;  %v7381_v31 = vunpack.i.l.bf16 %v7380_v47 }
0x2d9a   : > { %v5759_v4 = vsel %vm1056_vm5, %v5757_v2, %v7382_v62  ;;  %v5758_v9 = vsel %vm1056_vm5, %v5756_v5, %v7381_v31  ;;  %v6526_v2 = vld [vmem:[%s8926_s8 + $0x30] ss:$0 sm:$0xff] }
0x2d9f   : > { %v7385_v63 = vpop.permute.xlu1 %7384 }
0x2da0   : > { %v7387_v6 = vunpack.i.h.bf16 %v7385_v63  ;;  %v7386_v22 = vunpack.i.l.bf16 %v7385_v63 }
0x2da2   : > { %v5761_v10 = vsel %vm1058_vm6, %v5759_v4, %v7387_v6  ;;  %v5760_v12 = vsel %vm1058_vm6, %v5758_v9, %v7386_v22  ;;  %v7582_v9 = vld [vmem:[#allocation4 + $0x4a0] ss:$8 sps:$4 sm:$0xff]  }
0x2da3   : > { %v5762_v56 = vpack.c.bf16 %v5761_v10, %v5760_v12  ;;  %v7583_v10 = vld [vmem:[#allocation4 + $0x420] ss:$8 sps:$4 sm:$0xff]   ;;  %v7584_v12 = vld [vmem:[#allocation4 + $0x490] ss:$8 sps:$4 sm:$0xff]  }
0x2da5   : > { %7271 = vmatmul.mubr.msk.bf16.vlgmr.msra.gmra.mxu0 %vm554_vm3, %v5762_v56  ;;  %v7585_v56 = vld [vmem:[#allocation4 + $0x410] ss:$8 sps:$4 sm:$0xff]  }
0x2da6   : > { %6828 = vmatpush3.bf16.msra.mxu0 %v7573_v46 }
0x2da7   : > { %6829 = vmatprep.subr.bf16.mxu0 %v7574_v7 }
0x2daa   : > { %6830 = vmatpush3.bf16.msra.mxu0 %v7575_v50 }
0x2dab   : > { %6831 = vmatprep.subr.bf16.mxu0 %v7576_v13 }
0x2dae   : > { %6832 = vmatpush3.bf16.msra.mxu0 %v7577_v11 }
0x2daf   : > { %6833 = vmatprep.subr.bf16.mxu0 %v7578_v51 }
0x2db2   : > { %6834 = vmatpush3.bf16.msra.mxu0 %v7579_v52 }
0x2db3   : > { %6835 = vmatprep.subr.bf16.mxu0 %v7580_v53 }
0x2db6   : > { %6836 = vmatpush3.bf16.msra.mxu0 %v7581_v54 }
0x2db7   : > { %6837 = vmatprep.subr.bf16.mxu0 %v7582_v9 }
0x2dba   : > { %6838 = vmatpush3.bf16.msra.mxu0 %v7583_v10 }
0x2dbb   : > { %6839 = vmatprep.subr.bf16.mxu0 %v7584_v12 }
0x2dbe   : > { %6840 = vmatpush3.bf16.msra.mxu0 %v7585_v56 }
0x2e65   : > { %v5824_v15 = vpop.f32.mrf.mxu0 }
0x2e66   : > { %v5825_v17 = vadd.f32 %v6524_v14, %v5824_v15  ;;  %v7587_v15 = vld [vmem:[#allocation4 + $0x400] ss:$8 sps:$4 sm:$0xff]  }
0x2e67   : > { %v7272_v18 = vpop.f32.mrf.mxu0 }
0x2e68   : > { %v5831_v19 = vadd.f32 %v5825_v17, %v8742_v37  ;;  %v6527_v17 = vld [vmem:[%s8926_s8 + $0x31] ss:$8 sm:$0x3] }
0x2e69   : > { %v5827_v25 = vpop.f32.mrf.mxu0 }
0x2e6a   : > { %v5828_v26 = vadd.f32 %v6524_v14, %v5827_v25  ;;  %v5833_v27 = vsel %vm554_vm3, %v5831_v19, 0.0  ;;  %v7586_v14 = vld [vmem:[#allocation4 + $0x480] ss:$8 sps:$4 sm:$0xff]   ;;  %v5868_v25 = vrot.slane %v6527_v17, %v8011_v23  ;;  %v6528_v23 = vld [vmem:[%s8926_s8 + $0x32] ss:$0 sm:$0xff] }
0x2e6b   : > { %5834 = vadd.xlane.f32.xlu0 %v5833_v27  ;;  %v7273_v29 = vpop.f32.mrf.mxu0  ;;  %6841 = vmatprep.subr.bf16.mxu0 %v7586_v14  ;;  %v6601_v14 = vld [vmem:[%s8922_s4 + $0x2] ss:$0 sm:$0xff] }
0x2e6c   : > { %v5832_v32 = vadd.f32 %v5828_v26, %v8744_v38  ;;  %v7565_v38 = vld [vmem:[#allocation4 + $0x3e4] ss:$8 sps:$4 sm:$0xff]   ;;  %6842 = vmatpush3.bf16.msra.mxu0 %v7587_v15 }
0x2e6d   : > { %5928 = vmatprep.subr.bf16.mxu1 %v7565_v38 }
0x2e6e   : > { %v5836_v33 = vsel %vm3220_vm12, %v5832_v32, 0.0  ;;  %5929 = vmatpush1.bf16.msra.mxu1 %v7563_v49 }
0x2e6f   : > { %5837 = vadd.xlane.f32.xlu1 %v5836_v33  ;;  %5930 = vmatprep.subr.bf16.mxu1 %v7568_v3 }
0x2e72   : > { %5931 = vmatpush1.bf16.msra.mxu1 %v7566_v28 }
0x2e73   : > { %5932 = vmatprep.subr.bf16.mxu1 %v7571_v44 }
0x2e76   : > { %5933 = vmatpush1.bf16.msra.mxu1 %v7569_v43 }
0x2e77   : > { %7274 = vmatprep.subr.bf16.mxu1 %v7864_v0 }
0x2ef4   : > { %v5835_v21 = vpop.xlane.xlu0 %5834 }
0x2ef5   : > { %v5839_v35 = vmul.f32 0.015625, %v5835_v21 }
0x2ef7   : > { %v5841_v39 = vsub.f32 %v5831_v19, %v5839_v35  ;;  %v5872_v19 = vrot.slane %v6527_v17, %v8025_v34 }
0x2ef8   : > { %v5838_v48 = vpop.xlane.xlu1 %5837 }
0x2ef9   : > { %v5840_v8 = vmul.f32 0.015625, %v5838_v48  ;;  %v5843_v20 = vmul.f32 %v5841_v39, %v5841_v39 }
0x2efb   : > { %v5842_v40 = vsub.f32 %v5832_v32, %v5840_v8  ;;  %v5845_v37 = vsel %vm554_vm3, %v5843_v20, 0.0 }
0x2efc   : > { %5846 = vadd.xlane.f32.xlu0 %v5845_v37 }
0x2efd   : > { %v5844_v36 = vmul.f32 %v5842_v40, %v5842_v40 }
0x2eff   : > { %v5848_v42 = vsel %vm3220_vm12, %v5844_v36, 0.0 }
0x2f00   : > { %5849 = vadd.xlane.f32.xlu0 %v5848_v42 }
0x2f85   : > { %v5847_v55 = vpop.xlane.xlu0 %5846 }
0x2f86   : > { %v5851_v57 = vmul.f32 0.015625, %v5847_v55 }
0x2f88   : > { %v5853_v58 = vadd.f32 1e-05, %v5851_v57  ;;  %v7588_v57 = vld [vmem:[%s8921_s3 + $0x28] sm:$0xff]  }
0x2f89   : > { %v5850_v16 = vpop.xlane.xlu0 %5849 }
0x2f8a   : > { %7776 = vrsqrt.f32 %v5853_v58  ;;  %v5852_v59 = vmul.f32 0.015625, %v5850_v16  ;;  %v7589_v58 = vld [vmem:[%s8921_s3 + $0x20] sm:$0xff]   ;;  %v7590_v16 = vld [vmem:[%s8921_s3 + $0x18] sm:$0xff]  }
0x2f8c   : > { %v5854_v30 = vadd.f32 1e-05, %v5852_v59  ;;  %v7591_v59 = vld [vmem:[%s8921_s3 + $0x10] sm:$0xff]  }
0x2f8e   : > { %7778 = vrsqrt.f32 %v5854_v30 }
0x2f97   : > { %v7777_v47 = vpop.eup %7776 }
0x2f98   : > { %v5857_v60 = vmul.f32 %v7777_v47, %v5841_v39 }
0x2f9a   : > { %v5859_v31 = vmul.f32 %v6525_v61, %v5857_v60 }
0x2f9b   : > { %v7779_v62 = vpop.eup %7778 }
0x2f9c   : > { %v5858_v63 = vmul.f32 %v7779_v62, %v5842_v40  ;;  %v5861_v6 = vadd.f32 %v6526_v2, %v5859_v31 }
0x2f9e   : > { %v5860_v5 = vmul.f32 %v6525_v61, %v5858_v63 }
0x2fa0   : > { %v5862_v22 = vadd.f32 %v6526_v2, %v5860_v5  ;;  %v6529_v5 = vld [vmem:[%s8926_s8 + $0x33] ss:$0 sm:$0xff] }
0x2fa2   : > { %v5863_v4 = vpack.c.bf16 %v5862_v22, %v5861_v6 }
0x2fa4   : > { %6584 = vmatmul.mubr.msk.bf16.vlgmr.msra.gmra.mxu1 %vm554_vm3, %v5863_v4  ;;  %v6530_v4 = vld [vmem:[%s8926_s8 + $0x34] ss:$0 sm:$0xff] }
0x2fa5   : > { %7282 = vmatprep.mubr.msk.bf16.mxu1 %vm7865_vm0, %v7864_v0  ;;  %7275 = vmatpush3.bf16.msra.mxu1 %v7588_v57 }
0x2fa6   : > { %7276 = vmatprep.subr.bf16.mxu1 %v7864_v0 }
0x2fa9   : > { %7277 = vmatpush3.bf16.msra.mxu1 %v7589_v58 }
0x2faa   : > { %7278 = vmatprep.subr.bf16.mxu1 %v7864_v0 }
0x2fad   : > { %7279 = vmatpush3.bf16.msra.mxu1 %v7590_v16 }
0x2fae   : > { %7280 = vmatprep.subr.bf16.mxu1 %v7864_v0 }
0x2fb1   : > { %7281 = vmatpush3.bf16.msra.mxu1 %v7591_v59 }
0x3064   : > { %v5952_v18 = vpop.f32.mrf.mxu1 }
0x3065   : > { %v5953_v33 = vadd.f32 %v5952_v18, %v5868_v25 }
0x3066   : > { %v5954_v26 = vpop.f32.mrf.mxu1 }
0x3067   : > { %v5955_v29 = vadd.f32 %v5954_v26, %v5872_v19  ;;  %v5961_v20 = vmax.f32 %v5953_v33, 0.0 }
0x3068   : > { %v5956_v27 = vpop.f32.mrf.mxu1 }
0x3069   : > { %v5957_v32 = vadd.f32 %v5956_v27, %v5868_v25  ;;  %v5962_v48 = vmax.f32 %v5955_v29, 0.0 }
0x306a   : > { %v5958_v21 = vpop.f32.mrf.mxu1 }
0x306b   : > { %v5959_v35 = vadd.f32 %v5958_v21, %v5872_v19  ;;  %v5963_v39 = vmax.f32 %v5957_v32, 0.0 }
0x306d   : > { %v5964_v8 = vmax.f32 %v5959_v35, 0.0  ;;  %v5965_v37 = vpack.c.bf16 %v5963_v39, %v5961_v20 }
0x306f   : > { %v5966_v40 = vpack.c.bf16 %v5964_v8, %v5962_v48 }
0x3071   : > { %6095 = vmatprep.mubr.bf16.mxu0 %v5966_v40 }
0x3072   : > { %6096 = vmatmul.mubr.bf16.vlgmr.msra.gmra.mxu0 %v5965_v37 }
0x3132   : > { %v6843_v36 = vpop.f32.mrf.mxu0 }
0x3134   : > { %v6844_v34 = vpop.f32.mrf.mxu0 }
0x3135   : > { %v6845_v42 = vadd.f32 %v6844_v34, %v6843_v36 }
0x3136   : > { %v6846_v24 = vpop.f32.mrf.mxu0 }
0x3137   : > { %v6098_v41 = vadd.f32 %v6845_v42, %v6528_v23 }
0x3138   : > { %v6847_v38 = vpop.f32.mrf.mxu0 }
0x3139   : > { %v6848_v49 = vadd.f32 %v6847_v38, %v6846_v24  ;;  %v6104_v3 = vadd.f32 %v6098_v41, %v5861_v6 }
0x313b   : > { %v6101_v28 = vadd.f32 %v6848_v49, %v6528_v23  ;;  %v6106_v43 = vsel %vm554_vm3, %v6104_v3, 0.0 }
0x313c   : > { %6107 = vadd.xlane.f32.xlu1 %v6106_v43 }
0x313d   : > { %v6105_v44 = vadd.f32 %v6101_v28, %v5862_v22 }
0x313f   : > { %v6109_v45 = vsel %vm3220_vm12, %v6105_v44, 0.0 }
0x3140   : > { %6110 = vadd.xlane.f32.xlu0 %v6109_v45 }
0x31c5   : > { %v6108_v46 = vpop.xlane.xlu1 %6107 }
0x31c6   : > { %v6112_v7 = vmul.f32 0.015625, %v6108_v46 }
0x31c8   : > { %v6114_v50 = vsub.f32 %v6104_v3, %v6112_v7 }
0x31c9   : > { %v6111_v13 = vpop.xlane.xlu0 %6110 }
0x31ca   : > { %v6113_v11 = vmul.f32 0.015625, %v6111_v13  ;;  %v6116_v51 = vmul.f32 %v6114_v50, %v6114_v50 }
0x31cc   : > { %v6115_v52 = vsub.f32 %v6105_v44, %v6113_v11  ;;  %v6118_v53 = vsel %vm554_vm3, %v6116_v51, 0.0 }
0x31cd   : > { %6119 = vadd.xlane.f32.xlu1 %v6118_v53 }
0x31ce   : > { %v6117_v54 = vmul.f32 %v6115_v52, %v6115_v52 }
0x31d0   : > { %v6121_v55 = vsel %vm3220_vm12, %v6117_v54, 0.0 }
0x31d1   : > { %6122 = vadd.xlane.f32.xlu0 %v6121_v55 }
0x3256   : > { %v6120_v30 = vpop.xlane.xlu1 %6119 }
0x3257   : > { %v6124_v47 = vmul.f32 0.015625, %v6120_v30 }
0x3259   : > { %v6126_v60 = vadd.f32 1e-05, %v6124_v47 }
0x325a   : > { %v6123_v61 = vpop.xlane.xlu0 %6122 }
0x325b   : > { %7780 = vrsqrt.f32 %v6126_v60  ;;  %v6125_v62 = vmul.f32 0.015625, %v6123_v61 }
0x325d   : > { %v6127_v31 = vadd.f32 1e-05, %v6125_v62 }
0x325f   : > { %7782 = vrsqrt.f32 %v6127_v31 }
0x3268   : > { %v7781_v63 = vpop.eup %7780 }
0x3269   : > { %v6130_v2 = vmul.f32 %v7781_v63, %v6114_v50 }
0x326b   : > { %v6132_v6 = vmul.f32 %v6529_v5, %v6130_v2 }
0x326c   : > { %v7783_v0 = vpop.eup %7782 }
0x326d   : > { %v6131_v22 = vmul.f32 %v7783_v0, %v6115_v52  ;;  %v6134_v10 = vadd.f32 %v6530_v4, %v6132_v6 }
0x326f   : > { %v6133_v9 = vmul.f32 %v6529_v5, %v6131_v22 }
0x3271   : > { %v6135_v12 = vadd.f32 %v6530_v4, %v6133_v9 }
0x3273   : > { %v6136_v56 = vpack.c.bf16 %v6135_v12, %v6134_v10 }
0x3275   : > { %7283 = vmatmul.mubr.msk.bf16.vlgmr.msra.gmra.mxu1 %vm554_vm3, %v6136_v56 }
0x3335   : > { %v6211_v15 = vpop.f32.mrf.mxu1 }
0x3336   : > { %v6212_v17 = vadd.f32 %v6601_v14, %v6211_v15 }
0x3337   : > { %v7284_v18 = vpop.f32.mrf.mxu1 }
0x3338   : > { %v6218_v19 = vsub.f32 0.0, %v6212_v17 }
0x3339   : > { %v6214_v25 = vpop.f32.mrf.mxu1 }
0x333a   : > { %v6220_v26 = vmul.f32 1.442695, %v6218_v19  ;;  %v6215_v27 = vadd.f32 %v6601_v14, %v6214_v25 }
0x333b   : > { %v7285_v29 = vpop.f32.mrf.mxu1 }
0x333c   : > { %7784 = vpow2.f32 %v6220_v26  ;;  %v6219_v32 = vsub.f32 0.0, %v6215_v27 }
0x333e   : > { %v6222_v33 = vmul.f32 1.442695, %v6219_v32 }
0x3340   : > { %7786 = vpow2.f32 %v6222_v33 }
0x3349   : > { %v7785_v21 = vpop.eup %7784 }
0x334a   : > { %v6224_v35 = vadd.f32 1.0, %v7785_v21 }
0x334c   : > { %7788 = vrcp.f32 %v6224_v35 }
0x334d   : > { %v7787_v39 = vpop.eup %7786 }
0x334e   : > { %v6225_v48 = vadd.f32 1.0, %v7787_v39 }
0x3350   : > { %7790 = vrcp.f32 %v6225_v48 }
0x3359   : > { %v7789_v8 = vpop.eup %7788 }
0x335a   : > { %v6231_v20 = vsel %vm6230_vm14, %v7789_v8, %v6212_v17 }
0x335b   : > { %6233 = vst.msk [vmem:[%s379_s25] sm:$0xff] %vm389_vm2, %v6231_v20 }
0x335d   : > { %v7791_v40 = vpop.eup %7790 }
0x335e   : > { %v6232_v37 = vsel %vm6230_vm14, %v7791_v40, %v6215_v27 }
0x335f   : > { %6234 = vst.msk [vmem:[%s379_s25 + $0x8] sm:$0x1] %vm3439_vm13, %v6232_v37 }
0x3360 PF: > { %s21_s30 = sadd.s32 1, %s7858_s30  }
0x3361   : > { %p18_p2 = scmp.ge.s32.totalorder %s21_s30, 4  }
0x3363   :  { %20 = sbr.rel (!%p18_p2) target bundleno = 2 (0x2), region = 106 }
0x3368   :  { %6256 = vsyncpa [#allocation3], 1 }
0x3369   :  { %6258 = vsyncpa [#allocation3 + $0x1], 1 }
0x336a   :  { %6259 = vsyncpa [#allocation5], 1 }

</bundles_post_ra>
